<compile_context>
chip_gen: v6e
topology: v6e:2x2x1
jax: 0.10.0
libtpu: 0.0.40
codegen_flags: <defaults>
</compile_context>

<pallas_src>
import jax
import jax.numpy as jnp
from jax.experimental import pallas as pl
from jax.experimental.pallas import tpu as pltpu

INPUT_SIZE = 28
HIDDEN = 64            # real hidden size (nn.LSTM hidden_size=64)
HP = 128               # hidden padded to one full 128-lane vreg per gate
NUM_CLASSES = 10
OUT_PAD = 128          # lane-dense padded output width
T = 8                  # sequence length (small toy sequence)
B = 2                  # real batch
BP = 8                 # batch padded to a full f32 sublane tile


def rnn_kernel(x_ref, wih0_ref, whh0_ref, b0_ref, w1_ref, b1_ref,
               wout_ref, bout_ref, y_ref):
    # x_ref:    (T*BP, INPUT_SIZE) bf16 -- time-major, batch zero-padded to BP rows
    # wih0_ref: (INPUT_SIZE, 4*HP) bf16 -- layer-0 input weights, gate-padded
    # whh0_ref: (HP, 4*HP)         bf16 -- layer-0 recurrent weights, gate/row-padded
    # b0_ref:   (1, 4*HP)          f32  -- layer-0 bias (b_ih + b_hh), gate-padded
    # w1_ref:   (2*HP, 4*HP)       bf16 -- layer-1 stacked [w_ih; w_hh], padded
    # b1_ref:   (1, 4*HP)          f32
    # wout_ref: (HP, OUT_PAD)      bf16 -- Linear(64, 10) weights, lane-dense padded
    # bout_ref: (1, OUT_PAD)       f32
    # y_ref:    (BP, OUT_PAD)      f32  -- real logits live in [:B, :NUM_CLASSES]
    x = x_ref[...]
    wih0 = wih0_ref[...]
    whh0 = whh0_ref[...]
    w1 = w1_ref[...]

    # Hoisted layer-0 input projection for all timesteps at once, bias folded in.
    xg_all = (jnp.dot(x, wih0, preferred_element_type=jnp.float32)
              + jnp.broadcast_to(b0_ref[...], (T * BP, 4 * HP)))      # (T*BP, 4*HP) f32

    # Hoist the layer-1 bias broadcast out of the unrolled loop.
    b1_b = jnp.broadcast_to(b1_ref[...], (BP, 4 * HP))

    # hx = None -> zero initial hidden/cell state (padded lanes stay exactly zero).
    h0 = jnp.zeros((BP, HP), jnp.float32)
    c0 = jnp.zeros((BP, HP), jnp.float32)
    h1 = jnp.zeros((BP, HP), jnp.float32)
    c1 = jnp.zeros((BP, HP), jnp.float32)

    def apply_gates(gates, c):
        # Gate order (i, f, g, o) matches PyTorch; each slice is a full 128-lane vreg.
        i = jax.nn.sigmoid(gates[:, 0 * HP:1 * HP])
        f = jax.nn.sigmoid(gates[:, 1 * HP:2 * HP])
        g = jnp.tanh(gates[:, 2 * HP:3 * HP])
        o = jax.nn.sigmoid(gates[:, 3 * HP:4 * HP])
        c_new = f * c + i * g
        h_new = o * jnp.tanh(c_new)
        return h_new, c_new

    # Static unroll over the short time dimension (T is a compile-time constant).
    for t in range(T):
        # Layer 0: single recurrent matmul per step (input projection precomputed).
        g0 = xg_all[t * BP:(t + 1) * BP, :] + jnp.dot(
            h0.astype(jnp.bfloat16), whh0, preferred_element_type=jnp.float32)
        h0, c0 = apply_gates(g0, c0)

        # Layer 1: fused input+recurrent matmul over a 256-deep contraction.
        inp1 = jnp.concatenate(
            [h0.astype(jnp.bfloat16), h1.astype(jnp.bfloat16)], axis=1)   # (BP, 2*HP)
        g1 = jnp.dot(inp1, w1, preferred_element_type=jnp.float32) + b1_b
        h1, c1 = apply_gates(g1, c1)

    # Final Linear on the last timestep of the top layer; lane-dense (BP, 128) store.
    y = jnp.dot(h1.astype(jnp.bfloat16), wout_ref[...],
                preferred_element_type=jnp.float32) + bout_ref[...]
    y_ref[...] = y


def _pad_gate_cols(w_t):
    """(D, 4*HIDDEN) gate-major columns -> (D, 4*HP), each gate padded to HP lanes."""
    d = w_t.shape[0]
    out = jnp.zeros((d, 4 * HP), jnp.float32)
    for g in range(4):
        out = out.at[:, g * HP:g * HP + HIDDEN].set(w_t[:, g * HIDDEN:(g + 1) * HIDDEN])
    return out


def _pad_gate_bias(b):
    out = jnp.zeros((4 * HP,), jnp.float32)
    for g in range(4):
        out = out.at[g * HP:g * HP + HIDDEN].set(b[g * HIDDEN:(g + 1) * HIDDEN])
    return out[None, :]


def prepare_params(raw):
    """Host-side repack of PyTorch-layout params into the kernel's padded bf16 layout."""
    (w_ih0, w_hh0, b_ih0, b_hh0,
     w_ih1, w_hh1, b_ih1, b_hh1,
     w_out, b_out) = raw

    # Layer 0.
    wih0_p = _pad_gate_cols(w_ih0.T)                                   # (I, 4*HP)
    whh0_p = jnp.zeros((HP, 4 * HP), jnp.float32)
    whh0_p = whh0_p.at[:HIDDEN, :].set(_pad_gate_cols(w_hh0.T))        # (HP, 4*HP)
    b0_p = _pad_gate_bias(b_ih0 + b_hh0)                               # (1, 4*HP)

    # Layer 1: stacked [w_ih; w_hh] for the fused [h0_pad, h1_pad] contraction.
    w1_p = jnp.zeros((2 * HP, 4 * HP), jnp.float32)
    w1_p = w1_p.at[:HIDDEN, :].set(_pad_gate_cols(w_ih1.T))
    w1_p = w1_p.at[HP:HP + HIDDEN, :].set(_pad_gate_cols(w_hh1.T))     # (2*HP, 4*HP)
    b1_p = _pad_gate_bias(b_ih1 + b_hh1)

    # Output Linear(64, 10), lane-dense padded.
    wout_p = jnp.zeros((HP, OUT_PAD), jnp.float32)
    wout_p = wout_p.at[:HIDDEN, :NUM_CLASSES].set(w_out.T)             # (HP, 128)
    bout_p = jnp.zeros((1, OUT_PAD), jnp.float32).at[0, :NUM_CLASSES].set(b_out)

    bf16 = jnp.bfloat16
    return (wih0_p.astype(bf16), whh0_p.astype(bf16), b0_p,
            w1_p.astype(bf16), b1_p,
            wout_p.astype(bf16), bout_p)


def rnn_forward(x, kparams):
    (wih0_p, whh0_p, b0_p, w1_p, b1_p, wout_p, bout_p) = kparams
    bx, tx, isz = x.shape
    assert tx == T and bx <= BP and isz == INPUT_SIZE

    # (B, T, I) -> time-major (T, BP, I) with the batch zero-padded to a full
    # sublane tile -> flat (T*BP, I), so per-step reads are 8-row-aligned slices.
    x_tm = jnp.zeros((T, BP, INPUT_SIZE), jnp.float32).at[:, :bx, :].set(
        jnp.transpose(x, (1, 0, 2)))
    x_flat = x_tm.reshape(T * BP, INPUT_SIZE).astype(jnp.bfloat16)

    y_pad = pl.pallas_call(
        rnn_kernel,
        out_shape=jax.ShapeDtypeStruct((BP, OUT_PAD), jnp.float32),
        in_specs=[pl.BlockSpec(memory_space=pltpu.MemorySpace.VMEM)] * 8,
        out_specs=pl.BlockSpec(memory_space=pltpu.MemorySpace.VMEM),
    )(x_flat, wih0_p, whh0_p, b0_p, w1_p, b1_p, wout_p, bout_p)

    # TODO(synk): for much larger batches, add a grid over the padded batch axis with
    # dimension_semantics=("parallel",) so v7x can shard the recurrence across both TCs.
    return y_pad[:bx, :NUM_CLASSES]


def init_params(key):
    # Deterministic init mimicking PyTorch's U(-1/sqrt(H), 1/sqrt(H)); PyTorch layout.
    k = 1.0 / jnp.sqrt(jnp.float32(HIDDEN))
    keys = jax.random.split(key, 10)

    def u(kk, shape):
        return jax.random.uniform(kk, shape, jnp.float32, minval=-k, maxval=k)

    w_ih0 = u(keys[0], (4 * HIDDEN, INPUT_SIZE))
    w_hh0 = u(keys[1], (4 * HIDDEN, HIDDEN))
    b_ih0 = u(keys[2], (4 * HIDDEN,))
    b_hh0 = u(keys[3], (4 * HIDDEN,))
    w_ih1 = u(keys[4], (4 * HIDDEN, HIDDEN))
    w_hh1 = u(keys[5], (4 * HIDDEN, HIDDEN))
    b_ih1 = u(keys[6], (4 * HIDDEN,))
    b_hh1 = u(keys[7], (4 * HIDDEN,))
    w_out = u(keys[8], (NUM_CLASSES, HIDDEN))
    b_out = u(keys[9], (NUM_CLASSES,))
    return (w_ih0, w_hh0, b_ih0, b_hh0, w_ih1, w_hh1, b_ih1, b_hh1, w_out, b_out)


def rnn_reference(x, raw):
    # Pure-JAX reference with identical semantics and the same bf16-operand /
    # f32-accumulate matmul numerics as the kernel.
    (w_ih0, w_hh0, b_ih0, b_hh0, w_ih1, w_hh1, b_ih1, b_hh1, w_out, b_out) = raw
    bf16 = jnp.bfloat16

    def mm(a, w):
        return jnp.dot(a.astype(bf16), w.astype(bf16),
                       preferred_element_type=jnp.float32)

    def cell(inp, h, c, w_ih, w_hh, b):
        g = mm(inp, w_ih.T) + mm(h, w_hh.T) + b
        i = jax.nn.sigmoid(g[:, 0 * HIDDEN:1 * HIDDEN])
        f = jax.nn.sigmoid(g[:, 1 * HIDDEN:2 * HIDDEN])
        gg = jnp.tanh(g[:, 2 * HIDDEN:3 * HIDDEN])
        o = jax.nn.sigmoid(g[:, 3 * HIDDEN:4 * HIDDEN])
        c_new = f * c + i * gg
        return o * jnp.tanh(c_new), c_new

    batch = x.shape[0]
    h0 = jnp.zeros((batch, HIDDEN), jnp.float32)
    c0 = jnp.zeros((batch, HIDDEN), jnp.float32)
    h1 = jnp.zeros((batch, HIDDEN), jnp.float32)
    c1 = jnp.zeros((batch, HIDDEN), jnp.float32)
    b0 = (b_ih0 + b_hh0)[None, :]
    b1 = (b_ih1 + b_hh1)[None, :]
    for t in range(x.shape[1]):
        h0, c0 = cell(x[:, t, :], h0, c0, w_ih0, w_hh0, b0)
        h1, c1 = cell(h0, h1, c1, w_ih1, w_hh1, b1)
    return mm(h1, w_out.T) + b_out[None, :]


if __name__ == "__main__":
    key = jax.random.PRNGKey(0)
    k_x, k_p = jax.random.split(key)
    x = jax.random.normal(k_x, (B, T, INPUT_SIZE), jnp.float32)
    raw = init_params(k_p)
    kparams = prepare_params(raw)

    y = rnn_forward(x, kparams)
    y = jax.block_until_ready(y)

    y_ref = rnn_reference(x, raw)
    assert y.shape == (B, NUM_CLASSES)
    assert jnp.allclose(y, y_ref, atol=5e-3, rtol=5e-3), "Pallas output mismatch vs reference"

    print("KERNEL_OK")
</pallas_src>

<mosaic_0001>
module attributes {stable_mosaic.version = 11 : i64} {
  func.func @rnn_kernel(%arg0: memref<64x28xbf16, #tpu.memory_space<vmem>>, %arg1: memref<28x512xbf16, #tpu.memory_space<vmem>>, %arg2: memref<128x512xbf16, #tpu.memory_space<vmem>>, %arg3: memref<1x512xf32, #tpu.memory_space<vmem>>, %arg4: memref<256x512xbf16, #tpu.memory_space<vmem>>, %arg5: memref<1x512xf32, #tpu.memory_space<vmem>>, %arg6: memref<128x128xbf16, #tpu.memory_space<vmem>>, %arg7: memref<1x128xf32, #tpu.memory_space<vmem>>, %arg8: memref<8x128xf32, #tpu.memory_space<vmem>>) attributes {dimension_semantics = [], scalar_prefetch = 0 : i64, scratch_operands = 0 : i64, tpu.core_type = #tpu.core_type<tc>} {
    %c0 = arith.constant 0 : index
    %c0_0 = arith.constant 0 : index
    %0 = vector.load %arg0[%c0, %c0_0] : memref<64x28xbf16, #tpu.memory_space<vmem>>, vector<64x28xbf16>
    %c0_1 = arith.constant 0 : index
    %c0_2 = arith.constant 0 : index
    %1 = vector.load %arg1[%c0_1, %c0_2] : memref<28x512xbf16, #tpu.memory_space<vmem>>, vector<28x512xbf16>
    %c0_3 = arith.constant 0 : index
    %c0_4 = arith.constant 0 : index
    %2 = vector.load %arg2[%c0_3, %c0_4] : memref<128x512xbf16, #tpu.memory_space<vmem>>, vector<128x512xbf16>
    %c0_5 = arith.constant 0 : index
    %c0_6 = arith.constant 0 : index
    %3 = vector.load %arg4[%c0_5, %c0_6] : memref<256x512xbf16, #tpu.memory_space<vmem>>, vector<256x512xbf16>
    %cst = arith.constant dense<0.000000e+00> : vector<64x512xf32>
    %4 = tpu.matmul %0, %1, %cst {dimension_numbers = #tpu.dot_dimension_numbers<[1], [0], [0], [1], [0, 0, 1, 1], [], []>} : vector<64x28xbf16>, vector<28x512xbf16>, vector<64x512xf32> -> vector<64x512xf32>
    %c0_7 = arith.constant 0 : index
    %c0_8 = arith.constant 0 : index
    %5 = vector.load %arg3[%c0_7, %c0_8] : memref<1x512xf32, #tpu.memory_space<vmem>>, vector<1x512xf32>
    %6 = vector.shape_cast %5 : vector<1x512xf32> to vector<1x512xf32>
    %7 = vector.broadcast %6 : vector<1x512xf32> to vector<64x512xf32>
    %8 = arith.addf %4, %7 : vector<64x512xf32>
    %c0_9 = arith.constant 0 : index
    %c0_10 = arith.constant 0 : index
    %9 = vector.load %arg5[%c0_9, %c0_10] : memref<1x512xf32, #tpu.memory_space<vmem>>, vector<1x512xf32>
    %10 = vector.shape_cast %9 : vector<1x512xf32> to vector<1x512xf32>
    %11 = vector.broadcast %10 : vector<1x512xf32> to vector<8x512xf32>
    %cst_11 = arith.constant 0.000000e+00 : f32
    %12 = vector.broadcast %cst_11 : f32 to vector<8x128xf32>
    %cst_12 = arith.constant 0.000000e+00 : f32
    %13 = vector.broadcast %cst_12 : f32 to vector<8x128xf32>
    %cst_13 = arith.constant 0.000000e+00 : f32
    %14 = vector.broadcast %cst_13 : f32 to vector<8x128xf32>
    %cst_14 = arith.constant 0.000000e+00 : f32
    %15 = vector.broadcast %cst_14 : f32 to vector<8x128xf32>
    %16 = vector.extract_strided_slice %8 {offsets = [0, 0], sizes = [8, 512], strides = [1, 1]} : vector<64x512xf32> to vector<8x512xf32>
    %17 = arith.truncf %12 : vector<8x128xf32> to vector<8x128xbf16>
    %cst_15 = arith.constant dense<0.000000e+00> : vector<8x512xf32>
    %18 = tpu.matmul %17, %2, %cst_15 {dimension_numbers = #tpu.dot_dimension_numbers<[1], [0], [0], [1], [0, 0, 1, 1], [], []>} : vector<8x128xbf16>, vector<128x512xbf16>, vector<8x512xf32> -> vector<8x512xf32>
    %19 = arith.addf %16, %18 : vector<8x512xf32>
    %20 = vector.extract_strided_slice %19 {offsets = [0, 0], sizes = [8, 128], strides = [1, 1]} : vector<8x512xf32> to vector<8x128xf32>
    %21 = arith.negf %20 : vector<8x128xf32>
    %22 = math.exp %21 : vector<8x128xf32>
    %cst_16 = arith.constant 1.000000e+00 : f32
    %23 = vector.broadcast %cst_16 : f32 to vector<8x128xf32>
    %24 = arith.addf %23, %22 : vector<8x128xf32>
    %25 = arith.divf %23, %24 : vector<8x128xf32>
    %26 = vector.extract_strided_slice %19 {offsets = [0, 128], sizes = [8, 128], strides = [1, 1]} : vector<8x512xf32> to vector<8x128xf32>
    %27 = arith.negf %26 : vector<8x128xf32>
    %28 = math.exp %27 : vector<8x128xf32>
    %cst_17 = arith.constant 1.000000e+00 : f32
    %29 = vector.broadcast %cst_17 : f32 to vector<8x128xf32>
    %30 = arith.addf %29, %28 : vector<8x128xf32>
    %31 = arith.divf %29, %30 : vector<8x128xf32>
    %32 = vector.extract_strided_slice %19 {offsets = [0, 256], sizes = [8, 128], strides = [1, 1]} : vector<8x512xf32> to vector<8x128xf32>
    %33 = math.tanh %32 : vector<8x128xf32>
    %34 = vector.extract_strided_slice %19 {offsets = [0, 384], sizes = [8, 128], strides = [1, 1]} : vector<8x512xf32> to vector<8x128xf32>
    %35 = arith.negf %34 : vector<8x128xf32>
    %36 = math.exp %35 : vector<8x128xf32>
    %cst_18 = arith.constant 1.000000e+00 : f32
    %37 = vector.broadcast %cst_18 : f32 to vector<8x128xf32>
    %38 = arith.addf %37, %36 : vector<8x128xf32>
    %39 = arith.divf %37, %38 : vector<8x128xf32>
    %40 = arith.mulf %31, %13 : vector<8x128xf32>
    %41 = arith.mulf %25, %33 : vector<8x128xf32>
    %42 = arith.addf %40, %41 : vector<8x128xf32>
    %43 = math.tanh %42 : vector<8x128xf32>
    %44 = arith.mulf %39, %43 : vector<8x128xf32>
    %45 = arith.truncf %44 : vector<8x128xf32> to vector<8x128xbf16>
    %46 = arith.truncf %14 : vector<8x128xf32> to vector<8x128xbf16>
    %47 = tpu.concatenate %45, %46 in 1 : vector<8x128xbf16>, vector<8x128xbf16> -> vector<8x256xbf16>
    %cst_19 = arith.constant dense<0.000000e+00> : vector<8x512xf32>
    %48 = tpu.matmul %47, %3, %cst_19 {dimension_numbers = #tpu.dot_dimension_numbers<[1], [0], [0], [1], [0, 0, 1, 1], [], []>} : vector<8x256xbf16>, vector<256x512xbf16>, vector<8x512xf32> -> vector<8x512xf32>
    %49 = arith.addf %48, %11 : vector<8x512xf32>
    %50 = vector.extract_strided_slice %49 {offsets = [0, 0], sizes = [8, 128], strides = [1, 1]} : vector<8x512xf32> to vector<8x128xf32>
    %51 = arith.negf %50 : vector<8x128xf32>
    %52 = math.exp %51 : vector<8x128xf32>
    %cst_20 = arith.constant 1.000000e+00 : f32
    %53 = vector.broadcast %cst_20 : f32 to vector<8x128xf32>
    %54 = arith.addf %53, %52 : vector<8x128xf32>
    %55 = arith.divf %53, %54 : vector<8x128xf32>
    %56 = vector.extract_strided_slice %49 {offsets = [0, 128], sizes = [8, 128], strides = [1, 1]} : vector<8x512xf32> to vector<8x128xf32>
    %57 = arith.negf %56 : vector<8x128xf32>
    %58 = math.exp %57 : vector<8x128xf32>
    %cst_21 = arith.constant 1.000000e+00 : f32
    %59 = vector.broadcast %cst_21 : f32 to vector<8x128xf32>
    %60 = arith.addf %59, %58 : vector<8x128xf32>
    %61 = arith.divf %59, %60 : vector<8x128xf32>
    %62 = vector.extract_strided_slice %49 {offsets = [0, 256], sizes = [8, 128], strides = [1, 1]} : vector<8x512xf32> to vector<8x128xf32>
    %63 = math.tanh %62 : vector<8x128xf32>
    %64 = vector.extract_strided_slice %49 {offsets = [0, 384], sizes = [8, 128], strides = [1, 1]} : vector<8x512xf32> to vector<8x128xf32>
    %65 = arith.negf %64 : vector<8x128xf32>
    %66 = math.exp %65 : vector<8x128xf32>
    %cst_22 = arith.constant 1.000000e+00 : f32
    %67 = vector.broadcast %cst_22 : f32 to vector<8x128xf32>
    %68 = arith.addf %67, %66 : vector<8x128xf32>
    %69 = arith.divf %67, %68 : vector<8x128xf32>
    %70 = arith.mulf %61, %15 : vector<8x128xf32>
    %71 = arith.mulf %55, %63 : vector<8x128xf32>
    %72 = arith.addf %70, %71 : vector<8x128xf32>
    %73 = math.tanh %72 : vector<8x128xf32>
    %74 = arith.mulf %69, %73 : vector<8x128xf32>
    %75 = vector.extract_strided_slice %8 {offsets = [8, 0], sizes = [8, 512], strides = [1, 1]} : vector<64x512xf32> to vector<8x512xf32>
    %76 = arith.truncf %44 : vector<8x128xf32> to vector<8x128xbf16>
    %cst_23 = arith.constant dense<0.000000e+00> : vector<8x512xf32>
    %77 = tpu.matmul %76, %2, %cst_23 {dimension_numbers = #tpu.dot_dimension_numbers<[1], [0], [0], [1], [0, 0, 1, 1], [], []>} : vector<8x128xbf16>, vector<128x512xbf16>, vector<8x512xf32> -> vector<8x512xf32>
    %78 = arith.addf %75, %77 : vector<8x512xf32>
    %79 = vector.extract_strided_slice %78 {offsets = [0, 0], sizes = [8, 128], strides = [1, 1]} : vector<8x512xf32> to vector<8x128xf32>
    %80 = arith.negf %79 : vector<8x128xf32>
    %81 = math.exp %80 : vector<8x128xf32>
    %cst_24 = arith.constant 1.000000e+00 : f32
    %82 = vector.broadcast %cst_24 : f32 to vector<8x128xf32>
    %83 = arith.addf %82, %81 : vector<8x128xf32>
    %84 = arith.divf %82, %83 : vector<8x128xf32>
    %85 = vector.extract_strided_slice %78 {offsets = [0, 128], sizes = [8, 128], strides = [1, 1]} : vector<8x512xf32> to vector<8x128xf32>
    %86 = arith.negf %85 : vector<8x128xf32>
    %87 = math.exp %86 : vector<8x128xf32>
    %cst_25 = arith.constant 1.000000e+00 : f32
    %88 = vector.broadcast %cst_25 : f32 to vector<8x128xf32>
    %89 = arith.addf %88, %87 : vector<8x128xf32>
    %90 = arith.divf %88, %89 : vector<8x128xf32>
    %91 = vector.extract_strided_slice %78 {offsets = [0, 256], sizes = [8, 128], strides = [1, 1]} : vector<8x512xf32> to vector<8x128xf32>
    %92 = math.tanh %91 : vector<8x128xf32>
    %93 = vector.extract_strided_slice %78 {offsets = [0, 384], sizes = [8, 128], strides = [1, 1]} : vector<8x512xf32> to vector<8x128xf32>
    %94 = arith.negf %93 : vector<8x128xf32>
    %95 = math.exp %94 : vector<8x128xf32>
    %cst_26 = arith.constant 1.000000e+00 : f32
    %96 = vector.broadcast %cst_26 : f32 to vector<8x128xf32>
    %97 = arith.addf %96, %95 : vector<8x128xf32>
    %98 = arith.divf %96, %97 : vector<8x128xf32>
    %99 = arith.mulf %90, %42 : vector<8x128xf32>
    %100 = arith.mulf %84, %92 : vector<8x128xf32>
    %101 = arith.addf %99, %100 : vector<8x128xf32>
    %102 = math.tanh %101 : vector<8x128xf32>
    %103 = arith.mulf %98, %102 : vector<8x128xf32>
    %104 = arith.truncf %103 : vector<8x128xf32> to vector<8x128xbf16>
    %105 = arith.truncf %74 : vector<8x128xf32> to vector<8x128xbf16>
    %106 = tpu.concatenate %104, %105 in 1 : vector<8x128xbf16>, vector<8x128xbf16> -> vector<8x256xbf16>
    %cst_27 = arith.constant dense<0.000000e+00> : vector<8x512xf32>
    %107 = tpu.matmul %106, %3, %cst_27 {dimension_numbers = #tpu.dot_dimension_numbers<[1], [0], [0], [1], [0, 0, 1, 1], [], []>} : vector<8x256xbf16>, vector<256x512xbf16>, vector<8x512xf32> -> vector<8x512xf32>
    %108 = arith.addf %107, %11 : vector<8x512xf32>
    %109 = vector.extract_strided_slice %108 {offsets = [0, 0], sizes = [8, 128], strides = [1, 1]} : vector<8x512xf32> to vector<8x128xf32>
    %110 = arith.negf %109 : vector<8x128xf32>
    %111 = math.exp %110 : vector<8x128xf32>
    %cst_28 = arith.constant 1.000000e+00 : f32
    %112 = vector.broadcast %cst_28 : f32 to vector<8x128xf32>
    %113 = arith.addf %112, %111 : vector<8x128xf32>
    %114 = arith.divf %112, %113 : vector<8x128xf32>
    %115 = vector.extract_strided_slice %108 {offsets = [0, 128], sizes = [8, 128], strides = [1, 1]} : vector<8x512xf32> to vector<8x128xf32>
    %116 = arith.negf %115 : vector<8x128xf32>
    %117 = math.exp %116 : vector<8x128xf32>
    %cst_29 = arith.constant 1.000000e+00 : f32
    %118 = vector.broadcast %cst_29 : f32 to vector<8x128xf32>
    %119 = arith.addf %118, %117 : vector<8x128xf32>
    %120 = arith.divf %118, %119 : vector<8x128xf32>
    %121 = vector.extract_strided_slice %108 {offsets = [0, 256], sizes = [8, 128], strides = [1, 1]} : vector<8x512xf32> to vector<8x128xf32>
    %122 = math.tanh %121 : vector<8x128xf32>
    %123 = vector.extract_strided_slice %108 {offsets = [0, 384], sizes = [8, 128], strides = [1, 1]} : vector<8x512xf32> to vector<8x128xf32>
    %124 = arith.negf %123 : vector<8x128xf32>
    %125 = math.exp %124 : vector<8x128xf32>
    %cst_30 = arith.constant 1.000000e+00 : f32
    %126 = vector.broadcast %cst_30 : f32 to vector<8x128xf32>
    %127 = arith.addf %126, %125 : vector<8x128xf32>
    %128 = arith.divf %126, %127 : vector<8x128xf32>
    %129 = arith.mulf %120, %72 : vector<8x128xf32>
    %130 = arith.mulf %114, %122 : vector<8x128xf32>
    %131 = arith.addf %129, %130 : vector<8x128xf32>
    %132 = math.tanh %131 : vector<8x128xf32>
    %133 = arith.mulf %128, %132 : vector<8x128xf32>
    %134 = vector.extract_strided_slice %8 {offsets = [16, 0], sizes = [8, 512], strides = [1, 1]} : vector<64x512xf32> to vector<8x512xf32>
    %135 = arith.truncf %103 : vector<8x128xf32> to vector<8x128xbf16>
    %cst_31 = arith.constant dense<0.000000e+00> : vector<8x512xf32>
    %136 = tpu.matmul %135, %2, %cst_31 {dimension_numbers = #tpu.dot_dimension_numbers<[1], [0], [0], [1], [0, 0, 1, 1], [], []>} : vector<8x128xbf16>, vector<128x512xbf16>, vector<8x512xf32> -> vector<8x512xf32>
    %137 = arith.addf %134, %136 : vector<8x512xf32>
    %138 = vector.extract_strided_slice %137 {offsets = [0, 0], sizes = [8, 128], strides = [1, 1]} : vector<8x512xf32> to vector<8x128xf32>
    %139 = arith.negf %138 : vector<8x128xf32>
    %140 = math.exp %139 : vector<8x128xf32>
    %cst_32 = arith.constant 1.000000e+00 : f32
    %141 = vector.broadcast %cst_32 : f32 to vector<8x128xf32>
    %142 = arith.addf %141, %140 : vector<8x128xf32>
    %143 = arith.divf %141, %142 : vector<8x128xf32>
    %144 = vector.extract_strided_slice %137 {offsets = [0, 128], sizes = [8, 128], strides = [1, 1]} : vector<8x512xf32> to vector<8x128xf32>
    %145 = arith.negf %144 : vector<8x128xf32>
    %146 = math.exp %145 : vector<8x128xf32>
    %cst_33 = arith.constant 1.000000e+00 : f32
    %147 = vector.broadcast %cst_33 : f32 to vector<8x128xf32>
    %148 = arith.addf %147, %146 : vector<8x128xf32>
    %149 = arith.divf %147, %148 : vector<8x128xf32>
    %150 = vector.extract_strided_slice %137 {offsets = [0, 256], sizes = [8, 128], strides = [1, 1]} : vector<8x512xf32> to vector<8x128xf32>
    %151 = math.tanh %150 : vector<8x128xf32>
    %152 = vector.extract_strided_slice %137 {offsets = [0, 384], sizes = [8, 128], strides = [1, 1]} : vector<8x512xf32> to vector<8x128xf32>
    %153 = arith.negf %152 : vector<8x128xf32>
    %154 = math.exp %153 : vector<8x128xf32>
    %cst_34 = arith.constant 1.000000e+00 : f32
    %155 = vector.broadcast %cst_34 : f32 to vector<8x128xf32>
    %156 = arith.addf %155, %154 : vector<8x128xf32>
    %157 = arith.divf %155, %156 : vector<8x128xf32>
    %158 = arith.mulf %149, %101 : vector<8x128xf32>
    %159 = arith.mulf %143, %151 : vector<8x128xf32>
    %160 = arith.addf %158, %159 : vector<8x128xf32>
    %161 = math.tanh %160 : vector<8x128xf32>
    %162 = arith.mulf %157, %161 : vector<8x128xf32>
    %163 = arith.truncf %162 : vector<8x128xf32> to vector<8x128xbf16>
    %164 = arith.truncf %133 : vector<8x128xf32> to vector<8x128xbf16>
    %165 = tpu.concatenate %163, %164 in 1 : vector<8x128xbf16>, vector<8x128xbf16> -> vector<8x256xbf16>
    %cst_35 = arith.constant dense<0.000000e+00> : vector<8x512xf32>
    %166 = tpu.matmul %165, %3, %cst_35 {dimension_numbers = #tpu.dot_dimension_numbers<[1], [0], [0], [1], [0, 0, 1, 1], [], []>} : vector<8x256xbf16>, vector<256x512xbf16>, vector<8x512xf32> -> vector<8x512xf32>
    %167 = arith.addf %166, %11 : vector<8x512xf32>
    %168 = vector.extract_strided_slice %167 {offsets = [0, 0], sizes = [8, 128], strides = [1, 1]} : vector<8x512xf32> to vector<8x128xf32>
    %169 = arith.negf %168 : vector<8x128xf32>
    %170 = math.exp %169 : vector<8x128xf32>
    %cst_36 = arith.constant 1.000000e+00 : f32
    %171 = vector.broadcast %cst_36 : f32 to vector<8x128xf32>
    %172 = arith.addf %171, %170 : vector<8x128xf32>
    %173 = arith.divf %171, %172 : vector<8x128xf32>
    %174 = vector.extract_strided_slice %167 {offsets = [0, 128], sizes = [8, 128], strides = [1, 1]} : vector<8x512xf32> to vector<8x128xf32>
    %175 = arith.negf %174 : vector<8x128xf32>
    %176 = math.exp %175 : vector<8x128xf32>
    %cst_37 = arith.constant 1.000000e+00 : f32
    %177 = vector.broadcast %cst_37 : f32 to vector<8x128xf32>
    %178 = arith.addf %177, %176 : vector<8x128xf32>
    %179 = arith.divf %177, %178 : vector<8x128xf32>
    %180 = vector.extract_strided_slice %167 {offsets = [0, 256], sizes = [8, 128], strides = [1, 1]} : vector<8x512xf32> to vector<8x128xf32>
    %181 = math.tanh %180 : vector<8x128xf32>
    %182 = vector.extract_strided_slice %167 {offsets = [0, 384], sizes = [8, 128], strides = [1, 1]} : vector<8x512xf32> to vector<8x128xf32>
    %183 = arith.negf %182 : vector<8x128xf32>
    %184 = math.exp %183 : vector<8x128xf32>
    %cst_38 = arith.constant 1.000000e+00 : f32
    %185 = vector.broadcast %cst_38 : f32 to vector<8x128xf32>
    %186 = arith.addf %185, %184 : vector<8x128xf32>
    %187 = arith.divf %185, %186 : vector<8x128xf32>
    %188 = arith.mulf %179, %131 : vector<8x128xf32>
    %189 = arith.mulf %173, %181 : vector<8x128xf32>
    %190 = arith.addf %188, %189 : vector<8x128xf32>
    %191 = math.tanh %190 : vector<8x128xf32>
    %192 = arith.mulf %187, %191 : vector<8x128xf32>
    %193 = vector.extract_strided_slice %8 {offsets = [24, 0], sizes = [8, 512], strides = [1, 1]} : vector<64x512xf32> to vector<8x512xf32>
    %194 = arith.truncf %162 : vector<8x128xf32> to vector<8x128xbf16>
    %cst_39 = arith.constant dense<0.000000e+00> : vector<8x512xf32>
    %195 = tpu.matmul %194, %2, %cst_39 {dimension_numbers = #tpu.dot_dimension_numbers<[1], [0], [0], [1], [0, 0, 1, 1], [], []>} : vector<8x128xbf16>, vector<128x512xbf16>, vector<8x512xf32> -> vector<8x512xf32>
    %196 = arith.addf %193, %195 : vector<8x512xf32>
    %197 = vector.extract_strided_slice %196 {offsets = [0, 0], sizes = [8, 128], strides = [1, 1]} : vector<8x512xf32> to vector<8x128xf32>
    %198 = arith.negf %197 : vector<8x128xf32>
    %199 = math.exp %198 : vector<8x128xf32>
    %cst_40 = arith.constant 1.000000e+00 : f32
    %200 = vector.broadcast %cst_40 : f32 to vector<8x128xf32>
    %201 = arith.addf %200, %199 : vector<8x128xf32>
    %202 = arith.divf %200, %201 : vector<8x128xf32>
    %203 = vector.extract_strided_slice %196 {offsets = [0, 128], sizes = [8, 128], strides = [1, 1]} : vector<8x512xf32> to vector<8x128xf32>
    %204 = arith.negf %203 : vector<8x128xf32>
    %205 = math.exp %204 : vector<8x128xf32>
    %cst_41 = arith.constant 1.000000e+00 : f32
    %206 = vector.broadcast %cst_41 : f32 to vector<8x128xf32>
    %207 = arith.addf %206, %205 : vector<8x128xf32>
    %208 = arith.divf %206, %207 : vector<8x128xf32>
    %209 = vector.extract_strided_slice %196 {offsets = [0, 256], sizes = [8, 128], strides = [1, 1]} : vector<8x512xf32> to vector<8x128xf32>
    %210 = math.tanh %209 : vector<8x128xf32>
    %211 = vector.extract_strided_slice %196 {offsets = [0, 384], sizes = [8, 128], strides = [1, 1]} : vector<8x512xf32> to vector<8x128xf32>
    %212 = arith.negf %211 : vector<8x128xf32>
    %213 = math.exp %212 : vector<8x128xf32>
    %cst_42 = arith.constant 1.000000e+00 : f32
    %214 = vector.broadcast %cst_42 : f32 to vector<8x128xf32>
    %215 = arith.addf %214, %213 : vector<8x128xf32>
    %216 = arith.divf %214, %215 : vector<8x128xf32>
    %217 = arith.mulf %208, %160 : vector<8x128xf32>
    %218 = arith.mulf %202, %210 : vector<8x128xf32>
    %219 = arith.addf %217, %218 : vector<8x128xf32>
    %220 = math.tanh %219 : vector<8x128xf32>
    %221 = arith.mulf %216, %220 : vector<8x128xf32>
    %222 = arith.truncf %221 : vector<8x128xf32> to vector<8x128xbf16>
    %223 = arith.truncf %192 : vector<8x128xf32> to vector<8x128xbf16>
    %224 = tpu.concatenate %222, %223 in 1 : vector<8x128xbf16>, vector<8x128xbf16> -> vector<8x256xbf16>
    %cst_43 = arith.constant dense<0.000000e+00> : vector<8x512xf32>
    %225 = tpu.matmul %224, %3, %cst_43 {dimension_numbers = #tpu.dot_dimension_numbers<[1], [0], [0], [1], [0, 0, 1, 1], [], []>} : vector<8x256xbf16>, vector<256x512xbf16>, vector<8x512xf32> -> vector<8x512xf32>
    %226 = arith.addf %225, %11 : vector<8x512xf32>
    %227 = vector.extract_strided_slice %226 {offsets = [0, 0], sizes = [8, 128], strides = [1, 1]} : vector<8x512xf32> to vector<8x128xf32>
    %228 = arith.negf %227 : vector<8x128xf32>
    %229 = math.exp %228 : vector<8x128xf32>
    %cst_44 = arith.constant 1.000000e+00 : f32
    %230 = vector.broadcast %cst_44 : f32 to vector<8x128xf32>
    %231 = arith.addf %230, %229 : vector<8x128xf32>
    %232 = arith.divf %230, %231 : vector<8x128xf32>
    %233 = vector.extract_strided_slice %226 {offsets = [0, 128], sizes = [8, 128], strides = [1, 1]} : vector<8x512xf32> to vector<8x128xf32>
    %234 = arith.negf %233 : vector<8x128xf32>
    %235 = math.exp %234 : vector<8x128xf32>
    %cst_45 = arith.constant 1.000000e+00 : f32
    %236 = vector.broadcast %cst_45 : f32 to vector<8x128xf32>
    %237 = arith.addf %236, %235 : vector<8x128xf32>
    %238 = arith.divf %236, %237 : vector<8x128xf32>
    %239 = vector.extract_strided_slice %226 {offsets = [0, 256], sizes = [8, 128], strides = [1, 1]} : vector<8x512xf32> to vector<8x128xf32>
    %240 = math.tanh %239 : vector<8x128xf32>
    %241 = vector.extract_strided_slice %226 {offsets = [0, 384], sizes = [8, 128], strides = [1, 1]} : vector<8x512xf32> to vector<8x128xf32>
    %242 = arith.negf %241 : vector<8x128xf32>
    %243 = math.exp %242 : vector<8x128xf32>
    %cst_46 = arith.constant 1.000000e+00 : f32
    %244 = vector.broadcast %cst_46 : f32 to vector<8x128xf32>
    %245 = arith.addf %244, %243 : vector<8x128xf32>
    %246 = arith.divf %244, %245 : vector<8x128xf32>
    %247 = arith.mulf %238, %190 : vector<8x128xf32>
    %248 = arith.mulf %232, %240 : vector<8x128xf32>
    %249 = arith.addf %247, %248 : vector<8x128xf32>
    %250 = math.tanh %249 : vector<8x128xf32>
    %251 = arith.mulf %246, %250 : vector<8x128xf32>
    %252 = vector.extract_strided_slice %8 {offsets = [32, 0], sizes = [8, 512], strides = [1, 1]} : vector<64x512xf32> to vector<8x512xf32>
    %253 = arith.truncf %221 : vector<8x128xf32> to vector<8x128xbf16>
    %cst_47 = arith.constant dense<0.000000e+00> : vector<8x512xf32>
    %254 = tpu.matmul %253, %2, %cst_47 {dimension_numbers = #tpu.dot_dimension_numbers<[1], [0], [0], [1], [0, 0, 1, 1], [], []>} : vector<8x128xbf16>, vector<128x512xbf16>, vector<8x512xf32> -> vector<8x512xf32>
    %255 = arith.addf %252, %254 : vector<8x512xf32>
    %256 = vector.extract_strided_slice %255 {offsets = [0, 0], sizes = [8, 128], strides = [1, 1]} : vector<8x512xf32> to vector<8x128xf32>
    %257 = arith.negf %256 : vector<8x128xf32>
    %258 = math.exp %257 : vector<8x128xf32>
    %cst_48 = arith.constant 1.000000e+00 : f32
    %259 = vector.broadcast %cst_48 : f32 to vector<8x128xf32>
    %260 = arith.addf %259, %258 : vector<8x128xf32>
    %261 = arith.divf %259, %260 : vector<8x128xf32>
    %262 = vector.extract_strided_slice %255 {offsets = [0, 128], sizes = [8, 128], strides = [1, 1]} : vector<8x512xf32> to vector<8x128xf32>
    %263 = arith.negf %262 : vector<8x128xf32>
    %264 = math.exp %263 : vector<8x128xf32>
    %cst_49 = arith.constant 1.000000e+00 : f32
    %265 = vector.broadcast %cst_49 : f32 to vector<8x128xf32>
    %266 = arith.addf %265, %264 : vector<8x128xf32>
    %267 = arith.divf %265, %266 : vector<8x128xf32>
    %268 = vector.extract_strided_slice %255 {offsets = [0, 256], sizes = [8, 128], strides = [1, 1]} : vector<8x512xf32> to vector<8x128xf32>
    %269 = math.tanh %268 : vector<8x128xf32>
    %270 = vector.extract_strided_slice %255 {offsets = [0, 384], sizes = [8, 128], strides = [1, 1]} : vector<8x512xf32> to vector<8x128xf32>
    %271 = arith.negf %270 : vector<8x128xf32>
    %272 = math.exp %271 : vector<8x128xf32>
    %cst_50 = arith.constant 1.000000e+00 : f32
    %273 = vector.broadcast %cst_50 : f32 to vector<8x128xf32>
    %274 = arith.addf %273, %272 : vector<8x128xf32>
    %275 = arith.divf %273, %274 : vector<8x128xf32>
    %276 = arith.mulf %267, %219 : vector<8x128xf32>
    %277 = arith.mulf %261, %269 : vector<8x128xf32>
    %278 = arith.addf %276, %277 : vector<8x128xf32>
    %279 = math.tanh %278 : vector<8x128xf32>
    %280 = arith.mulf %275, %279 : vector<8x128xf32>
    %281 = arith.truncf %280 : vector<8x128xf32> to vector<8x128xbf16>
    %282 = arith.truncf %251 : vector<8x128xf32> to vector<8x128xbf16>
    %283 = tpu.concatenate %281, %282 in 1 : vector<8x128xbf16>, vector<8x128xbf16> -> vector<8x256xbf16>
    %cst_51 = arith.constant dense<0.000000e+00> : vector<8x512xf32>
    %284 = tpu.matmul %283, %3, %cst_51 {dimension_numbers = #tpu.dot_dimension_numbers<[1], [0], [0], [1], [0, 0, 1, 1], [], []>} : vector<8x256xbf16>, vector<256x512xbf16>, vector<8x512xf32> -> vector<8x512xf32>
    %285 = arith.addf %284, %11 : vector<8x512xf32>
    %286 = vector.extract_strided_slice %285 {offsets = [0, 0], sizes = [8, 128], strides = [1, 1]} : vector<8x512xf32> to vector<8x128xf32>
    %287 = arith.negf %286 : vector<8x128xf32>
    %288 = math.exp %287 : vector<8x128xf32>
    %cst_52 = arith.constant 1.000000e+00 : f32
    %289 = vector.broadcast %cst_52 : f32 to vector<8x128xf32>
    %290 = arith.addf %289, %288 : vector<8x128xf32>
    %291 = arith.divf %289, %290 : vector<8x128xf32>
    %292 = vector.extract_strided_slice %285 {offsets = [0, 128], sizes = [8, 128], strides = [1, 1]} : vector<8x512xf32> to vector<8x128xf32>
    %293 = arith.negf %292 : vector<8x128xf32>
    %294 = math.exp %293 : vector<8x128xf32>
    %cst_53 = arith.constant 1.000000e+00 : f32
    %295 = vector.broadcast %cst_53 : f32 to vector<8x128xf32>
    %296 = arith.addf %295, %294 : vector<8x128xf32>
    %297 = arith.divf %295, %296 : vector<8x128xf32>
    %298 = vector.extract_strided_slice %285 {offsets = [0, 256], sizes = [8, 128], strides = [1, 1]} : vector<8x512xf32> to vector<8x128xf32>
    %299 = math.tanh %298 : vector<8x128xf32>
    %300 = vector.extract_strided_slice %285 {offsets = [0, 384], sizes = [8, 128], strides = [1, 1]} : vector<8x512xf32> to vector<8x128xf32>
    %301 = arith.negf %300 : vector<8x128xf32>
    %302 = math.exp %301 : vector<8x128xf32>
    %cst_54 = arith.constant 1.000000e+00 : f32
    %303 = vector.broadcast %cst_54 : f32 to vector<8x128xf32>
    %304 = arith.addf %303, %302 : vector<8x128xf32>
    %305 = arith.divf %303, %304 : vector<8x128xf32>
    %306 = arith.mulf %297, %249 : vector<8x128xf32>
    %307 = arith.mulf %291, %299 : vector<8x128xf32>
    %308 = arith.addf %306, %307 : vector<8x128xf32>
    %309 = math.tanh %308 : vector<8x128xf32>
    %310 = arith.mulf %305, %309 : vector<8x128xf32>
    %311 = vector.extract_strided_slice %8 {offsets = [40, 0], sizes = [8, 512], strides = [1, 1]} : vector<64x512xf32> to vector<8x512xf32>
    %312 = arith.truncf %280 : vector<8x128xf32> to vector<8x128xbf16>
    %cst_55 = arith.constant dense<0.000000e+00> : vector<8x512xf32>
    %313 = tpu.matmul %312, %2, %cst_55 {dimension_numbers = #tpu.dot_dimension_numbers<[1], [0], [0], [1], [0, 0, 1, 1], [], []>} : vector<8x128xbf16>, vector<128x512xbf16>, vector<8x512xf32> -> vector<8x512xf32>
    %314 = arith.addf %311, %313 : vector<8x512xf32>
    %315 = vector.extract_strided_slice %314 {offsets = [0, 0], sizes = [8, 128], strides = [1, 1]} : vector<8x512xf32> to vector<8x128xf32>
    %316 = arith.negf %315 : vector<8x128xf32>
    %317 = math.exp %316 : vector<8x128xf32>
    %cst_56 = arith.constant 1.000000e+00 : f32
    %318 = vector.broadcast %cst_56 : f32 to vector<8x128xf32>
    %319 = arith.addf %318, %317 : vector<8x128xf32>
    %320 = arith.divf %318, %319 : vector<8x128xf32>
    %321 = vector.extract_strided_slice %314 {offsets = [0, 128], sizes = [8, 128], strides = [1, 1]} : vector<8x512xf32> to vector<8x128xf32>
    %322 = arith.negf %321 : vector<8x128xf32>
    %323 = math.exp %322 : vector<8x128xf32>
    %cst_57 = arith.constant 1.000000e+00 : f32
    %324 = vector.broadcast %cst_57 : f32 to vector<8x128xf32>
    %325 = arith.addf %324, %323 : vector<8x128xf32>
    %326 = arith.divf %324, %325 : vector<8x128xf32>
    %327 = vector.extract_strided_slice %314 {offsets = [0, 256], sizes = [8, 128], strides = [1, 1]} : vector<8x512xf32> to vector<8x128xf32>
    %328 = math.tanh %327 : vector<8x128xf32>
    %329 = vector.extract_strided_slice %314 {offsets = [0, 384], sizes = [8, 128], strides = [1, 1]} : vector<8x512xf32> to vector<8x128xf32>
    %330 = arith.negf %329 : vector<8x128xf32>
    %331 = math.exp %330 : vector<8x128xf32>
    %cst_58 = arith.constant 1.000000e+00 : f32
    %332 = vector.broadcast %cst_58 : f32 to vector<8x128xf32>
    %333 = arith.addf %332, %331 : vector<8x128xf32>
    %334 = arith.divf %332, %333 : vector<8x128xf32>
    %335 = arith.mulf %326, %278 : vector<8x128xf32>
    %336 = arith.mulf %320, %328 : vector<8x128xf32>
    %337 = arith.addf %335, %336 : vector<8x128xf32>
    %338 = math.tanh %337 : vector<8x128xf32>
    %339 = arith.mulf %334, %338 : vector<8x128xf32>
    %340 = arith.truncf %339 : vector<8x128xf32> to vector<8x128xbf16>
    %341 = arith.truncf %310 : vector<8x128xf32> to vector<8x128xbf16>
    %342 = tpu.concatenate %340, %341 in 1 : vector<8x128xbf16>, vector<8x128xbf16> -> vector<8x256xbf16>
    %cst_59 = arith.constant dense<0.000000e+00> : vector<8x512xf32>
    %343 = tpu.matmul %342, %3, %cst_59 {dimension_numbers = #tpu.dot_dimension_numbers<[1], [0], [0], [1], [0, 0, 1, 1], [], []>} : vector<8x256xbf16>, vector<256x512xbf16>, vector<8x512xf32> -> vector<8x512xf32>
    %344 = arith.addf %343, %11 : vector<8x512xf32>
    %345 = vector.extract_strided_slice %344 {offsets = [0, 0], sizes = [8, 128], strides = [1, 1]} : vector<8x512xf32> to vector<8x128xf32>
    %346 = arith.negf %345 : vector<8x128xf32>
    %347 = math.exp %346 : vector<8x128xf32>
    %cst_60 = arith.constant 1.000000e+00 : f32
    %348 = vector.broadcast %cst_60 : f32 to vector<8x128xf32>
    %349 = arith.addf %348, %347 : vector<8x128xf32>
    %350 = arith.divf %348, %349 : vector<8x128xf32>
    %351 = vector.extract_strided_slice %344 {offsets = [0, 128], sizes = [8, 128], strides = [1, 1]} : vector<8x512xf32> to vector<8x128xf32>
    %352 = arith.negf %351 : vector<8x128xf32>
    %353 = math.exp %352 : vector<8x128xf32>
    %cst_61 = arith.constant 1.000000e+00 : f32
    %354 = vector.broadcast %cst_61 : f32 to vector<8x128xf32>
    %355 = arith.addf %354, %353 : vector<8x128xf32>
    %356 = arith.divf %354, %355 : vector<8x128xf32>
    %357 = vector.extract_strided_slice %344 {offsets = [0, 256], sizes = [8, 128], strides = [1, 1]} : vector<8x512xf32> to vector<8x128xf32>
    %358 = math.tanh %357 : vector<8x128xf32>
    %359 = vector.extract_strided_slice %344 {offsets = [0, 384], sizes = [8, 128], strides = [1, 1]} : vector<8x512xf32> to vector<8x128xf32>
    %360 = arith.negf %359 : vector<8x128xf32>
    %361 = math.exp %360 : vector<8x128xf32>
    %cst_62 = arith.constant 1.000000e+00 : f32
    %362 = vector.broadcast %cst_62 : f32 to vector<8x128xf32>
    %363 = arith.addf %362, %361 : vector<8x128xf32>
    %364 = arith.divf %362, %363 : vector<8x128xf32>
    %365 = arith.mulf %356, %308 : vector<8x128xf32>
    %366 = arith.mulf %350, %358 : vector<8x128xf32>
    %367 = arith.addf %365, %366 : vector<8x128xf32>
    %368 = math.tanh %367 : vector<8x128xf32>
    %369 = arith.mulf %364, %368 : vector<8x128xf32>
    %370 = vector.extract_strided_slice %8 {offsets = [48, 0], sizes = [8, 512], strides = [1, 1]} : vector<64x512xf32> to vector<8x512xf32>
    %371 = arith.truncf %339 : vector<8x128xf32> to vector<8x128xbf16>
    %cst_63 = arith.constant dense<0.000000e+00> : vector<8x512xf32>
    %372 = tpu.matmul %371, %2, %cst_63 {dimension_numbers = #tpu.dot_dimension_numbers<[1], [0], [0], [1], [0, 0, 1, 1], [], []>} : vector<8x128xbf16>, vector<128x512xbf16>, vector<8x512xf32> -> vector<8x512xf32>
    %373 = arith.addf %370, %372 : vector<8x512xf32>
    %374 = vector.extract_strided_slice %373 {offsets = [0, 0], sizes = [8, 128], strides = [1, 1]} : vector<8x512xf32> to vector<8x128xf32>
    %375 = arith.negf %374 : vector<8x128xf32>
    %376 = math.exp %375 : vector<8x128xf32>
    %cst_64 = arith.constant 1.000000e+00 : f32
    %377 = vector.broadcast %cst_64 : f32 to vector<8x128xf32>
    %378 = arith.addf %377, %376 : vector<8x128xf32>
    %379 = arith.divf %377, %378 : vector<8x128xf32>
    %380 = vector.extract_strided_slice %373 {offsets = [0, 128], sizes = [8, 128], strides = [1, 1]} : vector<8x512xf32> to vector<8x128xf32>
    %381 = arith.negf %380 : vector<8x128xf32>
    %382 = math.exp %381 : vector<8x128xf32>
    %cst_65 = arith.constant 1.000000e+00 : f32
    %383 = vector.broadcast %cst_65 : f32 to vector<8x128xf32>
    %384 = arith.addf %383, %382 : vector<8x128xf32>
    %385 = arith.divf %383, %384 : vector<8x128xf32>
    %386 = vector.extract_strided_slice %373 {offsets = [0, 256], sizes = [8, 128], strides = [1, 1]} : vector<8x512xf32> to vector<8x128xf32>
    %387 = math.tanh %386 : vector<8x128xf32>
    %388 = vector.extract_strided_slice %373 {offsets = [0, 384], sizes = [8, 128], strides = [1, 1]} : vector<8x512xf32> to vector<8x128xf32>
    %389 = arith.negf %388 : vector<8x128xf32>
    %390 = math.exp %389 : vector<8x128xf32>
    %cst_66 = arith.constant 1.000000e+00 : f32
    %391 = vector.broadcast %cst_66 : f32 to vector<8x128xf32>
    %392 = arith.addf %391, %390 : vector<8x128xf32>
    %393 = arith.divf %391, %392 : vector<8x128xf32>
    %394 = arith.mulf %385, %337 : vector<8x128xf32>
    %395 = arith.mulf %379, %387 : vector<8x128xf32>
    %396 = arith.addf %394, %395 : vector<8x128xf32>
    %397 = math.tanh %396 : vector<8x128xf32>
    %398 = arith.mulf %393, %397 : vector<8x128xf32>
    %399 = arith.truncf %398 : vector<8x128xf32> to vector<8x128xbf16>
    %400 = arith.truncf %369 : vector<8x128xf32> to vector<8x128xbf16>
    %401 = tpu.concatenate %399, %400 in 1 : vector<8x128xbf16>, vector<8x128xbf16> -> vector<8x256xbf16>
    %cst_67 = arith.constant dense<0.000000e+00> : vector<8x512xf32>
    %402 = tpu.matmul %401, %3, %cst_67 {dimension_numbers = #tpu.dot_dimension_numbers<[1], [0], [0], [1], [0, 0, 1, 1], [], []>} : vector<8x256xbf16>, vector<256x512xbf16>, vector<8x512xf32> -> vector<8x512xf32>
    %403 = arith.addf %402, %11 : vector<8x512xf32>
    %404 = vector.extract_strided_slice %403 {offsets = [0, 0], sizes = [8, 128], strides = [1, 1]} : vector<8x512xf32> to vector<8x128xf32>
    %405 = arith.negf %404 : vector<8x128xf32>
    %406 = math.exp %405 : vector<8x128xf32>
    %cst_68 = arith.constant 1.000000e+00 : f32
    %407 = vector.broadcast %cst_68 : f32 to vector<8x128xf32>
    %408 = arith.addf %407, %406 : vector<8x128xf32>
    %409 = arith.divf %407, %408 : vector<8x128xf32>
    %410 = vector.extract_strided_slice %403 {offsets = [0, 128], sizes = [8, 128], strides = [1, 1]} : vector<8x512xf32> to vector<8x128xf32>
    %411 = arith.negf %410 : vector<8x128xf32>
    %412 = math.exp %411 : vector<8x128xf32>
    %cst_69 = arith.constant 1.000000e+00 : f32
    %413 = vector.broadcast %cst_69 : f32 to vector<8x128xf32>
    %414 = arith.addf %413, %412 : vector<8x128xf32>
    %415 = arith.divf %413, %414 : vector<8x128xf32>
    %416 = vector.extract_strided_slice %403 {offsets = [0, 256], sizes = [8, 128], strides = [1, 1]} : vector<8x512xf32> to vector<8x128xf32>
    %417 = math.tanh %416 : vector<8x128xf32>
    %418 = vector.extract_strided_slice %403 {offsets = [0, 384], sizes = [8, 128], strides = [1, 1]} : vector<8x512xf32> to vector<8x128xf32>
    %419 = arith.negf %418 : vector<8x128xf32>
    %420 = math.exp %419 : vector<8x128xf32>
    %cst_70 = arith.constant 1.000000e+00 : f32
    %421 = vector.broadcast %cst_70 : f32 to vector<8x128xf32>
    %422 = arith.addf %421, %420 : vector<8x128xf32>
    %423 = arith.divf %421, %422 : vector<8x128xf32>
    %424 = arith.mulf %415, %367 : vector<8x128xf32>
    %425 = arith.mulf %409, %417 : vector<8x128xf32>
    %426 = arith.addf %424, %425 : vector<8x128xf32>
    %427 = math.tanh %426 : vector<8x128xf32>
    %428 = arith.mulf %423, %427 : vector<8x128xf32>
    %429 = vector.extract_strided_slice %8 {offsets = [56, 0], sizes = [8, 512], strides = [1, 1]} : vector<64x512xf32> to vector<8x512xf32>
    %430 = arith.truncf %398 : vector<8x128xf32> to vector<8x128xbf16>
    %cst_71 = arith.constant dense<0.000000e+00> : vector<8x512xf32>
    %431 = tpu.matmul %430, %2, %cst_71 {dimension_numbers = #tpu.dot_dimension_numbers<[1], [0], [0], [1], [0, 0, 1, 1], [], []>} : vector<8x128xbf16>, vector<128x512xbf16>, vector<8x512xf32> -> vector<8x512xf32>
    %432 = arith.addf %429, %431 : vector<8x512xf32>
    %433 = vector.extract_strided_slice %432 {offsets = [0, 0], sizes = [8, 128], strides = [1, 1]} : vector<8x512xf32> to vector<8x128xf32>
    %434 = arith.negf %433 : vector<8x128xf32>
    %435 = math.exp %434 : vector<8x128xf32>
    %cst_72 = arith.constant 1.000000e+00 : f32
    %436 = vector.broadcast %cst_72 : f32 to vector<8x128xf32>
    %437 = arith.addf %436, %435 : vector<8x128xf32>
    %438 = arith.divf %436, %437 : vector<8x128xf32>
    %439 = vector.extract_strided_slice %432 {offsets = [0, 128], sizes = [8, 128], strides = [1, 1]} : vector<8x512xf32> to vector<8x128xf32>
    %440 = arith.negf %439 : vector<8x128xf32>
    %441 = math.exp %440 : vector<8x128xf32>
    %cst_73 = arith.constant 1.000000e+00 : f32
    %442 = vector.broadcast %cst_73 : f32 to vector<8x128xf32>
    %443 = arith.addf %442, %441 : vector<8x128xf32>
    %444 = arith.divf %442, %443 : vector<8x128xf32>
    %445 = vector.extract_strided_slice %432 {offsets = [0, 256], sizes = [8, 128], strides = [1, 1]} : vector<8x512xf32> to vector<8x128xf32>
    %446 = math.tanh %445 : vector<8x128xf32>
    %447 = vector.extract_strided_slice %432 {offsets = [0, 384], sizes = [8, 128], strides = [1, 1]} : vector<8x512xf32> to vector<8x128xf32>
    %448 = arith.negf %447 : vector<8x128xf32>
    %449 = math.exp %448 : vector<8x128xf32>
    %cst_74 = arith.constant 1.000000e+00 : f32
    %450 = vector.broadcast %cst_74 : f32 to vector<8x128xf32>
    %451 = arith.addf %450, %449 : vector<8x128xf32>
    %452 = arith.divf %450, %451 : vector<8x128xf32>
    %453 = arith.mulf %444, %396 : vector<8x128xf32>
    %454 = arith.mulf %438, %446 : vector<8x128xf32>
    %455 = arith.addf %453, %454 : vector<8x128xf32>
    %456 = math.tanh %455 : vector<8x128xf32>
    %457 = arith.mulf %452, %456 : vector<8x128xf32>
    %458 = arith.truncf %457 : vector<8x128xf32> to vector<8x128xbf16>
    %459 = arith.truncf %428 : vector<8x128xf32> to vector<8x128xbf16>
    %460 = tpu.concatenate %458, %459 in 1 : vector<8x128xbf16>, vector<8x128xbf16> -> vector<8x256xbf16>
    %cst_75 = arith.constant dense<0.000000e+00> : vector<8x512xf32>
    %461 = tpu.matmul %460, %3, %cst_75 {dimension_numbers = #tpu.dot_dimension_numbers<[1], [0], [0], [1], [0, 0, 1, 1], [], []>} : vector<8x256xbf16>, vector<256x512xbf16>, vector<8x512xf32> -> vector<8x512xf32>
    %462 = arith.addf %461, %11 : vector<8x512xf32>
    %463 = vector.extract_strided_slice %462 {offsets = [0, 0], sizes = [8, 128], strides = [1, 1]} : vector<8x512xf32> to vector<8x128xf32>
    %464 = arith.negf %463 : vector<8x128xf32>
    %465 = math.exp %464 : vector<8x128xf32>
    %cst_76 = arith.constant 1.000000e+00 : f32
    %466 = vector.broadcast %cst_76 : f32 to vector<8x128xf32>
    %467 = arith.addf %466, %465 : vector<8x128xf32>
    %468 = arith.divf %466, %467 : vector<8x128xf32>
    %469 = vector.extract_strided_slice %462 {offsets = [0, 128], sizes = [8, 128], strides = [1, 1]} : vector<8x512xf32> to vector<8x128xf32>
    %470 = arith.negf %469 : vector<8x128xf32>
    %471 = math.exp %470 : vector<8x128xf32>
    %cst_77 = arith.constant 1.000000e+00 : f32
    %472 = vector.broadcast %cst_77 : f32 to vector<8x128xf32>
    %473 = arith.addf %472, %471 : vector<8x128xf32>
    %474 = arith.divf %472, %473 : vector<8x128xf32>
    %475 = vector.extract_strided_slice %462 {offsets = [0, 256], sizes = [8, 128], strides = [1, 1]} : vector<8x512xf32> to vector<8x128xf32>
    %476 = math.tanh %475 : vector<8x128xf32>
    %477 = vector.extract_strided_slice %462 {offsets = [0, 384], sizes = [8, 128], strides = [1, 1]} : vector<8x512xf32> to vector<8x128xf32>
    %478 = arith.negf %477 : vector<8x128xf32>
    %479 = math.exp %478 : vector<8x128xf32>
    %cst_78 = arith.constant 1.000000e+00 : f32
    %480 = vector.broadcast %cst_78 : f32 to vector<8x128xf32>
    %481 = arith.addf %480, %479 : vector<8x128xf32>
    %482 = arith.divf %480, %481 : vector<8x128xf32>
    %483 = arith.mulf %474, %426 : vector<8x128xf32>
    %484 = arith.mulf %468, %476 : vector<8x128xf32>
    %485 = arith.addf %483, %484 : vector<8x128xf32>
    %486 = math.tanh %485 : vector<8x128xf32>
    %487 = arith.mulf %482, %486 : vector<8x128xf32>
    %488 = arith.truncf %487 : vector<8x128xf32> to vector<8x128xbf16>
    %c0_79 = arith.constant 0 : index
    %c0_80 = arith.constant 0 : index
    %489 = vector.load %arg6[%c0_79, %c0_80] : memref<128x128xbf16, #tpu.memory_space<vmem>>, vector<128x128xbf16>
    %cst_81 = arith.constant dense<0.000000e+00> : vector<8x128xf32>
    %490 = tpu.matmul %488, %489, %cst_81 {dimension_numbers = #tpu.dot_dimension_numbers<[1], [0], [0], [1], [0, 0, 1, 1], [], []>} : vector<8x128xbf16>, vector<128x128xbf16>, vector<8x128xf32> -> vector<8x128xf32>
    %c0_82 = arith.constant 0 : index
    %c0_83 = arith.constant 0 : index
    %491 = vector.load %arg7[%c0_82, %c0_83] : memref<1x128xf32, #tpu.memory_space<vmem>>, vector<1x128xf32>
    %492 = vector.broadcast %491 : vector<1x128xf32> to vector<8x128xf32>
    %493 = arith.addf %490, %492 : vector<8x128xf32>
    %c0_84 = arith.constant 0 : index
    %c0_85 = arith.constant 0 : index
    %494 = vector.load %arg8[%c0_84, %c0_85] : memref<8x128xf32, #tpu.memory_space<vmem>>, vector<8x128xf32>
    tpu.vector_store %arg8[%c0_84, %c0_85], %493 {strides = array<i32>} : memref<8x128xf32, #tpu.memory_space<vmem>>, vector<8x128xf32>,
    return
  }
}

</mosaic_0001>

<bundles_post_ra>
// kernel: tpu_custom_call.1
= control target key start
LH: loop header
LB: loop body
LE: loop exit
PB: predicated region body
PF: predicated region fallthrough
CT: control target
= control target key end

     0   :  { %13 = vsyncpa [#allocation3], 0  ;;  %s5482_s0 = inlined_call_operand.vmem [shape: bf16[64,28], index: 0, kind: input, shape index: {}]   ;;  %s5483_s1 = inlined_call_operand.hbm [shape: bf16[28,512], index: 1, kind: input, shape index: {}]   ;;  %s5484_s2 = inlined_call_operand.hbm [shape: bf16[128,512], index: 2, kind: input, shape index: {}]   ;;  %s5485_s3 = inlined_call_operand.vmem [shape: f32[1,512], index: 3, kind: input, shape index: {}]   ;;  %s5486_s4 = inlined_call_operand.hbm [shape: bf16[256,512], index: 4, kind: input, shape index: {}]   ;;  %s5487_s5 = inlined_call_operand.vmem [shape: f32[1,512], index: 5, kind: input, shape index: {}]   ;;  %s5488_s6 = inlined_call_operand.hbm [shape: bf16[128,128], index: 6, kind: input, shape index: {}]   ;;  %s5489_s7 = inlined_call_operand.vmem [shape: f32[1,128], index: 7, kind: input, shape index: {}]   ;;  %s5490_s8 = inlined_call_operand.hbm [shape: f32[8,128], index: 8, kind: output, shape index: {}]  }
   0x1   :  { %14 = vsyncpa [#allocation6], 0 }
   0x2   :  { %15 = vsyncpa [#allocation9], 0 }
   0x3   :  { %16 = vsyncpa [#allocation4], 0  ;;  %s3763_s27 = smov [#allocation5]   ;;  %s3764_s29 = smov [#allocation2]  }
   0x4   :  { %s36_s28 = sshll.u32 %s3763_s27, 4  ;;  %s24_s30 = sshll.u32 %s3764_s29, 4  ;;  %s37_s28 = int_to_ptr.vmem [resolvable:$true] %s36_s28  ;;  %s25_s30 = int_to_ptr.vmem [resolvable:$true] %s24_s30 }
   0x5   :  { %s3663_s9 = scalar_lea.vmem %s37_s28, 4096  ;;  %p3668_p1 = scmp.lt.s32.totalorder %s37_s28, %s37_s28 }
   0x6   :  { %p3664_p0 = scmp.ne.s32.totalorder %s37_s28, %s3663_s9  ;;  %p3669_p2 = scmp.lt.s32.totalorder %s3663_s9, %s3663_s9 }
   0x8   :  { %p3670_p3 = por %p3669_p2, %p3668_p1 }
   0xa   :  { %p3671_p4 = pnand %p3670_p3, %p3664_p0 }
   0xc   :  { %3674 = shalt.err (!%p3671_p4)
}
   0xd   :  { %s3765_s10 = smov 256   ;;  %s3766_s11 = smov 16  }
   0xe   :  { %42 = dma.hbm_to_vmem [thread:$0]  %s5484_s2, 4096, %s37_s28, [#allocation6], %s3765_s10, %s3765_s10, %s3766_s11  }
   0xf   :  { %s3683_s14 = scalar_lea.vmem %s25_s30, 1024  ;;  %p3688_p6 = scmp.lt.s32.totalorder %s25_s30, %s25_s30 }
  0x10   :  { %p3684_p5 = scmp.ne.s32.totalorder %s25_s30, %s3683_s14  ;;  %p3689_p7 = scmp.lt.s32.totalorder %s3683_s14, %s3683_s14 }
  0x12   :  { %p3690_p8 = por %p3689_p7, %p3688_p6 }
  0x14   :  { %p3691_p9 = pnand %p3690_p8, %p3684_p5 }
  0x16   :  { %3694 = shalt.err (!%p3691_p9)
}
  0x17   :  { %30 = dma.hbm_to_vmem [thread:$0]  %s5483_s1, 1024, %s25_s30, [#allocation3], %s3765_s10, %s3765_s10, %s3766_s11  }
  0x18   :  { %s3767_s17 = smov [#allocation7]   ;;  %s3768_s19 = smov [#allocation8]  }
  0x19   :  { %s50_s18 = sshll.u32 %s3767_s17, 4  ;;  %s64_s20 = sshll.u32 %s3768_s19, 4  ;;  %s51_s18 = int_to_ptr.vmem [resolvable:$true] %s50_s18  ;;  %s65_s20 = int_to_ptr.vmem [resolvable:$true] %s64_s20 }
  0x1a   :  { %s3703_s21 = scalar_lea.vmem %s51_s18, 8192  ;;  %p3708_p11 = scmp.lt.s32.totalorder %s51_s18, %s51_s18 }
  0x1b   :  { %p3704_p10 = scmp.ne.s32.totalorder %s51_s18, %s3703_s21  ;;  %p3709_p12 = scmp.lt.s32.totalorder %s3703_s21, %s3703_s21 }
  0x1d   :  { %p3710_p13 = por %p3709_p12, %p3708_p11 }
  0x1f   :  { %p3711_p0 = pnand %p3710_p13, %p3704_p10 }
  0x21   :  { %3714 = shalt.err (!%p3711_p0)
}
  0x22   :  { %56 = dma.hbm_to_vmem [thread:$0]  %s5486_s4, 8192, %s51_s18, [#allocation6], %s3765_s10, %s3765_s10, %s3766_s11  }
  0x23   :  { %s3723_s23 = scalar_lea.vmem %s65_s20, 1024  ;;  %p3728_p2 = scmp.lt.s32.totalorder %s65_s20, %s65_s20 }
  0x24   :  { %p3724_p1 = scmp.ne.s32.totalorder %s65_s20, %s3723_s23  ;;  %p3729_p3 = scmp.lt.s32.totalorder %s3723_s23, %s3723_s23 }
  0x26   :  { %p3730_p4 = por %p3729_p3, %p3728_p2 }
  0x28   :  { %p3731_p5 = pnand %p3730_p4, %p3724_p1 }
  0x2a   :  { %3734 = shalt.err (!%p3731_p5)
}
  0x2b   :  { %s3769_s1 = smov 64   ;;  %s3770_s24 = smov 4  }
  0x2c   :  { %70 = dma.hbm_to_vmem [thread:$0]  %s5488_s6, 1024, %s65_s20, [#allocation9], %s3769_s1, %s3769_s1, %s3770_s24  }
  0x2d   :  { %3755 = dma.done.wait [#allocation3], 1024  }
  0x2e   :  { %3756 = vsyncadd [#allocation3], 4294966272 }
  0x2f   :  { %3757 = dma.done.wait [#allocation6], 12288  }
  0x30   :  { %3758 = vsyncadd [#allocation6], 4294955008 }
  0x31   :  { %3759 = dma.done.wait [#allocation9], 1024  }
  0x32   :  { %3760 = vsyncadd [#allocation9], 4294966272  ;;  %v5491_v0 = vmov 0   ;;  %vm289_vm0 = vcmask 1045504   ;;  %v3045_v5 = vld [vmem:[#allocation2 + $0x4] ss:$16 sps:$4 sm:$0xff]  }
  0x33   :  { %334 = vmatprep.mubr.bf16.mxu0 %v5491_v0  ;;  %407 = vmatprep.mubr.bf16.mxu1 %v5491_v0  ;;  %v3039_v1 = vld [vmem:[#allocation2 + $0x24] ss:$16 sps:$4 sm:$0x3f]   ;;  %v3041_v2 = vld [vmem:[#allocation2 + $0x2c] ss:$16 sps:$4 sm:$0x3f]  }
  0x34   :  { %2835 = vmatprep.subr.msk.bf16.mxu0 %vm289_vm0, %v3039_v1  ;;  %v3043_v3 = vld [vmem:[#allocation2 + $0x20] ss:$16 sps:$4 sm:$0x3f]   ;;  %v3044_v4 = vld [vmem:[#allocation2 + $0x28] ss:$16 sps:$4 sm:$0x3f]   ;;  %2840 = vmatprep.subr.msk.bf16.mxu1 %vm289_vm0, %v3041_v2 }
  0x35   :  { %v291_v6 = vsel %vm289_vm0, %v3043_v3, 0  ;;  %v297_v7 = vsel %vm289_vm0, %v3044_v4, 0  ;;  %v3047_v8 = vld [vmem:[#allocation2 + $0xc] ss:$16 sps:$4 sm:$0xff]   ;;  %v3049_v9 = vld [vmem:[#allocation2] ss:$16 sps:$4 sm:$0xff]  }
  0x36   :  { %315 = vmatpush1.bf16.msra.mxu0 %v291_v6  ;;  %388 = vmatpush1.bf16.msra.mxu1 %v297_v7  ;;  %v3050_v10 = vld [vmem:[#allocation2 + $0x8] ss:$16 sps:$4 sm:$0xff]   ;;  %v3051_v11 = vld [vmem:[%s5482_s0] sm:$0xff]   ;;  %v3839_v13 = vld [vmem:[#allocation5 + $0xec] ss:$16 sps:$4 sm:$0xff]   ;;  %vm276_vm1 = vcmask 228352  }
  0x37   :  { %316 = vmatprep.subr.bf16.mxu0 %v3045_v5  ;;  %389 = vmatprep.subr.bf16.mxu1 %v3047_v8  ;;  %v3837_v12 = vld [vmem:[#allocation5 + $0xe4] ss:$16 sps:$4 sm:$0xff]   ;;  %v3841_v14 = vld [vmem:[#allocation5 + $0xe0] ss:$16 sps:$4 sm:$0xff]   ;;  %v3843_v15 = vld [vmem:[#allocation5 + $0xe8] ss:$16 sps:$4 sm:$0xff]  }
  0x38   :  { %v3847_v16 = vld [vmem:[#allocation5 + $0xc4] ss:$16 sps:$4 sm:$0xff]   ;;  %v3849_v17 = vld [vmem:[#allocation5 + $0xcc] ss:$16 sps:$4 sm:$0xff]   ;;  %v3851_v18 = vld [vmem:[#allocation5 + $0xc0] ss:$16 sps:$4 sm:$0xff]  }
  0x39   :  { %v3855_v19 = vld [vmem:[#allocation5 + $0xc8] ss:$16 sps:$4 sm:$0xff]   ;;  %v3859_v20 = vld [vmem:[#allocation5 + $0xa4] ss:$16 sps:$4 sm:$0xff]   ;;  %v3863_v21 = vld [vmem:[#allocation5 + $0xac] ss:$16 sps:$4 sm:$0xff]  }
  0x3a   :  { %317 = vmatpush1.bf16.msra.mxu0 %v3049_v9  ;;  %390 = vmatpush1.bf16.msra.mxu1 %v3050_v10  ;;  %v3064_v22 = vld [vmem:[%s5482_s0 + $0x8] sm:$0xff]   ;;  %v3870_v23 = vld [vmem:[#allocation5 + $0xa0] ss:$16 sps:$4 sm:$0xff]   ;;  %v3876_v25 = vld [vmem:[#allocation5 + $0x84] ss:$16 sps:$4 sm:$0xff]   ;;  %vm3773_vm2 = vmmov 0  }
  0x3b   :  { %630 = vmatprep.subr.bf16.mxu0 %v3837_v12  ;;  %671 = vmatprep.subr.bf16.mxu1 %v3839_v13  ;;  %v3874_v24 = vld [vmem:[#allocation5 + $0xa8] ss:$16 sps:$4 sm:$0xff]   ;;  %v3880_v26 = vld [vmem:[#allocation5 + $0x8c] ss:$16 sps:$4 sm:$0xff]   ;;  %v3886_v27 = vld [vmem:[#allocation5 + $0x80] ss:$16 sps:$4 sm:$0xff]  }
  0x3c   :  { %v3888_v28 = vld [vmem:[#allocation5 + $0x88] ss:$16 sps:$4 sm:$0xff]   ;;  %v3890_v29 = vld [vmem:[#allocation5 + $0x64] ss:$16 sps:$4 sm:$0xff]   ;;  %v3894_v30 = vld [vmem:[#allocation5 + $0x6c] ss:$16 sps:$4 sm:$0xff]  }
  0x3d   :  { %2836 = vmatmul.mubr.msk.bf16.vlgmr.msra.gmra.mxu0 %vm276_vm1, %v3051_v11  ;;  %2841 = vmatmul.mubr.msk.bf16.vlgmr.msra.gmra.mxu1 %vm276_vm1, %v3051_v11  ;;  %v3077_v31 = vld [vmem:[%s5482_s0 + $0x10] sm:$0xff]   ;;  %v3903_v33 = vld [vmem:[#allocation5 + $0x68] ss:$16 sps:$4 sm:$0xff]   ;;  %v3911_v35 = vld [vmem:[#allocation5 + $0x4c] ss:$16 sps:$4 sm:$0xff]   ;;  %s3774_s14 = smov [#allocation10]  }
  0x3e   :  { %631 = vmatpush1.bf16.msra.mxu0 %v3841_v14  ;;  %672 = vmatpush1.bf16.msra.mxu1 %v3843_v15  ;;  %v3901_v32 = vld [vmem:[#allocation5 + $0x60] ss:$16 sps:$4 sm:$0xff]   ;;  %v3907_v34 = vld [vmem:[#allocation5 + $0x44] ss:$16 sps:$4 sm:$0xff]   ;;  %v3919_v37 = vld [vmem:[#allocation5 + $0x48] ss:$16 sps:$4 sm:$0xff]  }
  0x3f   :  { %632 = vmatprep.subr.bf16.mxu0 %v3847_v16  ;;  %673 = vmatprep.subr.bf16.mxu1 %v3849_v17  ;;  %v3915_v36 = vld [vmem:[#allocation5 + $0x40] ss:$16 sps:$4 sm:$0xff]   ;;  %v3090_v38 = vld [vmem:[%s5482_s0 + $0x18] sm:$0xff]   ;;  %v3926_v39 = vld [vmem:[#allocation5 + $0x24] ss:$16 sps:$4 sm:$0xff]   ;;  %s2812_s15 = sshll.u32 %s3774_s14, 4  ;;  %s2813_s15 = int_to_ptr.vmem [resolvable:$true] %s2812_s15 }
  0x40   :  { %344 = vmatprep.mubr.bf16.mxu0 %v5491_v0  ;;  %417 = vmatprep.mubr.bf16.mxu1 %v5491_v0  ;;  %v3928_v40 = vld [vmem:[#allocation5 + $0x2c] ss:$16 sps:$4 sm:$0xff]   ;;  %v3932_v41 = vld [vmem:[#allocation5 + $0x20] ss:$16 sps:$4 sm:$0xff]   ;;  %v3934_v42 = vld [vmem:[#allocation5 + $0x28] ss:$16 sps:$4 sm:$0xff]   ;;  %p3740_p7 = scmp.lt.s32.totalorder %s2813_s15, %s2813_s15 }
  0x41   :  { %v3936_v43 = vld [vmem:[#allocation5 + $0x4] ss:$16 sps:$4 sm:$0xff]   ;;  %v3938_v44 = vld [vmem:[#allocation5 + $0xc] ss:$16 sps:$4 sm:$0xff]   ;;  %v3944_v45 = vld [vmem:[#allocation5] ss:$16 sps:$4 sm:$0xff]  }
  0x42   :  { %633 = vmatpush1.bf16.msra.mxu0 %v3851_v18  ;;  %674 = vmatpush1.bf16.msra.mxu1 %v3855_v19  ;;  %v3946_v46 = vld [vmem:[#allocation5 + $0x8] ss:$16 sps:$4 sm:$0xff]   ;;  %v3962_v47 = vld [vmem:[#allocation7 + $0xe4] ss:$16 sps:$4 sm:$0xff]   ;;  %v3964_v48 = vld [vmem:[#allocation7 + $0xec] ss:$16 sps:$4 sm:$0xff]  }
  0x43   :  { %634 = vmatprep.subr.bf16.mxu0 %v3859_v20  ;;  %675 = vmatprep.subr.bf16.mxu1 %v3863_v21  ;;  %v3966_v49 = vld [vmem:[#allocation7 + $0xe0] ss:$16 sps:$4 sm:$0xff]   ;;  %v3968_v50 = vld [vmem:[#allocation7 + $0xe8] ss:$16 sps:$4 sm:$0xff]   ;;  %v3974_v51 = vld [vmem:[#allocation7 + $0xc4] ss:$16 sps:$4 sm:$0xff]  }
  0x44   :  { %v3976_v52 = vld [vmem:[#allocation7 + $0xcc] ss:$16 sps:$4 sm:$0xff]   ;;  %v3978_v53 = vld [vmem:[#allocation7 + $0xc0] ss:$16 sps:$4 sm:$0xff]   ;;  %v3980_v54 = vld [vmem:[#allocation7 + $0xc8] ss:$16 sps:$4 sm:$0xff]  }
  0x45   :  { %2837 = vmatmul.mubr.msk.bf16.gmra.mxu0 %vm276_vm1, %v3064_v22  ;;  %2842 = vmatmul.mubr.msk.bf16.gmra.mxu1 %vm276_vm1, %v3064_v22  ;;  %v3986_v55 = vld [vmem:[#allocation7 + $0xa4] ss:$16 sps:$4 sm:$0xff]   ;;  %v3988_v56 = vld [vmem:[#allocation7 + $0xac] ss:$16 sps:$4 sm:$0xff]   ;;  %v3990_v57 = vld [vmem:[#allocation7 + $0xa0] ss:$16 sps:$4 sm:$0xff]  }
  0x46   :  { %635 = vmatpush1.bf16.msra.mxu0 %v3870_v23  ;;  %676 = vmatpush1.bf16.msra.mxu1 %v3874_v24  ;;  %5834 = vst [vmem:[#allocation15_spill] sm:$0xff] %v3988_v56  ;;  %5835 = vst [vmem:[#allocation16_spill] sm:$0xff] %v3990_v57  ;;  %v3992_v58 = vld [vmem:[#allocation7 + $0xa8] ss:$16 sps:$4 sm:$0xff]   ;;  %v3998_v59 = vld [vmem:[#allocation7 + $0x84] ss:$16 sps:$4 sm:$0xff]  }
  0x47   :  { %636 = vmatprep.subr.bf16.mxu0 %v3876_v25  ;;  %677 = vmatprep.subr.bf16.mxu1 %v3880_v26  ;;  %5836 = vst [vmem:[#allocation17_spill] sm:$0xff] %v3992_v58  ;;  %5837 = vst [vmem:[#allocation18_spill] sm:$0xff] %v3998_v59  ;;  %v4000_v60 = vld [vmem:[#allocation7 + $0x8c] ss:$16 sps:$4 sm:$0xff]   ;;  %v4002_v61 = vld [vmem:[#allocation7 + $0x80] ss:$16 sps:$4 sm:$0xff]  }
  0x48   :  { %354 = vmatprep.mubr.bf16.mxu0 %v5491_v0  ;;  %427 = vmatprep.mubr.bf16.mxu1 %v5491_v0  ;;  %5838 = vst [vmem:[#allocation19_spill] sm:$0xff] %v4000_v60  ;;  %5839 = vst [vmem:[#allocation20_spill] sm:$0xff] %v4002_v61  ;;  %v4004_v62 = vld [vmem:[#allocation7 + $0x88] ss:$16 sps:$4 sm:$0xff]   ;;  %v4010_v63 = vld [vmem:[#allocation7 + $0x64] ss:$16 sps:$4 sm:$0xff]  }
  0x49   :  { %5840 = vst [vmem:[#allocation21_spill] sm:$0xff] %v4004_v62  ;;  %5841 = vst [vmem:[#allocation22_spill] sm:$0xff] %v4010_v63  ;;  %v4012_v1 = vld [vmem:[#allocation7 + $0x6c] ss:$16 sps:$4 sm:$0xff]   ;;  %v4014_v2 = vld [vmem:[#allocation7 + $0x60] ss:$16 sps:$4 sm:$0xff]  }
  0x4a   :  { %637 = vmatpush1.bf16.msra.mxu0 %v3886_v27  ;;  %678 = vmatpush1.bf16.msra.mxu1 %v3888_v28  ;;  %5842 = vst [vmem:[#allocation23_spill] sm:$0xff] %v4012_v1  ;;  %5843 = vst [vmem:[#allocation24_spill] sm:$0xff] %v4014_v2  ;;  %v4016_v3 = vld [vmem:[#allocation7 + $0x68] ss:$16 sps:$4 sm:$0xff]   ;;  %v4022_v4 = vld [vmem:[#allocation7 + $0x44] ss:$16 sps:$4 sm:$0xff]  }
  0x4b   :  { %638 = vmatprep.subr.bf16.mxu0 %v3890_v29  ;;  %679 = vmatprep.subr.bf16.mxu1 %v3894_v30  ;;  %5844 = vst [vmem:[#allocation25_spill] sm:$0xff] %v4016_v3  ;;  %5845 = vst [vmem:[#allocation26_spill] sm:$0xff] %v4022_v4  ;;  %v4024_v5 = vld [vmem:[#allocation7 + $0x4c] ss:$16 sps:$4 sm:$0xff]   ;;  %v4026_v6 = vld [vmem:[#allocation7 + $0x40] ss:$16 sps:$4 sm:$0xff]  }
  0x4c   :  { %5846 = vst [vmem:[#allocation27_spill] sm:$0xff] %v4024_v5  ;;  %5847 = vst [vmem:[#allocation28_spill] sm:$0xff] %v4026_v6  ;;  %v4028_v7 = vld [vmem:[#allocation7 + $0x48] ss:$16 sps:$4 sm:$0xff]   ;;  %v4034_v8 = vld [vmem:[#allocation7 + $0x24] ss:$16 sps:$4 sm:$0xff]  }
  0x4d   :  { %2838 = vmatmul.mubr.msk.bf16.gmra.mxu0 %vm276_vm1, %v3077_v31  ;;  %2843 = vmatmul.mubr.msk.bf16.gmra.mxu1 %vm276_vm1, %v3077_v31  ;;  %5848 = vst [vmem:[#allocation29_spill] sm:$0xff] %v4028_v7  ;;  %5849 = vst [vmem:[#allocation30_spill] sm:$0xff] %v4034_v8  ;;  %v4036_v9 = vld [vmem:[#allocation7 + $0x2c] ss:$16 sps:$4 sm:$0xff]   ;;  %v4038_v10 = vld [vmem:[#allocation7 + $0x20] ss:$16 sps:$4 sm:$0xff]  }
  0x4e   :  { %639 = vmatpush1.bf16.msra.mxu0 %v3901_v32  ;;  %680 = vmatpush1.bf16.msra.mxu1 %v3903_v33  ;;  %5850 = vst [vmem:[#allocation31_spill] sm:$0xff] %v4036_v9  ;;  %5851 = vst [vmem:[#allocation32_spill] sm:$0xff] %v4038_v10  ;;  %v4040_v11 = vld [vmem:[#allocation7 + $0x28] ss:$16 sps:$4 sm:$0xff]   ;;  %v4046_v22 = vld [vmem:[#allocation7 + $0x4] ss:$16 sps:$4 sm:$0xff]  }
  0x4f   :  { %640 = vmatprep.subr.bf16.mxu0 %v3907_v34  ;;  %681 = vmatprep.subr.bf16.mxu1 %v3911_v35  ;;  %5852 = vst [vmem:[#allocation33_spill] sm:$0xff] %v4040_v11  ;;  %5853 = vst [vmem:[#allocation34_spill] sm:$0xff] %v4046_v22  ;;  %v4048_v31 = vld [vmem:[#allocation7 + $0xc] ss:$16 sps:$4 sm:$0xff]   ;;  %s3735_s16 = scalar_lea.vmem %s2813_s15, 128 }
  0x50   :  { %364 = vmatprep.mubr.bf16.mxu0 %v5491_v0  ;;  %437 = vmatprep.mubr.bf16.mxu1 %v5491_v0  ;;  %5854 = vst [vmem:[#allocation35_spill] sm:$0xff] %v4048_v31  ;;  %p3736_p6 = scmp.ne.s32.totalorder %s2813_s15, %s3735_s16  ;;  %p3741_p8 = scmp.lt.s32.totalorder %s3735_s16, %s3735_s16 }
  0x52   :  { %641 = vmatpush1.bf16.msra.mxu0 %v3915_v36  ;;  %682 = vmatpush1.bf16.msra.mxu1 %v3919_v37  ;;  %p3742_p9 = por %p3741_p8, %p3740_p7 }
  0x53   :  { %642 = vmatprep.subr.bf16.mxu0 %v3926_v39  ;;  %683 = vmatprep.subr.bf16.mxu1 %v3928_v40 }
  0x54   :  { %p3743_p10 = pnand %p3742_p9, %p3736_p6 }
  0x55   :  { %2839 = vmatmul.mubr.msk.bf16.gmra.mxu0 %vm276_vm1, %v3090_v38  ;;  %2844 = vmatmul.mubr.msk.bf16.gmra.mxu1 %vm276_vm1, %v3090_v38  ;;  %v4050_v38 = vld [vmem:[#allocation7] ss:$16 sps:$4 sm:$0xff]  }
  0x56   :  { %643 = vmatpush1.bf16.msra.mxu0 %v3932_v41  ;;  %684 = vmatpush1.bf16.msra.mxu1 %v3934_v42  ;;  %5855 = vst [vmem:[#allocation36_spill] sm:$0xff] %v4050_v38 }
  0x57   :  { %644 = vmatprep.subr.bf16.mxu0 %v3936_v43  ;;  %685 = vmatprep.subr.bf16.mxu1 %v3938_v44 }
  0x58   :  { %662 = vmatprep.mubr.bf16.mxu0 %v5491_v0  ;;  %703 = vmatprep.mubr.bf16.mxu1 %v5491_v0 }
  0x5a   :  { %645 = vmatpush1.bf16.msra.mxu0 %v3944_v45  ;;  %686 = vmatpush1.bf16.msra.mxu1 %v3946_v46 }
  0x5b   :  { %1061 = vmatprep.subr.bf16.mxu0 %v3962_v47  ;;  %1102 = vmatprep.subr.bf16.mxu1 %v3964_v48 }
  0x5d   :  { %663 = vmatmul.mubr.bf16.vlgmr.msra.gmra.mxu0 %v5491_v0  ;;  %704 = vmatmul.mubr.bf16.vlgmr.msra.gmra.mxu1 %v5491_v0 }
  0x5e   :  { %1093 = vmatprep.mubr.bf16.mxu0 %v5491_v0  ;;  %1134 = vmatprep.mubr.bf16.mxu1 %v5491_v0  ;;  %v4052_v0 = vld [vmem:[#allocation7 + $0x8] ss:$16 sps:$4 sm:$0xff]  }
  0x5f   :  { %1062 = vmatpush1.bf16.msra.mxu0 %v3966_v49  ;;  %1103 = vmatpush1.bf16.msra.mxu1 %v3968_v50  ;;  %5856 = vst [vmem:[#allocation37_spill] sm:$0xff] %v4052_v0 }
  0x60   :  { %1063 = vmatprep.subr.bf16.mxu0 %v3974_v51  ;;  %1104 = vmatprep.subr.bf16.mxu1 %v3976_v52 }
  0x63   :  { %1064 = vmatpush1.bf16.msra.mxu0 %v3978_v53  ;;  %1105 = vmatpush1.bf16.msra.mxu1 %v3980_v54 }
  0x64   :  { %1065 = vmatprep.subr.bf16.mxu0 %v3986_v55  ;;  %1106 = vmatprep.subr.bf16.mxu1 %v3988_v56 }
  0x67   :  { %1066 = vmatpush1.bf16.msra.mxu0 %v3990_v57  ;;  %1107 = vmatpush1.bf16.msra.mxu1 %v3992_v58 }
  0x68   :  { %1067 = vmatprep.subr.bf16.mxu0 %v3998_v59  ;;  %1108 = vmatprep.subr.bf16.mxu1 %v4000_v60 }
  0x6b   :  { %1068 = vmatpush1.bf16.msra.mxu0 %v4002_v61  ;;  %1109 = vmatpush1.bf16.msra.mxu1 %v4004_v62 }
  0x6c   :  { %1069 = vmatprep.subr.bf16.mxu0 %v4010_v63  ;;  %1110 = vmatprep.subr.bf16.mxu1 %v4012_v1 }
  0x6f   :  { %1070 = vmatpush1.bf16.msra.mxu0 %v4014_v2  ;;  %1111 = vmatpush1.bf16.msra.mxu1 %v4016_v3 }
  0x70   :  { %1071 = vmatprep.subr.bf16.mxu0 %v4022_v4  ;;  %1112 = vmatprep.subr.bf16.mxu1 %v4024_v5 }
  0x73   :  { %1072 = vmatpush1.bf16.msra.mxu0 %v4026_v6  ;;  %1113 = vmatpush1.bf16.msra.mxu1 %v4028_v7  ;;  %v4114_v7 = vld [vmem:[#allocation7 + $0x144] ss:$16 sps:$4 sm:$0xff]   ;;  %v4116_v6 = vld [vmem:[#allocation7 + $0x14c] ss:$16 sps:$4 sm:$0xff]  }
  0x74   :  { %1073 = vmatprep.subr.bf16.mxu0 %v4034_v8  ;;  %1114 = vmatprep.subr.bf16.mxu1 %v4036_v9  ;;  %v4058_v9 = vld [vmem:[#allocation7 + $0x1e4] ss:$16 sps:$4 sm:$0xff]   ;;  %v4064_v8 = vld [vmem:[#allocation7 + $0x1e8] ss:$16 sps:$4 sm:$0xff]   ;;  %5877 = vst [vmem:[#allocation58_spill] sm:$0xff] %v4114_v7  ;;  %5878 = vst [vmem:[#allocation59_spill] sm:$0xff] %v4116_v6 }
  0x75   :  { %5857 = vst [vmem:[#allocation38_spill] sm:$0xff] %v4058_v9  ;;  %5860 = vst [vmem:[#allocation41_spill] sm:$0xff] %v4064_v8 }
  0x77   :  { %1074 = vmatpush1.bf16.msra.mxu0 %v4038_v10  ;;  %1115 = vmatpush1.bf16.msra.mxu1 %v4040_v11  ;;  %v4060_v10 = vld [vmem:[#allocation7 + $0x1ec] ss:$16 sps:$4 sm:$0xff]   ;;  %v4062_v11 = vld [vmem:[#allocation7 + $0x1e0] ss:$16 sps:$4 sm:$0xff]  }
  0x78   :  { %1075 = vmatprep.subr.bf16.mxu0 %v4046_v22  ;;  %1116 = vmatprep.subr.bf16.mxu1 %v4048_v31  ;;  %5858 = vst [vmem:[#allocation39_spill] sm:$0xff] %v4060_v10  ;;  %5859 = vst [vmem:[#allocation40_spill] sm:$0xff] %v4062_v11  ;;  %v4070_v31 = vld [vmem:[#allocation7 + $0x1c4] ss:$16 sps:$4 sm:$0xff]   ;;  %v4076_v22 = vld [vmem:[#allocation7 + $0x1c8] ss:$16 sps:$4 sm:$0xff]  }
  0x79   :  { %5861 = vst [vmem:[#allocation42_spill] sm:$0xff] %v4070_v31  ;;  %5864 = vst [vmem:[#allocation45_spill] sm:$0xff] %v4076_v22 }
  0x7b   :  { %1076 = vmatpush1.bf16.msra.mxu0 %v4050_v38  ;;  %1117 = vmatpush1.bf16.msra.mxu1 %v4052_v0  ;;  %v4072_v38 = vld [vmem:[#allocation7 + $0x1cc] ss:$16 sps:$4 sm:$0xff]   ;;  %v4074_v0 = vld [vmem:[#allocation7 + $0x1c0] ss:$16 sps:$4 sm:$0xff]  }
  0x7c   :  { %1077 = vmatprep.subr.bf16.mxu0 %v4058_v9  ;;  %1118 = vmatprep.subr.bf16.mxu1 %v4060_v10  ;;  %5862 = vst [vmem:[#allocation43_spill] sm:$0xff] %v4072_v38  ;;  %5863 = vst [vmem:[#allocation44_spill] sm:$0xff] %v4074_v0  ;;  %v4082_v10 = vld [vmem:[#allocation7 + $0x1a4] ss:$16 sps:$4 sm:$0xff]   ;;  %v4088_v9 = vld [vmem:[#allocation7 + $0x1a8] ss:$16 sps:$4 sm:$0xff]  }
  0x7d   :  { %5865 = vst [vmem:[#allocation46_spill] sm:$0xff] %v4082_v10  ;;  %5868 = vst [vmem:[#allocation49_spill] sm:$0xff] %v4088_v9 }
  0x7f   :  { %1078 = vmatpush2.bf16.msra.mxu0 %v4062_v11  ;;  %1119 = vmatpush2.bf16.msra.mxu1 %v4064_v8  ;;  %v4084_v11 = vld [vmem:[#allocation7 + $0x1ac] ss:$16 sps:$4 sm:$0xff]   ;;  %v4086_v8 = vld [vmem:[#allocation7 + $0x1a0] ss:$16 sps:$4 sm:$0xff]  }
  0x80   :  { %1079 = vmatprep.subr.bf16.mxu0 %v4070_v31  ;;  %1120 = vmatprep.subr.bf16.mxu1 %v4072_v38  ;;  %5866 = vst [vmem:[#allocation47_spill] sm:$0xff] %v4084_v11  ;;  %5867 = vst [vmem:[#allocation48_spill] sm:$0xff] %v4086_v8  ;;  %v4094_v38 = vld [vmem:[#allocation7 + $0x184] ss:$16 sps:$4 sm:$0xff]   ;;  %v4100_v31 = vld [vmem:[#allocation7 + $0x188] ss:$16 sps:$4 sm:$0xff]  }
  0x81   :  { %5869 = vst [vmem:[#allocation50_spill] sm:$0xff] %v4094_v38  ;;  %5872 = vst [vmem:[#allocation53_spill] sm:$0xff] %v4100_v31 }
  0x83   :  { %1080 = vmatpush2.bf16.msra.mxu0 %v4074_v0  ;;  %1121 = vmatpush2.bf16.msra.mxu1 %v4076_v22  ;;  %v4096_v0 = vld [vmem:[#allocation7 + $0x18c] ss:$16 sps:$4 sm:$0xff]   ;;  %v4098_v22 = vld [vmem:[#allocation7 + $0x180] ss:$16 sps:$4 sm:$0xff]  }
  0x84   :  { %1081 = vmatprep.subr.bf16.mxu0 %v4082_v10  ;;  %1122 = vmatprep.subr.bf16.mxu1 %v4084_v11  ;;  %5870 = vst [vmem:[#allocation51_spill] sm:$0xff] %v4096_v0  ;;  %5871 = vst [vmem:[#allocation52_spill] sm:$0xff] %v4098_v22  ;;  %v4106_v11 = vld [vmem:[#allocation7 + $0x164] ss:$16 sps:$4 sm:$0xff]   ;;  %v4112_v10 = vld [vmem:[#allocation7 + $0x168] ss:$16 sps:$4 sm:$0xff]  }
  0x85   :  { %5873 = vst [vmem:[#allocation54_spill] sm:$0xff] %v4106_v11  ;;  %5876 = vst [vmem:[#allocation57_spill] sm:$0xff] %v4112_v10 }
  0x87   :  { %1082 = vmatpush2.bf16.msra.mxu0 %v4086_v8  ;;  %1123 = vmatpush2.bf16.msra.mxu1 %v4088_v9  ;;  %v4108_v8 = vld [vmem:[#allocation7 + $0x16c] ss:$16 sps:$4 sm:$0xff]   ;;  %v4110_v9 = vld [vmem:[#allocation7 + $0x160] ss:$16 sps:$4 sm:$0xff]  }
  0x88   :  { %1083 = vmatprep.subr.bf16.mxu0 %v4094_v38  ;;  %1124 = vmatprep.subr.bf16.mxu1 %v4096_v0  ;;  %5874 = vst [vmem:[#allocation55_spill] sm:$0xff] %v4108_v8  ;;  %5875 = vst [vmem:[#allocation56_spill] sm:$0xff] %v4110_v9  ;;  %v4128_v0 = vld [vmem:[#allocation7 + $0x124] ss:$16 sps:$4 sm:$0xff]   ;;  %v4130_v38 = vld [vmem:[#allocation7 + $0x12c] ss:$16 sps:$4 sm:$0xff]  }
  0x89   :  { %5881 = vst [vmem:[#allocation62_spill] sm:$0xff] %v4128_v0  ;;  %5882 = vst [vmem:[#allocation63_spill] sm:$0xff] %v4130_v38 }
  0x8b   :  { %1084 = vmatpush2.bf16.msra.mxu0 %v4098_v22  ;;  %1125 = vmatpush2.bf16.msra.mxu1 %v4100_v31  ;;  %v4122_v31 = vld [vmem:[#allocation7 + $0x140] ss:$16 sps:$4 sm:$0xff]   ;;  %v4124_v22 = vld [vmem:[#allocation7 + $0x148] ss:$16 sps:$4 sm:$0xff]  }
  0x8c   :  { %1085 = vmatprep.subr.bf16.mxu0 %v4106_v11  ;;  %1126 = vmatprep.subr.bf16.mxu1 %v4108_v8  ;;  %5879 = vst [vmem:[#allocation60_spill] sm:$0xff] %v4122_v31  ;;  %5880 = vst [vmem:[#allocation61_spill] sm:$0xff] %v4124_v22  ;;  %v4134_v8 = vld [vmem:[#allocation7 + $0x120] ss:$16 sps:$4 sm:$0xff]  }
  0x8d   :  { %5883 = vst [vmem:[#allocation64_spill] sm:$0xff] %v4134_v8 }
  0x8f   :  { %1086 = vmatpush2.bf16.msra.mxu0 %v4110_v9  ;;  %1127 = vmatpush2.bf16.msra.mxu1 %v4112_v10  ;;  %v4136_v9 = vld [vmem:[#allocation7 + $0x128] ss:$16 sps:$4 sm:$0xff]   ;;  %v4140_v10 = vld [vmem:[#allocation7 + $0x104] ss:$16 sps:$4 sm:$0xff]  }
  0x90   :  { %1087 = vmatprep.subr.bf16.mxu0 %v4114_v7  ;;  %1128 = vmatprep.subr.bf16.mxu1 %v4116_v6  ;;  %5884 = vst [vmem:[#allocation65_spill] sm:$0xff] %v4136_v9  ;;  %5885 = vst [vmem:[#allocation66_spill] sm:$0xff] %v4140_v10  ;;  %v4142_v7 = vld [vmem:[#allocation7 + $0x10c] ss:$16 sps:$4 sm:$0xff]   ;;  %v4146_v6 = vld [vmem:[#allocation7 + $0x100] ss:$16 sps:$4 sm:$0xff]  }
  0x91   :  { %5886 = vst [vmem:[#allocation67_spill] sm:$0xff] %v4142_v7  ;;  %5887 = vst [vmem:[#allocation68_spill] sm:$0xff] %v4146_v6 }
  0x93   :  { %1088 = vmatpush2.bf16.msra.mxu0 %v4122_v31  ;;  %1129 = vmatpush2.bf16.msra.mxu1 %v4124_v22  ;;  %v4148_v31 = vld [vmem:[#allocation7 + $0x108] ss:$16 sps:$4 sm:$0xff]  }
  0x94   :  { %1089 = vmatprep.subr.bf16.mxu0 %v4128_v0  ;;  %1130 = vmatprep.subr.bf16.mxu1 %v4130_v38  ;;  %5888 = vst [vmem:[#allocation69_spill] sm:$0xff] %v4148_v31  ;;  %v200_v38 = vlaneseq }
  0x97   :  { %1090 = vmatpush2.bf16.msra.mxu0 %v4134_v8  ;;  %1131 = vmatpush2.bf16.msra.mxu1 %v4136_v9  ;;  %v4156_v8 = vshrl.u32 %v200_v38, 7 }
  0x98   :  { %1091 = vmatprep.subr.bf16.mxu0 %v4140_v10  ;;  %1132 = vmatprep.subr.bf16.mxu1 %v4142_v7  ;;  %v198_v7 = vld [vmem:[%s5485_s3] sm:$0xf] }
  0x99   :  { %5889 = vst [vmem:[#allocation70_spill] sm:$0xff] %v4156_v8  ;;  %v5585_v9 = vsub.s32 2, %v4156_v8  ;;  %v5594_v0 = vsub.s32 0, %v4156_v8  ;;  %v5890_v11 = vsub.s32 3, %v4156_v8 }
  0x9b   :  { %1092 = vmatpush2.bf16.msra.mxu0 %v4146_v6  ;;  %1133 = vmatpush2.bf16.msra.mxu1 %v4148_v31  ;;  %v203_v22 = vrot.slane %v198_v7, %v5594_v0  ;;  %v4181_v5 = vrot.slane %v198_v7, %v5890_v11 }
  0x9c   :  { %1167 = vmatprep.subr.bf16.mxu0 %v3837_v12  ;;  %1208 = vmatprep.subr.bf16.mxu1 %v3839_v13  ;;  %v4170_v12 = vrot.slane %v198_v7, %v5585_v9  ;;  %v5601_v13 = vsub.s32 1, %v4156_v8 }
  0x9e   :  { %v207_v2 = vrot.slane %v198_v7, %v5601_v13 }
  0xfd   :  { %v4164_v6 = vpop.f32.mrf.mxu0  ;;  %v4166_v31 = vpop.f32.mrf.mxu1 }
  0xff   :  { %v4173_v38 = vpop.f32.mrf.mxu0  ;;  %v4175_v10 = vpop.f32.mrf.mxu1 }
 0x101   :  { %v340_v4 = vpop.f32.mrf.mxu0  ;;  %v413_v3 = vpop.f32.mrf.mxu1 }
 0x102   :  { %v4185_v9 = vadd.f32 %v340_v4, %v203_v22  ;;  %v4188_v1 = vadd.f32 %v413_v3, %v4170_v12 }
 0x103   :  { %v342_v63 = vpop.f32.mrf.mxu0  ;;  %v415_v62 = vpop.f32.mrf.mxu1 }
 0x104   :  { %5891 = vst [vmem:[#allocation71_spill] sm:$0xff] %v4185_v9  ;;  %5892 = vst [vmem:[#allocation72_spill] sm:$0xff] %v4188_v1  ;;  %v4190_v61 = vadd.f32 %v342_v63, %v207_v2  ;;  %v4193_v0 = vadd.f32 %v415_v62, %v4181_v5 }
 0x105   :  { %v346_v60 = vpop.f32.mrf.mxu0  ;;  %v419_v11 = vpop.f32.mrf.mxu1 }
 0x106   :  { %5893 = vst [vmem:[#allocation73_spill] sm:$0xff] %v4190_v61  ;;  %5894 = vst [vmem:[#allocation74_spill] sm:$0xff] %v4193_v0  ;;  %v4195_v59 = vadd.f32 %v346_v60, %v203_v22  ;;  %v4198_v58 = vadd.f32 %v419_v11, %v4170_v12 }
 0x107   :  { %v348_v7 = vpop.f32.mrf.mxu0  ;;  %v421_v4 = vpop.f32.mrf.mxu1 }
 0x108   :  { %5895 = vst [vmem:[#allocation75_spill] sm:$0xff] %v4195_v59  ;;  %5896 = vst [vmem:[#allocation76_spill] sm:$0xff] %v4198_v58  ;;  %v4200_v13 = vadd.f32 %v348_v7, %v207_v2  ;;  %v4203_v3 = vadd.f32 %v421_v4, %v4181_v5 }
 0x109   :  { %v350_v1 = vpop.f32.mrf.mxu0  ;;  %v423_v63 = vpop.f32.mrf.mxu1 }
 0x10a   :  { %5897 = vst [vmem:[#allocation77_spill] sm:$0xff] %v4200_v13  ;;  %5898 = vst [vmem:[#allocation78_spill] sm:$0xff] %v4203_v3  ;;  %v4205_v61 = vadd.f32 %v350_v1, %v203_v22  ;;  %v4208_v62 = vadd.f32 %v423_v63, %v4170_v12 }
 0x10b   :  { %v352_v0 = vpop.f32.mrf.mxu0  ;;  %v425_v60 = vpop.f32.mrf.mxu1 }
 0x10c   :  { %5899 = vst [vmem:[#allocation79_spill] sm:$0xff] %v4205_v61  ;;  %5900 = vst [vmem:[#allocation80_spill] sm:$0xff] %v4208_v62  ;;  %v4210_v59 = vadd.f32 %v352_v0, %v207_v2  ;;  %v4213_v11 = vadd.f32 %v425_v60, %v4181_v5 }
 0x10d   :  { %v356_v58 = vpop.f32.mrf.mxu0  ;;  %v429_v7 = vpop.f32.mrf.mxu1 }
 0x10e   :  { %5901 = vst [vmem:[#allocation81_spill] sm:$0xff] %v4210_v59  ;;  %5902 = vst [vmem:[#allocation82_spill] sm:$0xff] %v4213_v11  ;;  %v4215_v13 = vadd.f32 %v356_v58, %v203_v22  ;;  %v4218_v4 = vadd.f32 %v429_v7, %v4170_v12 }
 0x10f   :  { %v358_v3 = vpop.f32.mrf.mxu0  ;;  %v431_v1 = vpop.f32.mrf.mxu1 }
 0x110   :  { %5903 = vst [vmem:[#allocation83_spill] sm:$0xff] %v4215_v13  ;;  %5904 = vst [vmem:[#allocation84_spill] sm:$0xff] %v4218_v4  ;;  %v4220_v61 = vadd.f32 %v358_v3, %v207_v2  ;;  %v4223_v63 = vadd.f32 %v431_v1, %v4181_v5 }
 0x111   :  { %v360_v62 = vpop.f32.mrf.mxu0  ;;  %v433_v0 = vpop.f32.mrf.mxu1 }
 0x112   :  { %5905 = vst [vmem:[#allocation85_spill] sm:$0xff] %v4220_v61  ;;  %5906 = vst [vmem:[#allocation86_spill] sm:$0xff] %v4223_v63  ;;  %v4225_v59 = vadd.f32 %v360_v62, %v203_v22  ;;  %v4228_v60 = vadd.f32 %v433_v0, %v4170_v12 }
 0x113   :  { %v362_v11 = vpop.f32.mrf.mxu0  ;;  %v435_v58 = vpop.f32.mrf.mxu1 }
 0x114   :  { %5907 = vst [vmem:[#allocation87_spill] sm:$0xff] %v4225_v59  ;;  %5908 = vst [vmem:[#allocation88_spill] sm:$0xff] %v4228_v60  ;;  %v4230_v13 = vadd.f32 %v362_v11, %v207_v2  ;;  %v4233_v7 = vadd.f32 %v435_v58, %v4181_v5 }
 0x115   :  { %v366_v4 = vpop.f32.mrf.mxu0  ;;  %v439_v3 = vpop.f32.mrf.mxu1 }
 0x116   :  { %5909 = vst [vmem:[#allocation89_spill] sm:$0xff] %v4230_v13  ;;  %5910 = vst [vmem:[#allocation90_spill] sm:$0xff] %v4233_v7  ;;  %v4235_v61 = vadd.f32 %v366_v4, %v203_v22  ;;  %v4238_v1 = vadd.f32 %v439_v3, %v4170_v12 }
 0x117   :  { %v368_v63 = vpop.f32.mrf.mxu0  ;;  %v441_v62 = vpop.f32.mrf.mxu1 }
 0x118   :  { %5911 = vst [vmem:[#allocation91_spill] sm:$0xff] %v4235_v61  ;;  %5912 = vst [vmem:[#allocation92_spill] sm:$0xff] %v4238_v1  ;;  %v4240_v59 = vadd.f32 %v368_v63, %v207_v2  ;;  %v4243_v0 = vadd.f32 %v441_v62, %v4181_v5  ;;  %v337_v61 = vadd.f32 %v4164_v6, %v203_v22 }
 0x119   :  { %v370_v60 = vpop.f32.mrf.mxu0  ;;  %v443_v11 = vpop.f32.mrf.mxu1  ;;  %v339_v62 = vadd.f32 %v4173_v38, %v207_v2 }
 0x11a   :  { %5913 = vst [vmem:[#allocation93_spill] sm:$0xff] %v4240_v59  ;;  %5914 = vst [vmem:[#allocation94_spill] sm:$0xff] %v4243_v0  ;;  %v4245_v13 = vadd.f32 %v370_v60, %v203_v22  ;;  %v4248_v58 = vadd.f32 %v443_v11, %v4170_v12  ;;  %v412_v22 = vadd.f32 %v4175_v10, %v4181_v5 }
 0x11b   :  { %v372_v7 = vpop.f32.mrf.mxu0  ;;  %v445_v4 = vpop.f32.mrf.mxu1 }
 0x11c   :  { %5915 = vst [vmem:[#allocation95_spill] sm:$0xff] %v4245_v13  ;;  %5916 = vst [vmem:[#allocation96_spill] sm:$0xff] %v4248_v58  ;;  %v4251_v3 = vadd.f32 %v372_v7, %v207_v2  ;;  %v4254_v1 = vadd.f32 %v445_v4, %v4181_v5  ;;  %v410_v4 = vadd.f32 %v4166_v31, %v4170_v12 }
 0x11d   :  { %v664_v63 = vpop.f32.mrf.mxu0  ;;  %v705_v59 = vpop.f32.mrf.mxu1 }
 0x11e   :  { %5917 = vst [vmem:[#allocation97_spill] sm:$0xff] %v4251_v3  ;;  %5918 = vst [vmem:[#allocation98_spill] sm:$0xff] %v4254_v1  ;;  %v712_v0 = vadd.f32 %v664_v63, %v337_v61  ;;  %v714_v38 = vadd.f32 %v705_v59, %v410_v4  ;;  %v5953_v4 = vld [vmem:[#allocation48_spill] sm:$0xff]  ;;  %v5971_v1 = vld [vmem:[#allocation66_spill] sm:$0xff] }
 0x11f   :  { %v666_v9 = vpop.f32.mrf.mxu0  ;;  %v707_v60 = vpop.f32.mrf.mxu1  ;;  %v5972_v3 = vld [vmem:[#allocation67_spill] sm:$0xff] }
 0x120   :  { %v2877_v13 = vmul.f32 -1.442695, %v712_v0  ;;  %v713_v8 = vadd.f32 %v666_v9, %v339_v62  ;;  %v715_v7 = vadd.f32 %v707_v60, %v412_v22  ;;  %v5951_v22 = vld [vmem:[#allocation46_spill] sm:$0xff] }
 0x121   :  { %v668_v11 = vpop.f32.mrf.mxu0  ;;  %v709_v58 = vpop.f32.mrf.mxu1 }
 0x122   :  { %3207 = vpow2.f32 %v2877_v13  ;;  %v2878_v57 = vmul.f32 -1.442695, %v713_v8  ;;  %v2879_v2 = vmul.f32 -1.442695, %v715_v7  ;;  %v5919_v11 = vmov 0   ;;  %v5952_v7 = vld [vmem:[#allocation47_spill] sm:$0xff] }
 0x123   :  { %v669_v56 = vpop.f32.mrf.mxu0  ;;  %v710_v6 = vpop.f32.mrf.mxu1 }
 0x124   :  { %3209 = vpow2.f32 %v2878_v57  ;;  %v5950_v6 = vld [vmem:[#allocation45_spill] sm:$0xff] }
 0x125   :  { %3211 = vpow2.f32 %v2879_v2  ;;  %v5954_v2 = vld [vmem:[#allocation49_spill] sm:$0xff] }
 0x12f   :  { %v3208_v61 = vpop.eup %3207 }
 0x130   :  { %v719_v63 = vadd.f32 1.0, %v3208_v61  ;;  %v5955_v61 = vld [vmem:[#allocation50_spill] sm:$0xff] }
 0x131   :  { %v3210_v0 = vpop.eup %3209 }
 0x132   :  { %3213 = vrcp.f32 %v719_v63  ;;  %v725_v9 = vadd.f32 1.0, %v3210_v0  ;;  %v3212_v56 = vpop.eup %3211  ;;  %v5957_v63 = vld [vmem:[#allocation52_spill] sm:$0xff]  ;;  %v5958_v0 = vld [vmem:[#allocation53_spill] sm:$0xff] }
 0x133   :  { %3215 = vtanh.f32 %v714_v38  ;;  %v732_v58 = vadd.f32 1.0, %v3212_v56  ;;  %v5956_v38 = vld [vmem:[#allocation51_spill] sm:$0xff] }
 0x134   :  { %3217 = vrcp.f32 %v725_v9  ;;  %v5959_v9 = vld [vmem:[#allocation54_spill] sm:$0xff]  ;;  %v5960_v56 = vld [vmem:[#allocation55_spill] sm:$0xff] }
 0x135   :  { %3219 = vrcp.f32 %v732_v58  ;;  %v5964_v58 = vld [vmem:[#allocation59_spill] sm:$0xff] }
 0x13f   :  { %v3214_v8 = vpop.eup %3213 }
 0x140   :  { %v3216_v57 = vpop.eup %3215 }
 0x141   :  { %v3218_v13 = vpop.eup %3217  ;;  %v736_v10 = vmul.f32 %v3216_v57, %v3214_v8  ;;  %v5961_v8 = vld [vmem:[#allocation56_spill] sm:$0xff]  ;;  %v5962_v57 = vld [vmem:[#allocation57_spill] sm:$0xff] }
 0x142   :  { %v735_v5 = vmul.f32 0.0, %v3218_v13  ;;  %v3220_v59 = vpop.eup %3219  ;;  %v5963_v13 = vld [vmem:[#allocation58_spill] sm:$0xff] }
 0x144   :  { %v4261_v62 = vadd.f32 %v736_v10, %v735_v5  ;;  %v5965_v5 = vld [vmem:[#allocation60_spill] sm:$0xff]  ;;  %v5966_v10 = vld [vmem:[#allocation61_spill] sm:$0xff] }
 0x146   :  { %3221 = vtanh.f32 %v4261_v62 }
 0x153   :  { %v3222_v31 = vpop.eup %3221 }
 0x154   :  { %v739_v12 = vmul.f32 %v3222_v31, %v3220_v59  ;;  %v5967_v59 = vld [vmem:[#allocation62_spill] sm:$0xff]  ;;  %v5968_v31 = vld [vmem:[#allocation63_spill] sm:$0xff] }
 0x156   :  { %v740_v60 = vpack.c.bf16 %v739_v12, %v739_v12  ;;  %v5969_v12 = vld [vmem:[#allocation64_spill] sm:$0xff] }
 0x158   :  { %1094 = vmatmul.mubr.bf16.vlgmr.msra.gmra.mxu0 %v740_v60  ;;  %1135 = vmatmul.mubr.bf16.vlgmr.msra.gmra.mxu1 %v740_v60 }
 0x159   :  { %1168 = vmatpush1.bf16.msra.mxu0 %v3841_v14  ;;  %1209 = vmatpush1.bf16.msra.mxu1 %v3843_v15  ;;  %v5920_v14 = vld [vmem:[#allocation15_spill] sm:$0xff]  ;;  %v5921_v15 = vld [vmem:[#allocation16_spill] sm:$0xff] }
 0x15a   :  { %1169 = vmatprep.subr.bf16.mxu0 %v3847_v16  ;;  %1210 = vmatprep.subr.bf16.mxu1 %v3849_v17  ;;  %v5922_v16 = vld [vmem:[#allocation17_spill] sm:$0xff]  ;;  %v5923_v17 = vld [vmem:[#allocation18_spill] sm:$0xff] }
 0x15b   :  { %1199 = vmatprep.mubr.bf16.mxu0 %v5919_v11  ;;  %1240 = vmatprep.mubr.bf16.mxu1 %v5919_v11 }
 0x15d   :  { %1170 = vmatpush1.bf16.msra.mxu0 %v3851_v18  ;;  %1211 = vmatpush1.bf16.msra.mxu1 %v3855_v19  ;;  %v5924_v18 = vld [vmem:[#allocation19_spill] sm:$0xff]  ;;  %v5925_v19 = vld [vmem:[#allocation20_spill] sm:$0xff] }
 0x15e   :  { %1171 = vmatprep.subr.bf16.mxu0 %v3859_v20  ;;  %1212 = vmatprep.subr.bf16.mxu1 %v3863_v21  ;;  %v5926_v20 = vld [vmem:[#allocation21_spill] sm:$0xff]  ;;  %v5927_v21 = vld [vmem:[#allocation22_spill] sm:$0xff] }
 0x161   :  { %1172 = vmatpush1.bf16.msra.mxu0 %v3870_v23  ;;  %1213 = vmatpush1.bf16.msra.mxu1 %v3874_v24  ;;  %v5928_v23 = vld [vmem:[#allocation23_spill] sm:$0xff]  ;;  %v5929_v24 = vld [vmem:[#allocation24_spill] sm:$0xff] }
 0x162   :  { %1173 = vmatprep.subr.bf16.mxu0 %v3876_v25  ;;  %1214 = vmatprep.subr.bf16.mxu1 %v3880_v26  ;;  %v5930_v25 = vld [vmem:[#allocation25_spill] sm:$0xff]  ;;  %v5931_v26 = vld [vmem:[#allocation26_spill] sm:$0xff] }
 0x165   :  { %1174 = vmatpush1.bf16.msra.mxu0 %v3886_v27  ;;  %1215 = vmatpush1.bf16.msra.mxu1 %v3888_v28  ;;  %v5932_v27 = vld [vmem:[#allocation27_spill] sm:$0xff]  ;;  %v5933_v28 = vld [vmem:[#allocation28_spill] sm:$0xff] }
 0x166   :  { %1175 = vmatprep.subr.bf16.mxu0 %v3890_v29  ;;  %1216 = vmatprep.subr.bf16.mxu1 %v3894_v30  ;;  %v5934_v29 = vld [vmem:[#allocation29_spill] sm:$0xff]  ;;  %v5935_v30 = vld [vmem:[#allocation30_spill] sm:$0xff] }
 0x169   :  { %1176 = vmatpush1.bf16.msra.mxu0 %v3901_v32  ;;  %1217 = vmatpush1.bf16.msra.mxu1 %v3903_v33  ;;  %v5936_v32 = vld [vmem:[#allocation31_spill] sm:$0xff]  ;;  %v5937_v33 = vld [vmem:[#allocation32_spill] sm:$0xff] }
 0x16a   :  { %1177 = vmatprep.subr.bf16.mxu0 %v3907_v34  ;;  %1218 = vmatprep.subr.bf16.mxu1 %v3911_v35  ;;  %v5938_v34 = vld [vmem:[#allocation33_spill] sm:$0xff]  ;;  %v5939_v35 = vld [vmem:[#allocation34_spill] sm:$0xff] }
 0x16d   :  { %1178 = vmatpush1.bf16.msra.mxu0 %v3915_v36  ;;  %1219 = vmatpush1.bf16.msra.mxu1 %v3919_v37  ;;  %v5940_v36 = vld [vmem:[#allocation35_spill] sm:$0xff]  ;;  %v5941_v37 = vld [vmem:[#allocation36_spill] sm:$0xff] }
 0x16e   :  { %1179 = vmatprep.subr.bf16.mxu0 %v3926_v39  ;;  %1220 = vmatprep.subr.bf16.mxu1 %v3928_v40  ;;  %v5942_v39 = vld [vmem:[#allocation37_spill] sm:$0xff]  ;;  %v5943_v40 = vld [vmem:[#allocation38_spill] sm:$0xff] }
 0x171   :  { %1180 = vmatpush1.bf16.msra.mxu0 %v3932_v41  ;;  %1221 = vmatpush1.bf16.msra.mxu1 %v3934_v42  ;;  %v5944_v41 = vld [vmem:[#allocation39_spill] sm:$0xff]  ;;  %v5945_v42 = vld [vmem:[#allocation40_spill] sm:$0xff] }
 0x172   :  { %1181 = vmatprep.subr.bf16.mxu0 %v3936_v43  ;;  %1222 = vmatprep.subr.bf16.mxu1 %v3938_v44  ;;  %v5946_v43 = vld [vmem:[#allocation41_spill] sm:$0xff]  ;;  %v5947_v44 = vld [vmem:[#allocation42_spill] sm:$0xff] }
 0x175   :  { %1182 = vmatpush1.bf16.msra.mxu0 %v3944_v45  ;;  %1223 = vmatpush1.bf16.msra.mxu1 %v3946_v46  ;;  %v5948_v45 = vld [vmem:[#allocation43_spill] sm:$0xff]  ;;  %v5949_v46 = vld [vmem:[#allocation44_spill] sm:$0xff] }
 0x176   :  { %1279 = vmatprep.subr.bf16.mxu0 %v3962_v47  ;;  %1320 = vmatprep.subr.bf16.mxu1 %v3964_v48 }
 0x178   :  { %1200 = vmatmul.mubr.bf16.vlgmr.msra.gmra.mxu0 %v740_v60  ;;  %1241 = vmatmul.mubr.bf16.vlgmr.msra.gmra.mxu1 %v740_v60  ;;  %v5970_v60 = vld [vmem:[#allocation65_spill] sm:$0xff] }
 0x179   :  { %1280 = vmatpush1.bf16.msra.mxu0 %v3966_v49  ;;  %1321 = vmatpush1.bf16.msra.mxu1 %v3968_v50 }
 0x17a   :  { %1281 = vmatprep.subr.bf16.mxu0 %v3974_v51  ;;  %1322 = vmatprep.subr.bf16.mxu1 %v3976_v52 }
 0x17d   :  { %1282 = vmatpush1.bf16.msra.mxu0 %v3978_v53  ;;  %1323 = vmatpush1.bf16.msra.mxu1 %v3980_v54 }
 0x17e   :  { %1283 = vmatprep.subr.bf16.mxu0 %v3986_v55  ;;  %1324 = vmatprep.subr.bf16.mxu1 %v5920_v14 }
 0x181   :  { %1284 = vmatpush1.bf16.msra.mxu0 %v5921_v15  ;;  %1325 = vmatpush1.bf16.msra.mxu1 %v5922_v16 }
 0x182   :  { %1285 = vmatprep.subr.bf16.mxu0 %v5923_v17  ;;  %1326 = vmatprep.subr.bf16.mxu1 %v5924_v18 }
 0x185   :  { %1286 = vmatpush1.bf16.msra.mxu0 %v5925_v19  ;;  %1327 = vmatpush1.bf16.msra.mxu1 %v5926_v20 }
 0x186   :  { %1287 = vmatprep.subr.bf16.mxu0 %v5927_v21  ;;  %1328 = vmatprep.subr.bf16.mxu1 %v5928_v23 }
 0x189   :  { %1288 = vmatpush1.bf16.msra.mxu0 %v5929_v24  ;;  %1329 = vmatpush1.bf16.msra.mxu1 %v5930_v25 }
 0x18a   :  { %1289 = vmatprep.subr.bf16.mxu0 %v5931_v26  ;;  %1330 = vmatprep.subr.bf16.mxu1 %v5932_v27 }
 0x18d   :  { %1290 = vmatpush1.bf16.msra.mxu0 %v5933_v28  ;;  %1331 = vmatpush1.bf16.msra.mxu1 %v5934_v29 }
 0x18e   :  { %1291 = vmatprep.subr.bf16.mxu0 %v5935_v30  ;;  %1332 = vmatprep.subr.bf16.mxu1 %v5936_v32 }
 0x191   :  { %1292 = vmatpush1.bf16.msra.mxu0 %v5937_v33  ;;  %1333 = vmatpush1.bf16.msra.mxu1 %v5938_v34 }
 0x192   :  { %1293 = vmatprep.subr.bf16.mxu0 %v5939_v35  ;;  %1334 = vmatprep.subr.bf16.mxu1 %v5940_v36 }
 0x195   :  { %1294 = vmatpush1.bf16.msra.mxu0 %v5941_v37  ;;  %1335 = vmatpush1.bf16.msra.mxu1 %v5942_v39 }
 0x196   :  { %1295 = vmatprep.subr.bf16.mxu0 %v5943_v40  ;;  %1336 = vmatprep.subr.bf16.mxu1 %v5944_v41 }
 0x199   :  { %1296 = vmatpush2.bf16.msra.mxu0 %v5945_v42  ;;  %1337 = vmatpush2.bf16.msra.mxu1 %v5946_v43 }
 0x19a   :  { %1297 = vmatprep.subr.bf16.mxu0 %v5947_v44  ;;  %1338 = vmatprep.subr.bf16.mxu1 %v5948_v45 }
 0x19d   :  { %1298 = vmatpush2.bf16.msra.mxu0 %v5949_v46  ;;  %1339 = vmatpush2.bf16.msra.mxu1 %v5950_v6 }
 0x19e   :  { %1299 = vmatprep.subr.bf16.mxu0 %v5951_v22  ;;  %1340 = vmatprep.subr.bf16.mxu1 %v5952_v7 }
 0x1a1   :  { %1300 = vmatpush2.bf16.msra.mxu0 %v5953_v4  ;;  %1341 = vmatpush2.bf16.msra.mxu1 %v5954_v2 }
 0x1a2   :  { %1301 = vmatprep.subr.bf16.mxu0 %v5955_v61  ;;  %1342 = vmatprep.subr.bf16.mxu1 %v5956_v38 }
 0x1a5   :  { %1302 = vmatpush2.bf16.msra.mxu0 %v5957_v63  ;;  %1343 = vmatpush2.bf16.msra.mxu1 %v5958_v0 }
 0x1a6   :  { %1303 = vmatprep.subr.bf16.mxu0 %v5959_v9  ;;  %1344 = vmatprep.subr.bf16.mxu1 %v5960_v56 }
 0x1a9   :  { %1304 = vmatpush2.bf16.msra.mxu0 %v5961_v8  ;;  %1345 = vmatpush2.bf16.msra.mxu1 %v5962_v57  ;;  %v5973_v57 = vld [vmem:[#allocation68_spill] sm:$0xff] }
 0x1aa   :  { %1305 = vmatprep.subr.bf16.mxu0 %v5963_v13  ;;  %1346 = vmatprep.subr.bf16.mxu1 %v5964_v58  ;;  %v5974_v13 = vld [vmem:[#allocation69_spill] sm:$0xff]  ;;  %v4360_v58 = vld [vmem:[#allocation5 + $0xe4] ss:$16 sps:$4 sm:$0xff]  }
 0x1ab   :  { %5975 = vst [vmem:[#allocation15_spill] sm:$0xff] %v4360_v58 }
 0x1ad   :  { %1306 = vmatpush2.bf16.msra.mxu0 %v5965_v5  ;;  %1347 = vmatpush2.bf16.msra.mxu1 %v5966_v10  ;;  %v4363_v10 = vld [vmem:[#allocation5 + $0xec] ss:$16 sps:$4 sm:$0xff]  }
 0x1ae   :  { %1307 = vmatprep.subr.bf16.mxu0 %v5967_v59  ;;  %1348 = vmatprep.subr.bf16.mxu1 %v5968_v31  ;;  %5976 = vst [vmem:[#allocation16_spill] sm:$0xff] %v4363_v10 }
 0x1b1   :  { %1308 = vmatpush2.bf16.msra.mxu0 %v5969_v12  ;;  %1349 = vmatpush2.bf16.msra.mxu1 %v5970_v60  ;;  %v448_v60 = vld [vmem:[%s5487_s5] sm:$0xf] }
 0x1b2   :  { %1309 = vmatprep.subr.bf16.mxu0 %v5971_v1  ;;  %1350 = vmatprep.subr.bf16.mxu1 %v5972_v3  ;;  %v5977_v12 = vld [vmem:[#allocation70_spill] sm:$0xff] }
 0x1b3   :  { %v5978_v1 = vsub.s32 0, %v5977_v12  ;;  %v5982_v61 = vsub.s32 3, %v5977_v12 }
 0x1b5   :  { %1310 = vmatpush2.bf16.msra.mxu0 %v5973_v57  ;;  %1351 = vmatpush2.bf16.msra.mxu1 %v5974_v13  ;;  %v4371_v31 = vrot.slane %v448_v60, %v5978_v1  ;;  %v5980_v57 = vsub.s32 1, %v5977_v12 }
 0x1b6   :  { %1385 = vmatprep.subr.bf16.mxu0 %v4360_v58  ;;  %1426 = vmatprep.subr.bf16.mxu1 %v4363_v10 }
 0x1b7   :  { %5979 = vst [vmem:[#allocation17_spill] sm:$0xff] %v4371_v31  ;;  %v4375_v3 = vrot.slane %v448_v60, %v5980_v57  ;;  %v4381_v57 = vrot.slane %v448_v60, %v5982_v61 }
 0x1b9   :  { %5981 = vst [vmem:[#allocation18_spill] sm:$0xff] %v4375_v3  ;;  %5983 = vst [vmem:[#allocation19_spill] sm:$0xff] %v4381_v57 }
 0x218   :  { %v1095_v13 = vpop.f32.mrf.mxu0  ;;  %v1136_v59 = vpop.f32.mrf.mxu1 }
 0x219   :  { %v1096_v58 = vadd.f32 %v1095_v13, %v4371_v31  ;;  %v5984_v13 = vsub.s32 2, %v5977_v12 }
 0x21a   :  { %v1097_v5 = vpop.f32.mrf.mxu0  ;;  %v1138_v8 = vpop.f32.mrf.mxu1 }
 0x21b   :  { %v2944_v56 = vmul.f32 -1.442695, %v1096_v58  ;;  %v1098_v10 = vadd.f32 %v1097_v5, %v4375_v3  ;;  %v1139_v2 = vadd.f32 %v1138_v8, %v4381_v57  ;;  %v4386_v31 = vrot.slane %v448_v60, %v5984_v13  ;;  %v5987_v57 = vld [vmem:[#allocation73_spill] sm:$0xff] }
 0x21c   :  { %v1099_v9 = vpop.f32.mrf.mxu0  ;;  %v1140_v0 = vpop.f32.mrf.mxu1 }
 0x21d   :  { %3223 = vpow2.f32 %v2944_v56  ;;  %v2945_v63 = vmul.f32 -1.442695, %v1098_v10  ;;  %5985 = vst [vmem:[#allocation20_spill] sm:$0xff] %v4386_v31  ;;  %v2946_v58 = vmul.f32 -1.442695, %v1139_v2  ;;  %v1137_v9 = vadd.f32 %v1136_v59, %v4386_v31  ;;  %v5986_v10 = vld [vmem:[#allocation71_spill] sm:$0xff] }
 0x21e   :  { %v1100_v38 = vpop.f32.mrf.mxu0  ;;  %v1141_v1 = vpop.f32.mrf.mxu1 }
 0x21f   :  { %3225 = vpow2.f32 %v2945_v63 }
 0x220   :  { %3227 = vpow2.f32 %v2946_v58 }
 0x22a   :  { %v3224_v4 = vpop.eup %3223 }
 0x22b   :  { %v1146_v0 = vadd.f32 1.0, %v3224_v4 }
 0x22c   :  { %v3226_v56 = vpop.eup %3225 }
 0x22d   :  { %3229 = vrcp.f32 %v1146_v0  ;;  %v1152_v38 = vadd.f32 1.0, %v3226_v56  ;;  %v3228_v5 = vpop.eup %3227 }
 0x22e   :  { %3231 = vtanh.f32 %v1137_v9  ;;  %v1159_v4 = vadd.f32 1.0, %v3228_v5 }
 0x22f   :  { %3233 = vrcp.f32 %v1152_v38 }
 0x238   :  { %v1201_v63 = vpop.f32.mrf.mxu0  ;;  %v1242_v61 = vpop.f32.mrf.mxu1 }
 0x239   :  { %v1249_v8 = vadd.f32 %v1201_v63, %v5986_v10  ;;  %v5988_v63 = vld [vmem:[#allocation74_spill] sm:$0xff] }
 0x23a   :  { %v3230_v1 = vpop.eup %3229  ;;  %v1203_v12 = vpop.f32.mrf.mxu0 }
 0x23b   :  { %v1244_v60 = vpop.f32.mrf.mxu1  ;;  %v3232_v13 = vpop.eup %3231  ;;  %v2947_v2 = vmul.f32 -1.442695, %v1249_v8  ;;  %v1250_v3 = vadd.f32 %v1203_v12, %v5987_v57  ;;  %v5989_v8 = vld [vmem:[#allocation72_spill] sm:$0xff] }
 0x23c   :  { %v3234_v59 = vpop.eup %3233  ;;  %v1205_v31 = vpop.f32.mrf.mxu0  ;;  %v1163_v56 = vmul.f32 %v3232_v13, %v3230_v1  ;;  %v1252_v10 = vadd.f32 %v1244_v60, %v5988_v63  ;;  %v1251_v57 = vadd.f32 %v1242_v61, %v5989_v8 }
 0x23d   :  { %v1246_v58 = vpop.f32.mrf.mxu1  ;;  %v1162_v0 = vmul.f32 0.0, %v3234_v59  ;;  %3235 = vpow2.f32 %v2947_v2  ;;  %v2948_v9 = vmul.f32 -1.442695, %v1250_v3 }
 0x23e   :  { %v1206_v38 = vpop.f32.mrf.mxu0  ;;  %v2949_v12 = vmul.f32 -1.442695, %v1252_v10 }
 0x23f   :  { %v1247_v7 = vpop.f32.mrf.mxu1  ;;  %v4391_v22 = vadd.f32 %v1163_v56, %v1162_v0  ;;  %3237 = vpow2.f32 %v2948_v9 }
 0x240   :  { %3239 = vrcp.f32 %v1159_v4 }
 0x241   :  { %3241 = vtanh.f32 %v4391_v22 }
 0x242   :  { %3243 = vtanh.f32 %v1251_v57 }
 0x243   :  { %3245 = vpow2.f32 %v2949_v12  ;;  %v4404_v12 = vld [vmem:[#allocation5 + $0xe0] ss:$16 sps:$4 sm:$0xff]  }
 0x24a   :  { %v3236_v5 = vpop.eup %3235 }
 0x24b   :  { %v1256_v31 = vadd.f32 1.0, %v3236_v5  ;;  %v4407_v5 = vld [vmem:[#allocation5 + $0xe8] ss:$16 sps:$4 sm:$0xff]  }
 0x24c   :  { %v3238_v59 = vpop.eup %3237 }
 0x24d   :  { %v3240_v1 = vpop.eup %3239  ;;  %3247 = vrcp.f32 %v1256_v31  ;;  %v1262_v3 = vadd.f32 1.0, %v3238_v59  ;;  %v4413_v31 = vld [vmem:[#allocation5 + $0xcc] ss:$16 sps:$4 sm:$0xff]   ;;  %v4418_v59 = vld [vmem:[#allocation5 + $0xc0] ss:$16 sps:$4 sm:$0xff]  }
 0x24e   :  { %v3242_v7 = vpop.eup %3241 }
 0x24f   :  { %3249 = vrcp.f32 %v1262_v3  ;;  %v1166_v13 = vmul.f32 %v3242_v7, %v3240_v1  ;;  %v3244_v4 = vpop.eup %3243  ;;  %v4421_v1 = vld [vmem:[#allocation5 + $0xc8] ss:$16 sps:$4 sm:$0xff]   ;;  %v4424_v3 = vld [vmem:[#allocation5 + $0xa4] ss:$16 sps:$4 sm:$0xff]   ;;  %v4427_v7 = vld [vmem:[#allocation5 + $0xac] ss:$16 sps:$4 sm:$0xff]  }
 0x250   :  { %v3246_v58 = vpop.eup %3245 }
 0x251   :  { %v1278_v2 = vpack.c.bf16 %v1166_v13, %v1166_v13  ;;  %v1269_v56 = vadd.f32 1.0, %v3246_v58  ;;  %v4430_v13 = vld [vmem:[#allocation5 + $0xa0] ss:$16 sps:$4 sm:$0xff]   ;;  %v4439_v58 = vld [vmem:[#allocation5 + $0x8c] ss:$16 sps:$4 sm:$0xff]  }
 0x253   :  { %1311 = vmatprep.mubr.bf16.mxu0 %v1278_v2  ;;  %1352 = vmatprep.mubr.bf16.mxu1 %v1278_v2  ;;  %3251 = vrcp.f32 %v1269_v56  ;;  %v4433_v2 = vld [vmem:[#allocation5 + $0xa8] ss:$16 sps:$4 sm:$0xff]   ;;  %v4451_v56 = vld [vmem:[#allocation5 + $0x6c] ss:$16 sps:$4 sm:$0xff]  }
 0x254   :  { %5991 = vst [vmem:[#allocation22_spill] sm:$0xff] %v4451_v56 }
 0x25a   :  { %v3248_v60 = vpop.eup %3247 }
 0x25b   :  { %v1273_v0 = vmul.f32 %v3248_v60, %v3244_v4  ;;  %v4436_v4 = vld [vmem:[#allocation5 + $0x84] ss:$16 sps:$4 sm:$0xff]   ;;  %v4442_v60 = vld [vmem:[#allocation5 + $0x80] ss:$16 sps:$4 sm:$0xff]  }
 0x25c   :  { %v3250_v61 = vpop.eup %3249 }
 0x25d   :  { %v1272_v9 = vmul.f32 %v3250_v61, %v4261_v62  ;;  %v4410_v62 = vld [vmem:[#allocation5 + $0xc4] ss:$16 sps:$4 sm:$0xff]  }
 0x25e   :  { %v4448_v61 = vld [vmem:[#allocation5 + $0x64] ss:$16 sps:$4 sm:$0xff]  }
 0x25f   :  { %v4397_v38 = vadd.f32 %v1273_v0, %v1272_v9  ;;  %v4445_v0 = vld [vmem:[#allocation5 + $0x88] ss:$16 sps:$4 sm:$0xff]   ;;  %5990 = vst [vmem:[#allocation21_spill] sm:$0xff] %v4448_v61  ;;  %v4454_v9 = vld [vmem:[#allocation5 + $0x60] ss:$16 sps:$4 sm:$0xff]  }
 0x260   :  { %v3252_v63 = vpop.eup %3251  ;;  %5992 = vst [vmem:[#allocation23_spill] sm:$0xff] %v4454_v9 }
 0x261   :  { %3253 = vtanh.f32 %v4397_v38 }
 0x26e   :  { %v3254_v10 = vpop.eup %3253 }
 0x26f   :  { %v1276_v8 = vmul.f32 %v3254_v10, %v3252_v63  ;;  %v4457_v63 = vld [vmem:[#allocation5 + $0x68] ss:$16 sps:$4 sm:$0xff]   ;;  %v4460_v10 = vld [vmem:[#allocation5 + $0x44] ss:$16 sps:$4 sm:$0xff]  }
 0x270   :  { %5993 = vst [vmem:[#allocation24_spill] sm:$0xff] %v4457_v63  ;;  %5994 = vst [vmem:[#allocation25_spill] sm:$0xff] %v4460_v10 }
 0x271   :  { %v4400_v57 = vpack.c.bf16 %v1276_v8, %v1276_v8  ;;  %v4463_v8 = vld [vmem:[#allocation5 + $0x4c] ss:$16 sps:$4 sm:$0xff]  }
 0x272   :  { %5995 = vst [vmem:[#allocation26_spill] sm:$0xff] %v4463_v8 }
 0x273   :  { %1312 = vmatmul.mubr.bf16.vlgmr.msra.gmra.mxu0 %v4400_v57  ;;  %1353 = vmatmul.mubr.bf16.vlgmr.msra.gmra.mxu1 %v4400_v57 }
 0x274   :  { %1386 = vmatpush1.bf16.msra.mxu0 %v4404_v12  ;;  %1427 = vmatpush1.bf16.msra.mxu1 %v4407_v5 }
 0x275   :  { %1387 = vmatprep.subr.bf16.mxu0 %v4410_v62  ;;  %1428 = vmatprep.subr.bf16.mxu1 %v4413_v31 }
 0x276   :  { %1417 = vmatprep.mubr.bf16.mxu0 %v5919_v11  ;;  %1458 = vmatprep.mubr.bf16.mxu1 %v5919_v11 }
 0x278   :  { %1388 = vmatpush1.bf16.msra.mxu0 %v4418_v59  ;;  %1429 = vmatpush1.bf16.msra.mxu1 %v4421_v1 }
 0x279   :  { %1389 = vmatprep.subr.bf16.mxu0 %v4424_v3  ;;  %1430 = vmatprep.subr.bf16.mxu1 %v4427_v7 }
 0x27c   :  { %1390 = vmatpush1.bf16.msra.mxu0 %v4430_v13  ;;  %1431 = vmatpush1.bf16.msra.mxu1 %v4433_v2 }
 0x27d   :  { %1391 = vmatprep.subr.bf16.mxu0 %v4436_v4  ;;  %1432 = vmatprep.subr.bf16.mxu1 %v4439_v58 }
 0x280   :  { %1392 = vmatpush1.bf16.msra.mxu0 %v4442_v60  ;;  %1433 = vmatpush1.bf16.msra.mxu1 %v4445_v0 }
 0x281   :  { %1393 = vmatprep.subr.bf16.mxu0 %v4448_v61  ;;  %1434 = vmatprep.subr.bf16.mxu1 %v4451_v56  ;;  %v4466_v61 = vld [vmem:[#allocation5 + $0x40] ss:$16 sps:$4 sm:$0xff]   ;;  %v4469_v56 = vld [vmem:[#allocation5 + $0x48] ss:$16 sps:$4 sm:$0xff]  }
 0x282   :  { %5996 = vst [vmem:[#allocation27_spill] sm:$0xff] %v4466_v61  ;;  %5997 = vst [vmem:[#allocation28_spill] sm:$0xff] %v4469_v56 }
 0x284   :  { %1394 = vmatpush1.bf16.msra.mxu0 %v4454_v9  ;;  %1435 = vmatpush1.bf16.msra.mxu1 %v4457_v63  ;;  %v4472_v9 = vld [vmem:[#allocation5 + $0x24] ss:$16 sps:$4 sm:$0xff]   ;;  %v4475_v63 = vld [vmem:[#allocation5 + $0x2c] ss:$16 sps:$4 sm:$0xff]  }
 0x285   :  { %1395 = vmatprep.subr.bf16.mxu0 %v4460_v10  ;;  %1436 = vmatprep.subr.bf16.mxu1 %v4463_v8  ;;  %5998 = vst [vmem:[#allocation29_spill] sm:$0xff] %v4472_v9  ;;  %5999 = vst [vmem:[#allocation30_spill] sm:$0xff] %v4475_v63  ;;  %v4478_v10 = vld [vmem:[#allocation5 + $0x20] ss:$16 sps:$4 sm:$0xff]   ;;  %v4481_v8 = vld [vmem:[#allocation5 + $0x28] ss:$16 sps:$4 sm:$0xff]  }
 0x288   :  { %1396 = vmatpush1.bf16.msra.mxu0 %v4466_v61  ;;  %1437 = vmatpush1.bf16.msra.mxu1 %v4469_v56  ;;  %v4484_v61 = vld [vmem:[#allocation5 + $0x4] ss:$16 sps:$4 sm:$0xff]   ;;  %v4487_v56 = vld [vmem:[#allocation5 + $0xc] ss:$16 sps:$4 sm:$0xff]  }
 0x289   :  { %1397 = vmatprep.subr.bf16.mxu0 %v4472_v9  ;;  %1438 = vmatprep.subr.bf16.mxu1 %v4475_v63  ;;  %v4490_v9 = vld [vmem:[#allocation5] ss:$16 sps:$4 sm:$0xff]   ;;  %v4493_v63 = vld [vmem:[#allocation5 + $0x8] ss:$16 sps:$4 sm:$0xff]  }
 0x28c   :  { %1398 = vmatpush1.bf16.msra.mxu0 %v4478_v10  ;;  %1439 = vmatpush1.bf16.msra.mxu1 %v4481_v8 }
 0x28d   :  { %1399 = vmatprep.subr.bf16.mxu0 %v4484_v61  ;;  %1440 = vmatprep.subr.bf16.mxu1 %v4487_v56 }
 0x290   :  { %1400 = vmatpush1.bf16.msra.mxu0 %v4490_v9  ;;  %1441 = vmatpush1.bf16.msra.mxu1 %v4493_v63 }
 0x291   :  { %1497 = vmatprep.subr.bf16.mxu0 %v3962_v47  ;;  %1538 = vmatprep.subr.bf16.mxu1 %v3964_v48  ;;  %v6000_v47 = vld [vmem:[#allocation46_spill] sm:$0xff]  ;;  %v6001_v48 = vld [vmem:[#allocation47_spill] sm:$0xff] }
 0x293   :  { %1418 = vmatmul.mubr.bf16.vlgmr.msra.gmra.mxu0 %v4400_v57  ;;  %1459 = vmatmul.mubr.bf16.vlgmr.msra.gmra.mxu1 %v4400_v57  ;;  %v6028_v57 = vld [vmem:[#allocation19_spill] sm:$0xff] }
 0x294   :  { %1498 = vmatpush1.bf16.msra.mxu0 %v3966_v49  ;;  %1539 = vmatpush1.bf16.msra.mxu1 %v3968_v50  ;;  %v6002_v49 = vld [vmem:[#allocation48_spill] sm:$0xff]  ;;  %v6003_v50 = vld [vmem:[#allocation49_spill] sm:$0xff] }
 0x295   :  { %1499 = vmatprep.subr.bf16.mxu0 %v3974_v51  ;;  %1540 = vmatprep.subr.bf16.mxu1 %v3976_v52  ;;  %v6004_v51 = vld [vmem:[#allocation50_spill] sm:$0xff]  ;;  %v6005_v52 = vld [vmem:[#allocation51_spill] sm:$0xff] }
 0x298   :  { %1500 = vmatpush1.bf16.msra.mxu0 %v3978_v53  ;;  %1541 = vmatpush1.bf16.msra.mxu1 %v3980_v54  ;;  %v6006_v53 = vld [vmem:[#allocation52_spill] sm:$0xff]  ;;  %v6007_v54 = vld [vmem:[#allocation53_spill] sm:$0xff] }
 0x299   :  { %1501 = vmatprep.subr.bf16.mxu0 %v3986_v55  ;;  %1542 = vmatprep.subr.bf16.mxu1 %v5920_v14  ;;  %v6008_v55 = vld [vmem:[#allocation54_spill] sm:$0xff]  ;;  %v6009_v14 = vld [vmem:[#allocation55_spill] sm:$0xff] }
 0x29c   :  { %1502 = vmatpush1.bf16.msra.mxu0 %v5921_v15  ;;  %1543 = vmatpush1.bf16.msra.mxu1 %v5922_v16  ;;  %v6010_v15 = vld [vmem:[#allocation56_spill] sm:$0xff]  ;;  %v6011_v16 = vld [vmem:[#allocation57_spill] sm:$0xff] }
 0x29d   :  { %1503 = vmatprep.subr.bf16.mxu0 %v5923_v17  ;;  %1544 = vmatprep.subr.bf16.mxu1 %v5924_v18  ;;  %v6012_v17 = vld [vmem:[#allocation58_spill] sm:$0xff]  ;;  %v6013_v18 = vld [vmem:[#allocation59_spill] sm:$0xff] }
 0x2a0   :  { %1504 = vmatpush1.bf16.msra.mxu0 %v5925_v19  ;;  %1545 = vmatpush1.bf16.msra.mxu1 %v5926_v20  ;;  %v6014_v19 = vld [vmem:[#allocation60_spill] sm:$0xff]  ;;  %v6015_v20 = vld [vmem:[#allocation61_spill] sm:$0xff] }
 0x2a1   :  { %1505 = vmatprep.subr.bf16.mxu0 %v5927_v21  ;;  %1546 = vmatprep.subr.bf16.mxu1 %v5928_v23  ;;  %v6016_v21 = vld [vmem:[#allocation62_spill] sm:$0xff]  ;;  %v6017_v23 = vld [vmem:[#allocation63_spill] sm:$0xff] }
 0x2a4   :  { %1506 = vmatpush1.bf16.msra.mxu0 %v5929_v24  ;;  %1547 = vmatpush1.bf16.msra.mxu1 %v5930_v25  ;;  %v6018_v24 = vld [vmem:[#allocation64_spill] sm:$0xff]  ;;  %v6019_v25 = vld [vmem:[#allocation65_spill] sm:$0xff] }
 0x2a5   :  { %1507 = vmatprep.subr.bf16.mxu0 %v5931_v26  ;;  %1548 = vmatprep.subr.bf16.mxu1 %v5932_v27  ;;  %v6020_v26 = vld [vmem:[#allocation66_spill] sm:$0xff]  ;;  %v6021_v27 = vld [vmem:[#allocation67_spill] sm:$0xff] }
 0x2a8   :  { %1508 = vmatpush1.bf16.msra.mxu0 %v5933_v28  ;;  %1549 = vmatpush1.bf16.msra.mxu1 %v5934_v29  ;;  %v6022_v28 = vld [vmem:[#allocation68_spill] sm:$0xff]  ;;  %v6023_v29 = vld [vmem:[#allocation69_spill] sm:$0xff] }
 0x2a9   :  { %1509 = vmatprep.subr.bf16.mxu0 %v5935_v30  ;;  %1550 = vmatprep.subr.bf16.mxu1 %v5936_v32  ;;  %v6024_v30 = vld [vmem:[#allocation15_spill] sm:$0xff]  ;;  %v6025_v32 = vld [vmem:[#allocation16_spill] sm:$0xff] }
 0x2ac   :  { %1510 = vmatpush1.bf16.msra.mxu0 %v5937_v33  ;;  %1551 = vmatpush1.bf16.msra.mxu1 %v5938_v34 }
 0x2ad   :  { %1511 = vmatprep.subr.bf16.mxu0 %v5939_v35  ;;  %1552 = vmatprep.subr.bf16.mxu1 %v5940_v36  ;;  %v6026_v35 = vld [vmem:[#allocation17_spill] sm:$0xff] }
 0x2b0   :  { %1512 = vmatpush1.bf16.msra.mxu0 %v5941_v37  ;;  %1553 = vmatpush1.bf16.msra.mxu1 %v5942_v39 }
 0x2b1   :  { %1513 = vmatprep.subr.bf16.mxu0 %v5943_v40  ;;  %1554 = vmatprep.subr.bf16.mxu1 %v5944_v41  ;;  %v6027_v41 = vld [vmem:[#allocation18_spill] sm:$0xff] }
 0x2b4   :  { %1514 = vmatpush2.bf16.msra.mxu0 %v5945_v42  ;;  %1555 = vmatpush2.bf16.msra.mxu1 %v5946_v43 }
 0x2b5   :  { %1515 = vmatprep.subr.bf16.mxu0 %v5947_v44  ;;  %1556 = vmatprep.subr.bf16.mxu1 %v5948_v45 }
 0x2b8   :  { %1516 = vmatpush2.bf16.msra.mxu0 %v5949_v46  ;;  %1557 = vmatpush2.bf16.msra.mxu1 %v5950_v6 }
 0x2b9   :  { %1517 = vmatprep.subr.bf16.mxu0 %v6000_v47  ;;  %1558 = vmatprep.subr.bf16.mxu1 %v6001_v48 }
 0x2bc   :  { %1518 = vmatpush2.bf16.msra.mxu0 %v6002_v49  ;;  %1559 = vmatpush2.bf16.msra.mxu1 %v6003_v50  ;;  %v6029_v50 = vld [vmem:[#allocation20_spill] sm:$0xff] }
 0x2bd   :  { %1519 = vmatprep.subr.bf16.mxu0 %v6004_v51  ;;  %1560 = vmatprep.subr.bf16.mxu1 %v6005_v52 }
 0x2c0   :  { %1520 = vmatpush2.bf16.msra.mxu0 %v6006_v53  ;;  %1561 = vmatpush2.bf16.msra.mxu1 %v6007_v54 }
 0x2c1   :  { %1521 = vmatprep.subr.bf16.mxu0 %v6008_v55  ;;  %1562 = vmatprep.subr.bf16.mxu1 %v6009_v14 }
 0x2c4   :  { %1522 = vmatpush2.bf16.msra.mxu0 %v6010_v15  ;;  %1563 = vmatpush2.bf16.msra.mxu1 %v6011_v16  ;;  %v6030_v16 = vld [vmem:[#allocation75_spill] sm:$0xff] }
 0x2c5   :  { %1523 = vmatprep.subr.bf16.mxu0 %v6012_v17  ;;  %1564 = vmatprep.subr.bf16.mxu1 %v6013_v18 }
 0x2c8   :  { %1524 = vmatpush2.bf16.msra.mxu0 %v6014_v19  ;;  %1565 = vmatpush2.bf16.msra.mxu1 %v6015_v20 }
 0x2c9   :  { %1525 = vmatprep.subr.bf16.mxu0 %v6016_v21  ;;  %1566 = vmatprep.subr.bf16.mxu1 %v6017_v23 }
 0x2cc   :  { %1526 = vmatpush2.bf16.msra.mxu0 %v6018_v24  ;;  %1567 = vmatpush2.bf16.msra.mxu1 %v6019_v25  ;;  %v6031_v24 = vld [vmem:[#allocation77_spill] sm:$0xff] }
 0x2cd   :  { %1527 = vmatprep.subr.bf16.mxu0 %v6020_v26  ;;  %1568 = vmatprep.subr.bf16.mxu1 %v6021_v27 }
 0x2d0   :  { %1528 = vmatpush2.bf16.msra.mxu0 %v6022_v28  ;;  %1569 = vmatpush2.bf16.msra.mxu1 %v6023_v29 }
 0x2d1   :  { %1603 = vmatprep.subr.bf16.mxu0 %v6024_v30  ;;  %1644 = vmatprep.subr.bf16.mxu1 %v6025_v32 }
 0x333   :  { %v1313_v33 = vpop.f32.mrf.mxu0  ;;  %v1354_v34 = vpop.f32.mrf.mxu1 }
 0x334   :  { %v1314_v36 = vadd.f32 %v1313_v33, %v6026_v35  ;;  %v1355_v51 = vadd.f32 %v1354_v34, %v6029_v50 }
 0x335   :  { %v1315_v37 = vpop.f32.mrf.mxu0  ;;  %v1356_v39 = vpop.f32.mrf.mxu1 }
 0x336   :  { %v2950_v40 = vmul.f32 -1.442695, %v1314_v36  ;;  %v1316_v42 = vadd.f32 %v1315_v37, %v6027_v41  ;;  %v1357_v47 = vadd.f32 %v1356_v39, %v6028_v57 }
 0x337   :  { %v1317_v43 = vpop.f32.mrf.mxu0  ;;  %v1358_v44 = vpop.f32.mrf.mxu1 }
 0x338   :  { %3255 = vpow2.f32 %v2950_v40  ;;  %v2951_v45 = vmul.f32 -1.442695, %v1316_v42  ;;  %v2952_v48 = vmul.f32 -1.442695, %v1357_v47  ;;  %v6032_v42 = vld [vmem:[#allocation78_spill] sm:$0xff]  ;;  %v6033_v44 = vld [vmem:[#allocation76_spill] sm:$0xff] }
 0x339   :  { %v1318_v46 = vpop.f32.mrf.mxu0  ;;  %v1359_v6 = vpop.f32.mrf.mxu1 }
 0x33a   :  { %3257 = vpow2.f32 %v2951_v45 }
 0x33b   :  { %3259 = vpow2.f32 %v2952_v48 }
 0x345   :  { %v3256_v49 = vpop.eup %3255 }
 0x346   :  { %v1364_v52 = vadd.f32 1.0, %v3256_v49 }
 0x347   :  { %v3258_v53 = vpop.eup %3257 }
 0x348   :  { %3261 = vrcp.f32 %v1364_v52  ;;  %v1370_v54 = vadd.f32 1.0, %v3258_v53  ;;  %v3260_v15 = vpop.eup %3259 }
 0x349   :  { %3263 = vtanh.f32 %v1355_v51  ;;  %v1377_v27 = vadd.f32 1.0, %v3260_v15 }
 0x34a   :  { %3265 = vrcp.f32 %v1370_v54 }
 0x353   :  { %v1419_v55 = vpop.f32.mrf.mxu0  ;;  %v1460_v14 = vpop.f32.mrf.mxu1 }
 0x354   :  { %v1467_v17 = vadd.f32 %v1419_v55, %v6030_v16  ;;  %v1469_v45 = vadd.f32 %v1460_v14, %v6033_v44  ;;  %v4621_v44 = vld [vmem:[#allocation7 + $0xe8] ss:$16 sps:$4 sm:$0xff]  }
 0x355   :  { %v3262_v18 = vpop.eup %3261  ;;  %v1421_v19 = vpop.f32.mrf.mxu0 }
 0x356   :  { %v1462_v20 = vpop.f32.mrf.mxu1  ;;  %v3264_v21 = vpop.eup %3263  ;;  %v2953_v23 = vmul.f32 -1.442695, %v1467_v17  ;;  %v1468_v25 = vadd.f32 %v1421_v19, %v6031_v24 }
 0x357   :  { %v3266_v26 = vpop.eup %3265  ;;  %v1423_v28 = vpop.f32.mrf.mxu0  ;;  %v1381_v33 = vmul.f32 %v3264_v21, %v3262_v18  ;;  %v1470_v43 = vadd.f32 %v1462_v20, %v6032_v42  ;;  %v4615_v42 = vld [vmem:[#allocation7 + $0xec] ss:$16 sps:$4 sm:$0xff]  }
 0x358   :  { %v1464_v29 = vpop.f32.mrf.mxu1  ;;  %v1380_v34 = vmul.f32 %v3266_v26, %v4391_v22  ;;  %3267 = vpow2.f32 %v2953_v23  ;;  %v2954_v36 = vmul.f32 -1.442695, %v1468_v25  ;;  %v6035_v25 = vld [vmem:[#allocation22_spill] sm:$0xff]  ;;  %v6036_v26 = vld [vmem:[#allocation23_spill] sm:$0xff]  ;;  %v6038_v28 = vld [vmem:[#allocation25_spill] sm:$0xff] }
 0x359   :  { %v1424_v37 = vpop.f32.mrf.mxu0  ;;  %v2955_v46 = vmul.f32 -1.442695, %v1470_v43  ;;  %v6039_v29 = vld [vmem:[#allocation26_spill] sm:$0xff] }
 0x35a   :  { %v1465_v39 = vpop.f32.mrf.mxu1  ;;  %3269 = vpow2.f32 %v2954_v36  ;;  %v4571_v40 = vadd.f32 %v1381_v33, %v1380_v34  ;;  %v6040_v33 = vld [vmem:[#allocation27_spill] sm:$0xff]  ;;  %v6041_v34 = vld [vmem:[#allocation28_spill] sm:$0xff]  ;;  %v6042_v36 = vld [vmem:[#allocation29_spill] sm:$0xff] }
 0x35b   :  { %3271 = vrcp.f32 %v1377_v27  ;;  %v6037_v27 = vld [vmem:[#allocation24_spill] sm:$0xff]  ;;  %v6043_v37 = vld [vmem:[#allocation30_spill] sm:$0xff] }
 0x35c   :  { %3273 = vtanh.f32 %v4571_v40  ;;  %v4612_v39 = vld [vmem:[#allocation7 + $0xe4] ss:$16 sps:$4 sm:$0xff]   ;;  %v4618_v43 = vld [vmem:[#allocation7 + $0xe0] ss:$16 sps:$4 sm:$0xff]  }
 0x35d   :  { %3275 = vtanh.f32 %v1469_v45  ;;  %v4624_v45 = vld [vmem:[#allocation7 + $0xc4] ss:$16 sps:$4 sm:$0xff]  }
 0x35e   :  { %3277 = vpow2.f32 %v2955_v46  ;;  %v4627_v46 = vld [vmem:[#allocation7 + $0xcc] ss:$16 sps:$4 sm:$0xff]  }
 0x365   :  { %v3268_v6 = vpop.eup %3267 }
 0x366   :  { %v1474_v47 = vadd.f32 1.0, %v3268_v6  ;;  %v4630_v6 = vld [vmem:[#allocation7 + $0xc0] ss:$16 sps:$4 sm:$0xff]  }
 0x367   :  { %v3270_v48 = vpop.eup %3269 }
 0x368   :  { %v3272_v22 = vpop.eup %3271  ;;  %3279 = vrcp.f32 %v1474_v47  ;;  %v1480_v49 = vadd.f32 1.0, %v3270_v48  ;;  %v4633_v47 = vld [vmem:[#allocation7 + $0xc8] ss:$16 sps:$4 sm:$0xff]   ;;  %v4636_v48 = vld [vmem:[#allocation7 + $0xa4] ss:$16 sps:$4 sm:$0xff]  }
 0x369   :  { %v3274_v51 = vpop.eup %3273 }
 0x36a   :  { %3281 = vrcp.f32 %v1480_v49  ;;  %v1384_v52 = vmul.f32 %v3274_v51, %v3272_v22  ;;  %v3276_v54 = vpop.eup %3275  ;;  %v4639_v22 = vld [vmem:[#allocation7 + $0xac] ss:$16 sps:$4 sm:$0xff]   ;;  %v4642_v49 = vld [vmem:[#allocation7 + $0xa0] ss:$16 sps:$4 sm:$0xff]   ;;  %v4645_v51 = vld [vmem:[#allocation7 + $0xa8] ss:$16 sps:$4 sm:$0xff]  }
 0x36b   :  { %v3278_v55 = vpop.eup %3277  ;;  %6044 = vst [vmem:[#allocation31_spill] sm:$0xff] %v4642_v49  ;;  %6045 = vst [vmem:[#allocation32_spill] sm:$0xff] %v4645_v51 }
 0x36c   :  { %v1496_v53 = vpack.c.bf16 %v1384_v52, %v1384_v52  ;;  %v1487_v17 = vadd.f32 1.0, %v3278_v55  ;;  %v4648_v52 = vld [vmem:[#allocation7 + $0x84] ss:$16 sps:$4 sm:$0xff]   ;;  %v4657_v55 = vld [vmem:[#allocation7 + $0x88] ss:$16 sps:$4 sm:$0xff]  }
 0x36d   :  { %6046 = vst [vmem:[#allocation33_spill] sm:$0xff] %v4648_v52  ;;  %6049 = vst [vmem:[#allocation36_spill] sm:$0xff] %v4657_v55 }
 0x36e   :  { %1529 = vmatprep.mubr.bf16.mxu0 %v1496_v53  ;;  %1570 = vmatprep.mubr.bf16.mxu1 %v1496_v53  ;;  %3283 = vrcp.f32 %v1487_v17  ;;  %v4651_v53 = vld [vmem:[#allocation7 + $0x8c] ss:$16 sps:$4 sm:$0xff]   ;;  %v4669_v17 = vld [vmem:[#allocation7 + $0x68] ss:$16 sps:$4 sm:$0xff]  }
 0x36f   :  { %6047 = vst [vmem:[#allocation34_spill] sm:$0xff] %v4651_v53  ;;  %6053 = vst [vmem:[#allocation40_spill] sm:$0xff] %v4669_v17 }
 0x375   :  { %v3280_v15 = vpop.eup %3279 }
 0x376   :  { %v1491_v16 = vmul.f32 %v3280_v15, %v3276_v54  ;;  %v4654_v54 = vld [vmem:[#allocation7 + $0x80] ss:$16 sps:$4 sm:$0xff]   ;;  %v4660_v15 = vld [vmem:[#allocation7 + $0x64] ss:$16 sps:$4 sm:$0xff]  }
 0x377   :  { %v3282_v14 = vpop.eup %3281  ;;  %6048 = vst [vmem:[#allocation35_spill] sm:$0xff] %v4654_v54  ;;  %6050 = vst [vmem:[#allocation37_spill] sm:$0xff] %v4660_v15 }
 0x378   :  { %v1490_v18 = vmul.f32 %v3282_v14, %v4397_v38  ;;  %v6034_v38 = vld [vmem:[#allocation21_spill] sm:$0xff]  ;;  %v4666_v14 = vld [vmem:[#allocation7 + $0x60] ss:$16 sps:$4 sm:$0xff]  }
 0x379   :  { %6052 = vst [vmem:[#allocation39_spill] sm:$0xff] %v4666_v14 }
 0x37a   :  { %v4577_v19 = vadd.f32 %v1491_v16, %v1490_v18  ;;  %v4663_v16 = vld [vmem:[#allocation7 + $0x6c] ss:$16 sps:$4 sm:$0xff]   ;;  %v4672_v18 = vld [vmem:[#allocation7 + $0x44] ss:$16 sps:$4 sm:$0xff]  }
 0x37b   :  { %v3284_v20 = vpop.eup %3283  ;;  %6051 = vst [vmem:[#allocation38_spill] sm:$0xff] %v4663_v16  ;;  %6054 = vst [vmem:[#allocation41_spill] sm:$0xff] %v4672_v18 }
 0x37c   :  { %3285 = vtanh.f32 %v4577_v19 }
 0x389   :  { %v3286_v21 = vpop.eup %3285 }
 0x38a   :  { %v1494_v23 = vmul.f32 %v3286_v21, %v3284_v20  ;;  %v4675_v20 = vld [vmem:[#allocation7 + $0x4c] ss:$16 sps:$4 sm:$0xff]   ;;  %v4678_v21 = vld [vmem:[#allocation7 + $0x40] ss:$16 sps:$4 sm:$0xff]  }
 0x38b   :  { %6055 = vst [vmem:[#allocation42_spill] sm:$0xff] %v4675_v20  ;;  %6056 = vst [vmem:[#allocation43_spill] sm:$0xff] %v4678_v21 }
 0x38c   :  { %v1495_v24 = vpack.c.bf16 %v1494_v23, %v1494_v23  ;;  %v4681_v23 = vld [vmem:[#allocation7 + $0x48] ss:$16 sps:$4 sm:$0xff]  }
 0x38d   :  { %6057 = vst [vmem:[#allocation44_spill] sm:$0xff] %v4681_v23 }
 0x38e   :  { %1530 = vmatmul.mubr.bf16.vlgmr.msra.gmra.mxu0 %v1495_v24  ;;  %1571 = vmatmul.mubr.bf16.vlgmr.msra.gmra.mxu1 %v1495_v24 }
 0x38f   :  { %1604 = vmatpush1.bf16.msra.mxu0 %v4404_v12  ;;  %1645 = vmatpush1.bf16.msra.mxu1 %v4407_v5 }
 0x390   :  { %1605 = vmatprep.subr.bf16.mxu0 %v4410_v62  ;;  %1646 = vmatprep.subr.bf16.mxu1 %v4413_v31 }
 0x391   :  { %1635 = vmatprep.mubr.bf16.mxu0 %v5919_v11  ;;  %1676 = vmatprep.mubr.bf16.mxu1 %v5919_v11 }
 0x393   :  { %1606 = vmatpush1.bf16.msra.mxu0 %v4418_v59  ;;  %1647 = vmatpush1.bf16.msra.mxu1 %v4421_v1 }
 0x394   :  { %1607 = vmatprep.subr.bf16.mxu0 %v4424_v3  ;;  %1648 = vmatprep.subr.bf16.mxu1 %v4427_v7 }
 0x397   :  { %1608 = vmatpush1.bf16.msra.mxu0 %v4430_v13  ;;  %1649 = vmatpush1.bf16.msra.mxu1 %v4433_v2 }
 0x398   :  { %1609 = vmatprep.subr.bf16.mxu0 %v4436_v4  ;;  %1650 = vmatprep.subr.bf16.mxu1 %v4439_v58 }
 0x39b   :  { %1610 = vmatpush1.bf16.msra.mxu0 %v4442_v60  ;;  %1651 = vmatpush1.bf16.msra.mxu1 %v4445_v0 }
 0x39c   :  { %1611 = vmatprep.subr.bf16.mxu0 %v6034_v38  ;;  %1652 = vmatprep.subr.bf16.mxu1 %v6035_v25 }
 0x39f   :  { %1612 = vmatpush1.bf16.msra.mxu0 %v6036_v26  ;;  %1653 = vmatpush1.bf16.msra.mxu1 %v6037_v27 }
 0x3a0   :  { %1613 = vmatprep.subr.bf16.mxu0 %v6038_v28  ;;  %1654 = vmatprep.subr.bf16.mxu1 %v6039_v29 }
 0x3a3   :  { %1614 = vmatpush1.bf16.msra.mxu0 %v6040_v33  ;;  %1655 = vmatpush1.bf16.msra.mxu1 %v6041_v34 }
 0x3a4   :  { %1615 = vmatprep.subr.bf16.mxu0 %v6042_v36  ;;  %1656 = vmatprep.subr.bf16.mxu1 %v6043_v37 }
 0x3a7   :  { %1616 = vmatpush1.bf16.msra.mxu0 %v4478_v10  ;;  %1657 = vmatpush1.bf16.msra.mxu1 %v4481_v8 }
 0x3a8   :  { %1617 = vmatprep.subr.bf16.mxu0 %v4484_v61  ;;  %1658 = vmatprep.subr.bf16.mxu1 %v4487_v56 }
 0x3ab   :  { %1618 = vmatpush1.bf16.msra.mxu0 %v4490_v9  ;;  %1659 = vmatpush1.bf16.msra.mxu1 %v4493_v63 }
 0x3ac   :  { %1715 = vmatprep.subr.bf16.mxu0 %v4612_v39  ;;  %1756 = vmatprep.subr.bf16.mxu1 %v4615_v42 }
 0x3ae   :  { %1636 = vmatmul.mubr.bf16.vlgmr.msra.gmra.mxu0 %v1495_v24  ;;  %1677 = vmatmul.mubr.bf16.vlgmr.msra.gmra.mxu1 %v1495_v24  ;;  %v4684_v24 = vld [vmem:[#allocation7 + $0x24] ss:$16 sps:$4 sm:$0xff]  }
 0x3af   :  { %1716 = vmatpush1.bf16.msra.mxu0 %v4618_v43  ;;  %1757 = vmatpush1.bf16.msra.mxu1 %v4621_v44  ;;  %6058 = vst [vmem:[#allocation45_spill] sm:$0xff] %v4684_v24 }
 0x3b0   :  { %1717 = vmatprep.subr.bf16.mxu0 %v4624_v45  ;;  %1758 = vmatprep.subr.bf16.mxu1 %v4627_v46 }
 0x3b3   :  { %1718 = vmatpush1.bf16.msra.mxu0 %v4630_v6  ;;  %1759 = vmatpush1.bf16.msra.mxu1 %v4633_v47 }
 0x3b4   :  { %1719 = vmatprep.subr.bf16.mxu0 %v4636_v48  ;;  %1760 = vmatprep.subr.bf16.mxu1 %v4639_v22 }
 0x3b7   :  { %1720 = vmatpush1.bf16.msra.mxu0 %v4642_v49  ;;  %1761 = vmatpush1.bf16.msra.mxu1 %v4645_v51 }
 0x3b8   :  { %1721 = vmatprep.subr.bf16.mxu0 %v4648_v52  ;;  %1762 = vmatprep.subr.bf16.mxu1 %v4651_v53 }
 0x3bb   :  { %1722 = vmatpush1.bf16.msra.mxu0 %v4654_v54  ;;  %1763 = vmatpush1.bf16.msra.mxu1 %v4657_v55 }
 0x3bc   :  { %1723 = vmatprep.subr.bf16.mxu0 %v4660_v15  ;;  %1764 = vmatprep.subr.bf16.mxu1 %v4663_v16 }
 0x3bf   :  { %1724 = vmatpush1.bf16.msra.mxu0 %v4666_v14  ;;  %1765 = vmatpush1.bf16.msra.mxu1 %v4669_v17  ;;  %v4687_v17 = vld [vmem:[#allocation7 + $0x2c] ss:$16 sps:$4 sm:$0xff]  }
 0x3c0   :  { %1725 = vmatprep.subr.bf16.mxu0 %v4672_v18  ;;  %1766 = vmatprep.subr.bf16.mxu1 %v4675_v20  ;;  %6059 = vst [vmem:[#allocation70_spill] sm:$0xff] %v4687_v17  ;;  %v4690_v18 = vld [vmem:[#allocation7 + $0x20] ss:$16 sps:$4 sm:$0xff]   ;;  %v4693_v20 = vld [vmem:[#allocation7 + $0x28] ss:$16 sps:$4 sm:$0xff]  }
 0x3c1   :  { %6060 = vst [vmem:[#allocation71_spill] sm:$0xff] %v4690_v18  ;;  %6061 = vst [vmem:[#allocation73_spill] sm:$0xff] %v4693_v20 }
 0x3c3   :  { %1726 = vmatpush1.bf16.msra.mxu0 %v4678_v21  ;;  %1767 = vmatpush1.bf16.msra.mxu1 %v4681_v23  ;;  %v4696_v21 = vld [vmem:[#allocation7 + $0x4] ss:$16 sps:$4 sm:$0xff]   ;;  %v4699_v23 = vld [vmem:[#allocation7 + $0xc] ss:$16 sps:$4 sm:$0xff]  }
 0x3c4   :  { %1727 = vmatprep.subr.bf16.mxu0 %v4684_v24  ;;  %1768 = vmatprep.subr.bf16.mxu1 %v4687_v17  ;;  %6062 = vst [vmem:[#allocation74_spill] sm:$0xff] %v4696_v21  ;;  %6063 = vst [vmem:[#allocation72_spill] sm:$0xff] %v4699_v23  ;;  %v4702_v24 = vld [vmem:[#allocation7] ss:$16 sps:$4 sm:$0xff]   ;;  %v4705_v17 = vld [vmem:[#allocation7 + $0x8] ss:$16 sps:$4 sm:$0xff]  }
 0x3c5   :  { %6064 = vst [vmem:[#allocation46_spill] sm:$0xff] %v4702_v24  ;;  %6065 = vst [vmem:[#allocation47_spill] sm:$0xff] %v4705_v17 }
 0x3c7   :  { %1728 = vmatpush1.bf16.msra.mxu0 %v4690_v18  ;;  %1769 = vmatpush1.bf16.msra.mxu1 %v4693_v20  ;;  %v4708_v18 = vld [vmem:[#allocation7 + $0x1e4] ss:$16 sps:$4 sm:$0xff]   ;;  %v4711_v20 = vld [vmem:[#allocation7 + $0x1ec] ss:$16 sps:$4 sm:$0xff]  }
 0x3c8   :  { %1729 = vmatprep.subr.bf16.mxu0 %v4696_v21  ;;  %1770 = vmatprep.subr.bf16.mxu1 %v4699_v23  ;;  %6066 = vst [vmem:[#allocation48_spill] sm:$0xff] %v4708_v18  ;;  %6067 = vst [vmem:[#allocation49_spill] sm:$0xff] %v4711_v20  ;;  %v4714_v21 = vld [vmem:[#allocation7 + $0x1e0] ss:$16 sps:$4 sm:$0xff]   ;;  %v4717_v23 = vld [vmem:[#allocation7 + $0x1e8] ss:$16 sps:$4 sm:$0xff]  }
 0x3c9   :  { %6068 = vst [vmem:[#allocation50_spill] sm:$0xff] %v4714_v21  ;;  %6069 = vst [vmem:[#allocation51_spill] sm:$0xff] %v4717_v23 }
 0x3cb   :  { %1730 = vmatpush1.bf16.msra.mxu0 %v4702_v24  ;;  %1771 = vmatpush1.bf16.msra.mxu1 %v4705_v17  ;;  %v4720_v24 = vld [vmem:[#allocation7 + $0x1c4] ss:$16 sps:$4 sm:$0xff]   ;;  %v4723_v17 = vld [vmem:[#allocation7 + $0x1cc] ss:$16 sps:$4 sm:$0xff]  }
 0x3cc   :  { %1731 = vmatprep.subr.bf16.mxu0 %v4708_v18  ;;  %1772 = vmatprep.subr.bf16.mxu1 %v4711_v20  ;;  %6070 = vst [vmem:[#allocation52_spill] sm:$0xff] %v4720_v24  ;;  %6071 = vst [vmem:[#allocation53_spill] sm:$0xff] %v4723_v17  ;;  %v4726_v18 = vld [vmem:[#allocation7 + $0x1c0] ss:$16 sps:$4 sm:$0xff]   ;;  %v4729_v20 = vld [vmem:[#allocation7 + $0x1c8] ss:$16 sps:$4 sm:$0xff]  }
 0x3cd   :  { %6072 = vst [vmem:[#allocation54_spill] sm:$0xff] %v4726_v18  ;;  %6073 = vst [vmem:[#allocation55_spill] sm:$0xff] %v4729_v20 }
 0x3cf   :  { %1732 = vmatpush2.bf16.msra.mxu0 %v4714_v21  ;;  %1773 = vmatpush2.bf16.msra.mxu1 %v4717_v23  ;;  %v4732_v21 = vld [vmem:[#allocation7 + $0x1a4] ss:$16 sps:$4 sm:$0xff]   ;;  %v4735_v23 = vld [vmem:[#allocation7 + $0x1ac] ss:$16 sps:$4 sm:$0xff]  }
 0x3d0   :  { %1733 = vmatprep.subr.bf16.mxu0 %v4720_v24  ;;  %1774 = vmatprep.subr.bf16.mxu1 %v4723_v17  ;;  %6074 = vst [vmem:[#allocation56_spill] sm:$0xff] %v4732_v21  ;;  %6075 = vst [vmem:[#allocation57_spill] sm:$0xff] %v4735_v23  ;;  %v4738_v24 = vld [vmem:[#allocation7 + $0x1a0] ss:$16 sps:$4 sm:$0xff]   ;;  %v4741_v17 = vld [vmem:[#allocation7 + $0x1a8] ss:$16 sps:$4 sm:$0xff]  }
 0x3d1   :  { %6076 = vst [vmem:[#allocation58_spill] sm:$0xff] %v4738_v24  ;;  %6077 = vst [vmem:[#allocation59_spill] sm:$0xff] %v4741_v17 }
 0x3d3   :  { %1734 = vmatpush2.bf16.msra.mxu0 %v4726_v18  ;;  %1775 = vmatpush2.bf16.msra.mxu1 %v4729_v20  ;;  %v4744_v18 = vld [vmem:[#allocation7 + $0x184] ss:$16 sps:$4 sm:$0xff]   ;;  %v4747_v20 = vld [vmem:[#allocation7 + $0x18c] ss:$16 sps:$4 sm:$0xff]  }
 0x3d4   :  { %1735 = vmatprep.subr.bf16.mxu0 %v4732_v21  ;;  %1776 = vmatprep.subr.bf16.mxu1 %v4735_v23  ;;  %6078 = vst [vmem:[#allocation60_spill] sm:$0xff] %v4744_v18  ;;  %6079 = vst [vmem:[#allocation61_spill] sm:$0xff] %v4747_v20  ;;  %v4750_v21 = vld [vmem:[#allocation7 + $0x180] ss:$16 sps:$4 sm:$0xff]   ;;  %v4753_v23 = vld [vmem:[#allocation7 + $0x188] ss:$16 sps:$4 sm:$0xff]  }
 0x3d5   :  { %6080 = vst [vmem:[#allocation62_spill] sm:$0xff] %v4750_v21  ;;  %6081 = vst [vmem:[#allocation63_spill] sm:$0xff] %v4753_v23 }
 0x3d7   :  { %1736 = vmatpush2.bf16.msra.mxu0 %v4738_v24  ;;  %1777 = vmatpush2.bf16.msra.mxu1 %v4741_v17  ;;  %v4756_v24 = vld [vmem:[#allocation7 + $0x164] ss:$16 sps:$4 sm:$0xff]   ;;  %v4759_v17 = vld [vmem:[#allocation7 + $0x16c] ss:$16 sps:$4 sm:$0xff]  }
 0x3d8   :  { %1737 = vmatprep.subr.bf16.mxu0 %v4744_v18  ;;  %1778 = vmatprep.subr.bf16.mxu1 %v4747_v20  ;;  %6082 = vst [vmem:[#allocation64_spill] sm:$0xff] %v4756_v24  ;;  %6083 = vst [vmem:[#allocation65_spill] sm:$0xff] %v4759_v17  ;;  %v4762_v18 = vld [vmem:[#allocation7 + $0x160] ss:$16 sps:$4 sm:$0xff]   ;;  %v4765_v20 = vld [vmem:[#allocation7 + $0x168] ss:$16 sps:$4 sm:$0xff]  }
 0x3d9   :  { %6084 = vst [vmem:[#allocation66_spill] sm:$0xff] %v4762_v18  ;;  %6085 = vst [vmem:[#allocation67_spill] sm:$0xff] %v4765_v20 }
 0x3db   :  { %1738 = vmatpush2.bf16.msra.mxu0 %v4750_v21  ;;  %1779 = vmatpush2.bf16.msra.mxu1 %v4753_v23  ;;  %v4768_v21 = vld [vmem:[#allocation7 + $0x144] ss:$16 sps:$4 sm:$0xff]   ;;  %v4771_v23 = vld [vmem:[#allocation7 + $0x14c] ss:$16 sps:$4 sm:$0xff]  }
 0x3dc   :  { %1739 = vmatprep.subr.bf16.mxu0 %v4756_v24  ;;  %1780 = vmatprep.subr.bf16.mxu1 %v4759_v17  ;;  %6086 = vst [vmem:[#allocation68_spill] sm:$0xff] %v4768_v21  ;;  %6087 = vst [vmem:[#allocation69_spill] sm:$0xff] %v4771_v23  ;;  %v4774_v24 = vld [vmem:[#allocation7 + $0x140] ss:$16 sps:$4 sm:$0xff]   ;;  %v4777_v17 = vld [vmem:[#allocation7 + $0x148] ss:$16 sps:$4 sm:$0xff]  }
 0x3dd   :  { %6088 = vst [vmem:[#allocation15_spill] sm:$0xff] %v4774_v24  ;;  %6089 = vst [vmem:[#allocation16_spill] sm:$0xff] %v4777_v17 }
 0x3df   :  { %1740 = vmatpush2.bf16.msra.mxu0 %v4762_v18  ;;  %1781 = vmatpush2.bf16.msra.mxu1 %v4765_v20  ;;  %v4780_v18 = vld [vmem:[#allocation7 + $0x124] ss:$16 sps:$4 sm:$0xff]   ;;  %v4783_v20 = vld [vmem:[#allocation7 + $0x12c] ss:$16 sps:$4 sm:$0xff]  }
 0x3e0   :  { %1741 = vmatprep.subr.bf16.mxu0 %v4768_v21  ;;  %1782 = vmatprep.subr.bf16.mxu1 %v4771_v23  ;;  %6090 = vst [vmem:[#allocation75_spill] sm:$0xff] %v4780_v18  ;;  %6091 = vst [vmem:[#allocation77_spill] sm:$0xff] %v4783_v20  ;;  %v4786_v21 = vld [vmem:[#allocation7 + $0x120] ss:$16 sps:$4 sm:$0xff]   ;;  %v4789_v23 = vld [vmem:[#allocation7 + $0x128] ss:$16 sps:$4 sm:$0xff]  }
 0x3e1   :  { %6092 = vst [vmem:[#allocation78_spill] sm:$0xff] %v4786_v21  ;;  %6093 = vst [vmem:[#allocation76_spill] sm:$0xff] %v4789_v23 }
 0x3e3   :  { %1742 = vmatpush2.bf16.msra.mxu0 %v4774_v24  ;;  %1783 = vmatpush2.bf16.msra.mxu1 %v4777_v17  ;;  %v4792_v24 = vld [vmem:[#allocation7 + $0x104] ss:$16 sps:$4 sm:$0xff]   ;;  %v4795_v17 = vld [vmem:[#allocation7 + $0x10c] ss:$16 sps:$4 sm:$0xff]  }
 0x3e4   :  { %1743 = vmatprep.subr.bf16.mxu0 %v4780_v18  ;;  %1784 = vmatprep.subr.bf16.mxu1 %v4783_v20  ;;  %6094 = vst [vmem:[#allocation21_spill] sm:$0xff] %v4792_v24  ;;  %6095 = vst [vmem:[#allocation22_spill] sm:$0xff] %v4795_v17  ;;  %v4798_v18 = vld [vmem:[#allocation7 + $0x100] ss:$16 sps:$4 sm:$0xff]   ;;  %v4801_v20 = vld [vmem:[#allocation7 + $0x108] ss:$16 sps:$4 sm:$0xff]  }
 0x3e5   :  { %6096 = vst [vmem:[#allocation23_spill] sm:$0xff] %v4798_v18  ;;  %6097 = vst [vmem:[#allocation24_spill] sm:$0xff] %v4801_v20 }
 0x3e7   :  { %1744 = vmatpush2.bf16.msra.mxu0 %v4786_v21  ;;  %1785 = vmatpush2.bf16.msra.mxu1 %v4789_v23 }
 0x3e8   :  { %1745 = vmatprep.subr.bf16.mxu0 %v4792_v24  ;;  %1786 = vmatprep.subr.bf16.mxu1 %v4795_v17 }
 0x3eb   :  { %1746 = vmatpush2.bf16.msra.mxu0 %v4798_v18  ;;  %1787 = vmatpush2.bf16.msra.mxu1 %v4801_v20 }
 0x3ec   :  { %1821 = vmatprep.subr.bf16.mxu0 %v6024_v30  ;;  %1862 = vmatprep.subr.bf16.mxu1 %v6025_v32 }
 0x44e   :  { %v1531_v23 = vpop.f32.mrf.mxu0  ;;  %v1572_v21 = vpop.f32.mrf.mxu1 }
 0x44f   :  { %v1532_v24 = vadd.f32 %v1531_v23, %v6026_v35  ;;  %v1573_v51 = vadd.f32 %v1572_v21, %v6029_v50 }
 0x450   :  { %v1533_v14 = vpop.f32.mrf.mxu0  ;;  %v1574_v16 = vpop.f32.mrf.mxu1 }
 0x451   :  { %v2956_v15 = vmul.f32 -1.442695, %v1532_v24  ;;  %v1534_v17 = vadd.f32 %v1533_v14, %v6027_v41  ;;  %v1575_v30 = vadd.f32 %v1574_v16, %v6028_v57  ;;  %v6098_v14 = vld [vmem:[#allocation79_spill] sm:$0xff]  ;;  %v6099_v57 = vld [vmem:[#allocation81_spill] sm:$0xff] }
 0x452   :  { %v1535_v55 = vpop.f32.mrf.mxu0  ;;  %v1576_v54 = vpop.f32.mrf.mxu1 }
 0x453   :  { %3287 = vpow2.f32 %v2956_v15  ;;  %v2957_v18 = vmul.f32 -1.442695, %v1534_v17  ;;  %v2958_v20 = vmul.f32 -1.442695, %v1575_v30 }
 0x454   :  { %v1536_v53 = vpop.f32.mrf.mxu0  ;;  %v1577_v52 = vpop.f32.mrf.mxu1 }
 0x455   :  { %3289 = vpow2.f32 %v2957_v18 }
 0x456   :  { %3291 = vpow2.f32 %v2958_v20 }
 0x460   :  { %v3288_v32 = vpop.eup %3287 }
 0x461   :  { %v1582_v49 = vadd.f32 1.0, %v3288_v32 }
 0x462   :  { %v3290_v23 = vpop.eup %3289 }
 0x463   :  { %3293 = vrcp.f32 %v1582_v49  ;;  %v1588_v24 = vadd.f32 1.0, %v3290_v23  ;;  %v3292_v15 = vpop.eup %3291 }
 0x464   :  { %3295 = vtanh.f32 %v1573_v51  ;;  %v1595_v32 = vadd.f32 1.0, %v3292_v15 }
 0x465   :  { %3297 = vrcp.f32 %v1588_v24 }
 0x46e   :  { %v1637_v55 = vpop.f32.mrf.mxu0  ;;  %v1678_v54 = vpop.f32.mrf.mxu1 }
 0x46f   :  { %v1685_v53 = vadd.f32 %v1637_v55, %v6098_v14  ;;  %v6100_v14 = vld [vmem:[#allocation82_spill] sm:$0xff] }
 0x470   :  { %v3294_v52 = vpop.eup %3293  ;;  %v1639_v17 = vpop.f32.mrf.mxu0 }
 0x471   :  { %v1680_v18 = vpop.f32.mrf.mxu1  ;;  %v3296_v16 = vpop.eup %3295  ;;  %v2959_v30 = vmul.f32 -1.442695, %v1685_v53  ;;  %v1686_v41 = vadd.f32 %v1639_v17, %v6099_v57  ;;  %v6101_v57 = vld [vmem:[#allocation80_spill] sm:$0xff] }
 0x472   :  { %v3298_v21 = vpop.eup %3297  ;;  %v1641_v50 = vpop.f32.mrf.mxu0  ;;  %v1599_v49 = vmul.f32 %v3296_v16, %v3294_v52  ;;  %v1688_v53 = vadd.f32 %v1680_v18, %v6100_v14  ;;  %v1687_v17 = vadd.f32 %v1678_v54, %v6101_v57 }
 0x473   :  { %v1682_v20 = vpop.f32.mrf.mxu1  ;;  %v1598_v51 = vmul.f32 %v3298_v21, %v4571_v40  ;;  %3299 = vpow2.f32 %v2959_v30  ;;  %v2960_v23 = vmul.f32 -1.442695, %v1686_v41 }
 0x474   :  { %v1642_v24 = vpop.f32.mrf.mxu0  ;;  %v2961_v15 = vmul.f32 -1.442695, %v1688_v53 }
 0x475   :  { %v1683_v35 = vpop.f32.mrf.mxu1  ;;  %3301 = vpow2.f32 %v2960_v23  ;;  %v4813_v55 = vadd.f32 %v1599_v49, %v1598_v51 }
 0x476   :  { %3303 = vrcp.f32 %v1595_v32 }
 0x477   :  { %3305 = vtanh.f32 %v4813_v55 }
 0x478   :  { %3307 = vtanh.f32 %v1687_v17 }
 0x479   :  { %3309 = vpow2.f32 %v2961_v15  ;;  %v6133_v15 = vld [vmem:[#allocation57_spill] sm:$0xff] }
 0x480   :  { %v3300_v50 = vpop.eup %3299 }
 0x481   :  { %v1692_v20 = vadd.f32 1.0, %v3300_v50  ;;  %v6134_v50 = vld [vmem:[#allocation58_spill] sm:$0xff] }
 0x482   :  { %v3302_v52 = vpop.eup %3301 }
 0x483   :  { %v3304_v40 = vpop.eup %3303  ;;  %3311 = vrcp.f32 %v1692_v20  ;;  %v1698_v41 = vadd.f32 1.0, %v3302_v52  ;;  %v6135_v20 = vld [vmem:[#allocation59_spill] sm:$0xff]  ;;  %v6136_v52 = vld [vmem:[#allocation60_spill] sm:$0xff] }
 0x484   :  { %v3306_v35 = vpop.eup %3305 }
 0x485   :  { %3313 = vrcp.f32 %v1698_v41  ;;  %v1602_v16 = vmul.f32 %v3306_v35, %v3304_v40  ;;  %v3308_v21 = vpop.eup %3307  ;;  %v6137_v40 = vld [vmem:[#allocation61_spill] sm:$0xff]  ;;  %v6138_v41 = vld [vmem:[#allocation62_spill] sm:$0xff]  ;;  %v6139_v35 = vld [vmem:[#allocation63_spill] sm:$0xff] }
 0x486   :  { %v3310_v32 = vpop.eup %3309 }
 0x487   :  { %v1714_v30 = vpack.c.bf16 %v1602_v16, %v1602_v16  ;;  %v1705_v51 = vadd.f32 1.0, %v3310_v32  ;;  %v6140_v16 = vld [vmem:[#allocation64_spill] sm:$0xff]  ;;  %v6143_v32 = vld [vmem:[#allocation67_spill] sm:$0xff] }
 0x489   :  { %1747 = vmatprep.mubr.bf16.mxu0 %v1714_v30  ;;  %1788 = vmatprep.mubr.bf16.mxu1 %v1714_v30  ;;  %3315 = vrcp.f32 %v1705_v51  ;;  %v6141_v30 = vld [vmem:[#allocation65_spill] sm:$0xff]  ;;  %v6147_v51 = vld [vmem:[#allocation16_spill] sm:$0xff] }
 0x490   :  { %v3312_v18 = vpop.eup %3311 }
 0x491   :  { %v1709_v49 = vmul.f32 %v3312_v18, %v3308_v21  ;;  %v6142_v21 = vld [vmem:[#allocation66_spill] sm:$0xff]  ;;  %v6144_v18 = vld [vmem:[#allocation68_spill] sm:$0xff] }
 0x492   :  { %v3314_v54 = vpop.eup %3313 }
 0x493   :  { %v1708_v23 = vmul.f32 %v3314_v54, %v4577_v19  ;;  %v6122_v19 = vld [vmem:[#allocation46_spill] sm:$0xff]  ;;  %v6146_v54 = vld [vmem:[#allocation15_spill] sm:$0xff] }
 0x495   :  { %v4819_v24 = vadd.f32 %v1709_v49, %v1708_v23  ;;  %v6145_v49 = vld [vmem:[#allocation69_spill] sm:$0xff]  ;;  %v6148_v23 = vld [vmem:[#allocation75_spill] sm:$0xff] }
 0x496   :  { %v3316_v14 = vpop.eup %3315 }
 0x497   :  { %3317 = vtanh.f32 %v4819_v24 }
 0x4a4   :  { %v3318_v53 = vpop.eup %3317 }
 0x4a5   :  { %v1712_v57 = vmul.f32 %v3318_v53, %v3316_v14  ;;  %v6149_v14 = vld [vmem:[#allocation77_spill] sm:$0xff]  ;;  %v6150_v53 = vld [vmem:[#allocation78_spill] sm:$0xff] }
 0x4a7   :  { %v1713_v17 = vpack.c.bf16 %v1712_v57, %v1712_v57  ;;  %v6151_v57 = vld [vmem:[#allocation76_spill] sm:$0xff] }
 0x4a9   :  { %1748 = vmatmul.mubr.bf16.vlgmr.msra.gmra.mxu0 %v1713_v17  ;;  %1789 = vmatmul.mubr.bf16.vlgmr.msra.gmra.mxu1 %v1713_v17 }
 0x4aa   :  { %1822 = vmatpush1.bf16.msra.mxu0 %v4404_v12  ;;  %1863 = vmatpush1.bf16.msra.mxu1 %v4407_v5  ;;  %v6102_v12 = vld [vmem:[#allocation31_spill] sm:$0xff]  ;;  %v6103_v5 = vld [vmem:[#allocation32_spill] sm:$0xff] }
 0x4ab   :  { %1823 = vmatprep.subr.bf16.mxu0 %v4410_v62  ;;  %1864 = vmatprep.subr.bf16.mxu1 %v4413_v31  ;;  %v6104_v62 = vld [vmem:[#allocation33_spill] sm:$0xff]  ;;  %v6105_v31 = vld [vmem:[#allocation34_spill] sm:$0xff] }
 0x4ac   :  { %1853 = vmatprep.mubr.bf16.mxu0 %v5919_v11  ;;  %1894 = vmatprep.mubr.bf16.mxu1 %v5919_v11 }
 0x4ae   :  { %1824 = vmatpush1.bf16.msra.mxu0 %v4418_v59  ;;  %1865 = vmatpush1.bf16.msra.mxu1 %v4421_v1  ;;  %v6106_v59 = vld [vmem:[#allocation35_spill] sm:$0xff]  ;;  %v6107_v1 = vld [vmem:[#allocation36_spill] sm:$0xff] }
 0x4af   :  { %1825 = vmatprep.subr.bf16.mxu0 %v4424_v3  ;;  %1866 = vmatprep.subr.bf16.mxu1 %v4427_v7  ;;  %v6108_v3 = vld [vmem:[#allocation37_spill] sm:$0xff]  ;;  %v6109_v7 = vld [vmem:[#allocation38_spill] sm:$0xff] }
 0x4b2   :  { %1826 = vmatpush1.bf16.msra.mxu0 %v4430_v13  ;;  %1867 = vmatpush1.bf16.msra.mxu1 %v4433_v2  ;;  %v6110_v13 = vld [vmem:[#allocation39_spill] sm:$0xff]  ;;  %v6111_v2 = vld [vmem:[#allocation40_spill] sm:$0xff] }
 0x4b3   :  { %1827 = vmatprep.subr.bf16.mxu0 %v4436_v4  ;;  %1868 = vmatprep.subr.bf16.mxu1 %v4439_v58  ;;  %v6112_v4 = vld [vmem:[#allocation41_spill] sm:$0xff]  ;;  %v6113_v58 = vld [vmem:[#allocation42_spill] sm:$0xff] }
 0x4b6   :  { %1828 = vmatpush1.bf16.msra.mxu0 %v4442_v60  ;;  %1869 = vmatpush1.bf16.msra.mxu1 %v4445_v0  ;;  %v6114_v60 = vld [vmem:[#allocation43_spill] sm:$0xff]  ;;  %v6115_v0 = vld [vmem:[#allocation44_spill] sm:$0xff] }
 0x4b7   :  { %1829 = vmatprep.subr.bf16.mxu0 %v6034_v38  ;;  %1870 = vmatprep.subr.bf16.mxu1 %v6035_v25  ;;  %v6123_v38 = vld [vmem:[#allocation47_spill] sm:$0xff]  ;;  %v6124_v25 = vld [vmem:[#allocation48_spill] sm:$0xff] }
 0x4ba   :  { %1830 = vmatpush1.bf16.msra.mxu0 %v6036_v26  ;;  %1871 = vmatpush1.bf16.msra.mxu1 %v6037_v27  ;;  %v6125_v26 = vld [vmem:[#allocation49_spill] sm:$0xff]  ;;  %v6126_v27 = vld [vmem:[#allocation50_spill] sm:$0xff] }
 0x4bb   :  { %1831 = vmatprep.subr.bf16.mxu0 %v6038_v28  ;;  %1872 = vmatprep.subr.bf16.mxu1 %v6039_v29  ;;  %v6127_v28 = vld [vmem:[#allocation51_spill] sm:$0xff]  ;;  %v6128_v29 = vld [vmem:[#allocation52_spill] sm:$0xff] }
 0x4be   :  { %1832 = vmatpush1.bf16.msra.mxu0 %v6040_v33  ;;  %1873 = vmatpush1.bf16.msra.mxu1 %v6041_v34  ;;  %v6129_v33 = vld [vmem:[#allocation53_spill] sm:$0xff]  ;;  %v6130_v34 = vld [vmem:[#allocation54_spill] sm:$0xff] }
 0x4bf   :  { %1833 = vmatprep.subr.bf16.mxu0 %v6042_v36  ;;  %1874 = vmatprep.subr.bf16.mxu1 %v6043_v37  ;;  %v6131_v36 = vld [vmem:[#allocation55_spill] sm:$0xff]  ;;  %v6132_v37 = vld [vmem:[#allocation56_spill] sm:$0xff] }
 0x4c2   :  { %1834 = vmatpush1.bf16.msra.mxu0 %v4478_v10  ;;  %1875 = vmatpush1.bf16.msra.mxu1 %v4481_v8  ;;  %v6120_v10 = vld [vmem:[#allocation74_spill] sm:$0xff]  ;;  %v6121_v8 = vld [vmem:[#allocation72_spill] sm:$0xff] }
 0x4c3   :  { %1835 = vmatprep.subr.bf16.mxu0 %v4484_v61  ;;  %1876 = vmatprep.subr.bf16.mxu1 %v4487_v56  ;;  %v6116_v61 = vld [vmem:[#allocation45_spill] sm:$0xff]  ;;  %v6117_v56 = vld [vmem:[#allocation70_spill] sm:$0xff] }
 0x4c6   :  { %1836 = vmatpush1.bf16.msra.mxu0 %v4490_v9  ;;  %1877 = vmatpush1.bf16.msra.mxu1 %v4493_v63  ;;  %v6118_v9 = vld [vmem:[#allocation71_spill] sm:$0xff]  ;;  %v6119_v63 = vld [vmem:[#allocation73_spill] sm:$0xff] }
 0x4c7   :  { %1933 = vmatprep.subr.bf16.mxu0 %v4612_v39  ;;  %1974 = vmatprep.subr.bf16.mxu1 %v4615_v42 }
 0x4c9   :  { %1854 = vmatmul.mubr.bf16.vlgmr.msra.gmra.mxu0 %v1713_v17  ;;  %1895 = vmatmul.mubr.bf16.vlgmr.msra.gmra.mxu1 %v1713_v17  ;;  %v6152_v17 = vld [vmem:[#allocation21_spill] sm:$0xff] }
 0x4ca   :  { %1934 = vmatpush1.bf16.msra.mxu0 %v4618_v43  ;;  %1975 = vmatpush1.bf16.msra.mxu1 %v4621_v44 }
 0x4cb   :  { %1935 = vmatprep.subr.bf16.mxu0 %v4624_v45  ;;  %1976 = vmatprep.subr.bf16.mxu1 %v4627_v46 }
 0x4ce   :  { %1936 = vmatpush1.bf16.msra.mxu0 %v4630_v6  ;;  %1977 = vmatpush1.bf16.msra.mxu1 %v4633_v47 }
 0x4cf   :  { %1937 = vmatprep.subr.bf16.mxu0 %v4636_v48  ;;  %1978 = vmatprep.subr.bf16.mxu1 %v4639_v22 }
 0x4d2   :  { %1938 = vmatpush1.bf16.msra.mxu0 %v6102_v12  ;;  %1979 = vmatpush1.bf16.msra.mxu1 %v6103_v5 }
 0x4d3   :  { %1939 = vmatprep.subr.bf16.mxu0 %v6104_v62  ;;  %1980 = vmatprep.subr.bf16.mxu1 %v6105_v31 }
 0x4d6   :  { %1940 = vmatpush1.bf16.msra.mxu0 %v6106_v59  ;;  %1981 = vmatpush1.bf16.msra.mxu1 %v6107_v1 }
 0x4d7   :  { %1941 = vmatprep.subr.bf16.mxu0 %v6108_v3  ;;  %1982 = vmatprep.subr.bf16.mxu1 %v6109_v7 }
 0x4da   :  { %1942 = vmatpush1.bf16.msra.mxu0 %v6110_v13  ;;  %1983 = vmatpush1.bf16.msra.mxu1 %v6111_v2 }
 0x4db   :  { %1943 = vmatprep.subr.bf16.mxu0 %v6112_v4  ;;  %1984 = vmatprep.subr.bf16.mxu1 %v6113_v58 }
 0x4de   :  { %1944 = vmatpush1.bf16.msra.mxu0 %v6114_v60  ;;  %1985 = vmatpush1.bf16.msra.mxu1 %v6115_v0 }
 0x4df   :  { %1945 = vmatprep.subr.bf16.mxu0 %v6116_v61  ;;  %1986 = vmatprep.subr.bf16.mxu1 %v6117_v56 }
 0x4e2   :  { %1946 = vmatpush1.bf16.msra.mxu0 %v6118_v9  ;;  %1987 = vmatpush1.bf16.msra.mxu1 %v6119_v63 }
 0x4e3   :  { %1947 = vmatprep.subr.bf16.mxu0 %v6120_v10  ;;  %1988 = vmatprep.subr.bf16.mxu1 %v6121_v8 }
 0x4e6   :  { %1948 = vmatpush1.bf16.msra.mxu0 %v6122_v19  ;;  %1989 = vmatpush1.bf16.msra.mxu1 %v6123_v38 }
 0x4e7   :  { %1949 = vmatprep.subr.bf16.mxu0 %v6124_v25  ;;  %1990 = vmatprep.subr.bf16.mxu1 %v6125_v26 }
 0x4ea   :  { %1950 = vmatpush2.bf16.msra.mxu0 %v6126_v27  ;;  %1991 = vmatpush2.bf16.msra.mxu1 %v6127_v28 }
 0x4eb   :  { %1951 = vmatprep.subr.bf16.mxu0 %v6128_v29  ;;  %1992 = vmatprep.subr.bf16.mxu1 %v6129_v33 }
 0x4ee   :  { %1952 = vmatpush2.bf16.msra.mxu0 %v6130_v34  ;;  %1993 = vmatpush2.bf16.msra.mxu1 %v6131_v36 }
 0x4ef   :  { %1953 = vmatprep.subr.bf16.mxu0 %v6132_v37  ;;  %1994 = vmatprep.subr.bf16.mxu1 %v6133_v15 }
 0x4f2   :  { %1954 = vmatpush2.bf16.msra.mxu0 %v6134_v50  ;;  %1995 = vmatpush2.bf16.msra.mxu1 %v6135_v20  ;;  %v6161_v50 = vld [vmem:[#allocation20_spill] sm:$0xff] }
 0x4f3   :  { %1955 = vmatprep.subr.bf16.mxu0 %v6136_v52  ;;  %1996 = vmatprep.subr.bf16.mxu1 %v6137_v40 }
 0x4f6   :  { %1956 = vmatpush2.bf16.msra.mxu0 %v6138_v41  ;;  %1997 = vmatpush2.bf16.msra.mxu1 %v6139_v35 }
 0x4f7   :  { %1957 = vmatprep.subr.bf16.mxu0 %v6140_v16  ;;  %1998 = vmatprep.subr.bf16.mxu1 %v6141_v30 }
 0x4fa   :  { %1958 = vmatpush2.bf16.msra.mxu0 %v6142_v21  ;;  %1999 = vmatpush2.bf16.msra.mxu1 %v6143_v32  ;;  %v6153_v21 = vld [vmem:[#allocation22_spill] sm:$0xff]  ;;  %v6154_v32 = vld [vmem:[#allocation23_spill] sm:$0xff] }
 0x4fb   :  { %1959 = vmatprep.subr.bf16.mxu0 %v6144_v18  ;;  %2000 = vmatprep.subr.bf16.mxu1 %v6145_v49  ;;  %v6155_v18 = vld [vmem:[#allocation24_spill] sm:$0xff] }
 0x4fc   :  { %v4918_v49 = vld [vmem:[#allocation5 + $0xe4] ss:$16 sps:$4 sm:$0xff]  }
 0x4fd   :  { %6156 = vst [vmem:[#allocation25_spill] sm:$0xff] %v4918_v49 }
 0x4fe   :  { %1960 = vmatpush2.bf16.msra.mxu0 %v6146_v54  ;;  %2001 = vmatpush2.bf16.msra.mxu1 %v6147_v51  ;;  %v4921_v51 = vld [vmem:[#allocation5 + $0xec] ss:$16 sps:$4 sm:$0xff]  }
 0x4ff   :  { %1961 = vmatprep.subr.bf16.mxu0 %v6148_v23  ;;  %2002 = vmatprep.subr.bf16.mxu1 %v6149_v14  ;;  %6157 = vst [vmem:[#allocation26_spill] sm:$0xff] %v4921_v51  ;;  %v6158_v23 = vld [vmem:[#allocation17_spill] sm:$0xff] }
 0x502   :  { %1962 = vmatpush2.bf16.msra.mxu0 %v6150_v53  ;;  %2003 = vmatpush2.bf16.msra.mxu1 %v6151_v57 }
 0x503   :  { %1963 = vmatprep.subr.bf16.mxu0 %v6152_v17  ;;  %2004 = vmatprep.subr.bf16.mxu1 %v6153_v21  ;;  %v6159_v21 = vld [vmem:[#allocation18_spill] sm:$0xff] }
 0x506   :  { %1964 = vmatpush2.bf16.msra.mxu0 %v6154_v32  ;;  %2005 = vmatpush2.bf16.msra.mxu1 %v6155_v18 }
 0x507   :  { %2039 = vmatprep.subr.bf16.mxu0 %v4918_v49  ;;  %2080 = vmatprep.subr.bf16.mxu1 %v4921_v51  ;;  %v6160_v49 = vld [vmem:[#allocation19_spill] sm:$0xff] }
 0x569   :  { %v1749_v14 = vpop.f32.mrf.mxu0  ;;  %v1790_v53 = vpop.f32.mrf.mxu1 }
 0x56a   :  { %v1750_v57 = vadd.f32 %v1749_v14, %v6158_v23  ;;  %v1791_v15 = vadd.f32 %v1790_v53, %v6161_v50 }
 0x56b   :  { %v1751_v54 = vpop.f32.mrf.mxu0  ;;  %v1792_v17 = vpop.f32.mrf.mxu1 }
 0x56c   :  { %v2962_v30 = vmul.f32 -1.442695, %v1750_v57  ;;  %v1752_v16 = vadd.f32 %v1751_v54, %v6159_v21  ;;  %v1793_v52 = vadd.f32 %v1792_v17, %v6160_v49  ;;  %v6163_v49 = vld [vmem:[#allocation85_spill] sm:$0xff] }
 0x56d   :  { %v1753_v32 = vpop.f32.mrf.mxu0  ;;  %v1794_v35 = vpop.f32.mrf.mxu1 }
 0x56e   :  { %3319 = vpow2.f32 %v2962_v30  ;;  %v2963_v18 = vmul.f32 -1.442695, %v1752_v16  ;;  %v2964_v20 = vmul.f32 -1.442695, %v1793_v52  ;;  %v6162_v16 = vld [vmem:[#allocation83_spill] sm:$0xff] }
 0x56f   :  { %v1754_v41 = vpop.f32.mrf.mxu0  ;;  %v1795_v40 = vpop.f32.mrf.mxu1 }
 0x570   :  { %3321 = vpow2.f32 %v2963_v18 }
 0x571   :  { %3323 = vpow2.f32 %v2964_v20 }
 0x57b   :  { %v3320_v51 = vpop.eup %3319 }
 0x57c   :  { %v1800_v37 = vadd.f32 1.0, %v3320_v51 }
 0x57d   :  { %v3322_v14 = vpop.eup %3321 }
 0x57e   :  { %3325 = vrcp.f32 %v1800_v37  ;;  %v1806_v57 = vadd.f32 1.0, %v3322_v14  ;;  %v3324_v30 = vpop.eup %3323 }
 0x57f   :  { %3327 = vtanh.f32 %v1791_v15  ;;  %v1813_v51 = vadd.f32 1.0, %v3324_v30 }
 0x580   :  { %3329 = vrcp.f32 %v1806_v57 }
 0x589   :  { %v1855_v32 = vpop.f32.mrf.mxu0  ;;  %v1896_v35 = vpop.f32.mrf.mxu1 }
 0x58a   :  { %v1903_v41 = vadd.f32 %v1855_v32, %v6162_v16  ;;  %v6164_v16 = vld [vmem:[#allocation86_spill] sm:$0xff] }
 0x58b   :  { %v3326_v40 = vpop.eup %3325  ;;  %v1857_v18 = vpop.f32.mrf.mxu0 }
 0x58c   :  { %v1898_v54 = vpop.f32.mrf.mxu1  ;;  %v3328_v17 = vpop.eup %3327  ;;  %v2965_v52 = vmul.f32 -1.442695, %v1903_v41  ;;  %v1904_v21 = vadd.f32 %v1857_v18, %v6163_v49  ;;  %v6165_v49 = vld [vmem:[#allocation84_spill] sm:$0xff] }
 0x58d   :  { %v3330_v53 = vpop.eup %3329  ;;  %v1859_v50 = vpop.f32.mrf.mxu0  ;;  %v1817_v37 = vmul.f32 %v3328_v17, %v3326_v40  ;;  %v1906_v41 = vadd.f32 %v1898_v54, %v6164_v16  ;;  %v1905_v18 = vadd.f32 %v1896_v35, %v6165_v49 }
 0x58e   :  { %v1900_v20 = vpop.f32.mrf.mxu1  ;;  %v1816_v15 = vmul.f32 %v3330_v53, %v4813_v55  ;;  %3331 = vpow2.f32 %v2965_v52  ;;  %v2966_v14 = vmul.f32 -1.442695, %v1904_v21 }
 0x58f   :  { %v1860_v57 = vpop.f32.mrf.mxu0  ;;  %v2967_v30 = vmul.f32 -1.442695, %v1906_v41 }
 0x590   :  { %v1901_v23 = vpop.f32.mrf.mxu1  ;;  %3333 = vpow2.f32 %v2966_v14  ;;  %v4931_v32 = vadd.f32 %v1817_v37, %v1816_v15 }
 0x591   :  { %3335 = vrcp.f32 %v1813_v51 }
 0x592   :  { %3337 = vtanh.f32 %v4931_v32 }
 0x593   :  { %3339 = vtanh.f32 %v1905_v18 }
 0x594   :  { %3341 = vpow2.f32 %v2967_v30  ;;  %v4944_v30 = vld [vmem:[#allocation5 + $0xe0] ss:$16 sps:$4 sm:$0xff]  }
 0x59b   :  { %v3332_v50 = vpop.eup %3331 }
 0x59c   :  { %v1910_v20 = vadd.f32 1.0, %v3332_v50  ;;  %v4947_v50 = vld [vmem:[#allocation5 + $0xe8] ss:$16 sps:$4 sm:$0xff]  }
 0x59d   :  { %v3334_v40 = vpop.eup %3333 }
 0x59e   :  { %v3336_v55 = vpop.eup %3335  ;;  %3343 = vrcp.f32 %v1910_v20  ;;  %v1916_v21 = vadd.f32 1.0, %v3334_v40  ;;  %v4953_v20 = vld [vmem:[#allocation5 + $0xcc] ss:$16 sps:$4 sm:$0xff]   ;;  %v4958_v40 = vld [vmem:[#allocation5 + $0xc0] ss:$16 sps:$4 sm:$0xff]  }
 0x59f   :  { %v3338_v23 = vpop.eup %3337 }
 0x5a0   :  { %3345 = vrcp.f32 %v1916_v21  ;;  %v1820_v17 = vmul.f32 %v3338_v23, %v3336_v55  ;;  %v3340_v53 = vpop.eup %3339  ;;  %v4961_v55 = vld [vmem:[#allocation5 + $0xc8] ss:$16 sps:$4 sm:$0xff]   ;;  %v4964_v21 = vld [vmem:[#allocation5 + $0xa4] ss:$16 sps:$4 sm:$0xff]   ;;  %v4967_v23 = vld [vmem:[#allocation5 + $0xac] ss:$16 sps:$4 sm:$0xff]  }
 0x5a1   :  { %v3342_v51 = vpop.eup %3341 }
 0x5a2   :  { %v1932_v52 = vpack.c.bf16 %v1820_v17, %v1820_v17  ;;  %v1923_v15 = vadd.f32 1.0, %v3342_v51  ;;  %v4970_v17 = vld [vmem:[#allocation5 + $0xa0] ss:$16 sps:$4 sm:$0xff]   ;;  %v4979_v51 = vld [vmem:[#allocation5 + $0x8c] ss:$16 sps:$4 sm:$0xff]  }
 0x5a4   :  { %1965 = vmatprep.mubr.bf16.mxu0 %v1932_v52  ;;  %2006 = vmatprep.mubr.bf16.mxu1 %v1932_v52  ;;  %3347 = vrcp.f32 %v1923_v15  ;;  %v4973_v52 = vld [vmem:[#allocation5 + $0xa8] ss:$16 sps:$4 sm:$0xff]   ;;  %v4991_v15 = vld [vmem:[#allocation5 + $0x6c] ss:$16 sps:$4 sm:$0xff]  }
 0x5a5   :  { %6167 = vst [vmem:[#allocation28_spill] sm:$0xff] %v4991_v15 }
 0x5ab   :  { %v3344_v54 = vpop.eup %3343 }
 0x5ac   :  { %v1927_v37 = vmul.f32 %v3344_v54, %v3340_v53  ;;  %v4976_v53 = vld [vmem:[#allocation5 + $0x84] ss:$16 sps:$4 sm:$0xff]   ;;  %v4982_v54 = vld [vmem:[#allocation5 + $0x80] ss:$16 sps:$4 sm:$0xff]  }
 0x5ad   :  { %v3346_v35 = vpop.eup %3345 }
 0x5ae   :  { %v1926_v14 = vmul.f32 %v3346_v35, %v4819_v24  ;;  %v4950_v24 = vld [vmem:[#allocation5 + $0xc4] ss:$16 sps:$4 sm:$0xff]  }
 0x5af   :  { %v4988_v35 = vld [vmem:[#allocation5 + $0x64] ss:$16 sps:$4 sm:$0xff]  }
 0x5b0   :  { %v4937_v57 = vadd.f32 %v1927_v37, %v1926_v14  ;;  %v4985_v37 = vld [vmem:[#allocation5 + $0x88] ss:$16 sps:$4 sm:$0xff]   ;;  %6166 = vst [vmem:[#allocation27_spill] sm:$0xff] %v4988_v35  ;;  %v4994_v14 = vld [vmem:[#allocation5 + $0x60] ss:$16 sps:$4 sm:$0xff]  }
 0x5b1   :  { %v3348_v16 = vpop.eup %3347  ;;  %6168 = vst [vmem:[#allocation29_spill] sm:$0xff] %v4994_v14 }
 0x5b2   :  { %3349 = vtanh.f32 %v4937_v57 }
 0x5bf   :  { %v3350_v41 = vpop.eup %3349 }
 0x5c0   :  { %v1930_v49 = vmul.f32 %v3350_v41, %v3348_v16  ;;  %v4997_v16 = vld [vmem:[#allocation5 + $0x68] ss:$16 sps:$4 sm:$0xff]   ;;  %v5000_v41 = vld [vmem:[#allocation5 + $0x44] ss:$16 sps:$4 sm:$0xff]  }
 0x5c1   :  { %6169 = vst [vmem:[#allocation30_spill] sm:$0xff] %v4997_v16  ;;  %6170 = vst [vmem:[#allocation79_spill] sm:$0xff] %v5000_v41 }
 0x5c2   :  { %v4940_v18 = vpack.c.bf16 %v1930_v49, %v1930_v49  ;;  %v5003_v49 = vld [vmem:[#allocation5 + $0x4c] ss:$16 sps:$4 sm:$0xff]  }
 0x5c3   :  { %6171 = vst [vmem:[#allocation81_spill] sm:$0xff] %v5003_v49 }
 0x5c4   :  { %1966 = vmatmul.mubr.bf16.vlgmr.msra.gmra.mxu0 %v4940_v18  ;;  %2007 = vmatmul.mubr.bf16.vlgmr.msra.gmra.mxu1 %v4940_v18 }
 0x5c5   :  { %2040 = vmatpush1.bf16.msra.mxu0 %v4944_v30  ;;  %2081 = vmatpush1.bf16.msra.mxu1 %v4947_v50 }
 0x5c6   :  { %2041 = vmatprep.subr.bf16.mxu0 %v4950_v24  ;;  %2082 = vmatprep.subr.bf16.mxu1 %v4953_v20 }
 0x5c7   :  { %2071 = vmatprep.mubr.bf16.mxu0 %v5919_v11  ;;  %2112 = vmatprep.mubr.bf16.mxu1 %v5919_v11 }
 0x5c9   :  { %2042 = vmatpush1.bf16.msra.mxu0 %v4958_v40  ;;  %2083 = vmatpush1.bf16.msra.mxu1 %v4961_v55 }
 0x5ca   :  { %2043 = vmatprep.subr.bf16.mxu0 %v4964_v21  ;;  %2084 = vmatprep.subr.bf16.mxu1 %v4967_v23 }
 0x5cd   :  { %2044 = vmatpush1.bf16.msra.mxu0 %v4970_v17  ;;  %2085 = vmatpush1.bf16.msra.mxu1 %v4973_v52 }
 0x5ce   :  { %2045 = vmatprep.subr.bf16.mxu0 %v4976_v53  ;;  %2086 = vmatprep.subr.bf16.mxu1 %v4979_v51 }
 0x5d1   :  { %2046 = vmatpush1.bf16.msra.mxu0 %v4982_v54  ;;  %2087 = vmatpush1.bf16.msra.mxu1 %v4985_v37 }
 0x5d2   :  { %2047 = vmatprep.subr.bf16.mxu0 %v4988_v35  ;;  %2088 = vmatprep.subr.bf16.mxu1 %v4991_v15  ;;  %v5006_v35 = vld [vmem:[#allocation5 + $0x40] ss:$16 sps:$4 sm:$0xff]   ;;  %v5009_v15 = vld [vmem:[#allocation5 + $0x48] ss:$16 sps:$4 sm:$0xff]  }
 0x5d3   :  { %6172 = vst [vmem:[#allocation82_spill] sm:$0xff] %v5006_v35  ;;  %6173 = vst [vmem:[#allocation80_spill] sm:$0xff] %v5009_v15 }
 0x5d5   :  { %2048 = vmatpush1.bf16.msra.mxu0 %v4994_v14  ;;  %2089 = vmatpush1.bf16.msra.mxu1 %v4997_v16  ;;  %v5012_v14 = vld [vmem:[#allocation5 + $0x24] ss:$16 sps:$4 sm:$0xff]   ;;  %v5015_v16 = vld [vmem:[#allocation5 + $0x2c] ss:$16 sps:$4 sm:$0xff]  }
 0x5d6   :  { %2049 = vmatprep.subr.bf16.mxu0 %v5000_v41  ;;  %2090 = vmatprep.subr.bf16.mxu1 %v5003_v49  ;;  %6174 = vst [vmem:[#allocation31_spill] sm:$0xff] %v5012_v14  ;;  %6175 = vst [vmem:[#allocation32_spill] sm:$0xff] %v5015_v16  ;;  %v5018_v41 = vld [vmem:[#allocation5 + $0x20] ss:$16 sps:$4 sm:$0xff]   ;;  %v5021_v49 = vld [vmem:[#allocation5 + $0x28] ss:$16 sps:$4 sm:$0xff]  }
 0x5d9   :  { %2050 = vmatpush1.bf16.msra.mxu0 %v5006_v35  ;;  %2091 = vmatpush1.bf16.msra.mxu1 %v5009_v15  ;;  %v5024_v35 = vld [vmem:[#allocation5 + $0x4] ss:$16 sps:$4 sm:$0xff]   ;;  %v5027_v15 = vld [vmem:[#allocation5 + $0xc] ss:$16 sps:$4 sm:$0xff]  }
 0x5da   :  { %2051 = vmatprep.subr.bf16.mxu0 %v5012_v14  ;;  %2092 = vmatprep.subr.bf16.mxu1 %v5015_v16  ;;  %v5030_v14 = vld [vmem:[#allocation5] ss:$16 sps:$4 sm:$0xff]   ;;  %v5033_v16 = vld [vmem:[#allocation5 + $0x8] ss:$16 sps:$4 sm:$0xff]  }
 0x5dd   :  { %2052 = vmatpush1.bf16.msra.mxu0 %v5018_v41  ;;  %2093 = vmatpush1.bf16.msra.mxu1 %v5021_v49 }
 0x5de   :  { %2053 = vmatprep.subr.bf16.mxu0 %v5024_v35  ;;  %2094 = vmatprep.subr.bf16.mxu1 %v5027_v15 }
 0x5e1   :  { %2054 = vmatpush1.bf16.msra.mxu0 %v5030_v14  ;;  %2095 = vmatpush1.bf16.msra.mxu1 %v5033_v16 }
 0x5e2   :  { %2151 = vmatprep.subr.bf16.mxu0 %v4612_v39  ;;  %2192 = vmatprep.subr.bf16.mxu1 %v4615_v42  ;;  %v6176_v39 = vld [vmem:[#allocation56_spill] sm:$0xff]  ;;  %v6177_v42 = vld [vmem:[#allocation57_spill] sm:$0xff] }
 0x5e4   :  { %2072 = vmatmul.mubr.bf16.vlgmr.msra.gmra.mxu0 %v4940_v18  ;;  %2113 = vmatmul.mubr.bf16.vlgmr.msra.gmra.mxu1 %v4940_v18  ;;  %v6204_v18 = vld [vmem:[#allocation19_spill] sm:$0xff] }
 0x5e5   :  { %2152 = vmatpush1.bf16.msra.mxu0 %v4618_v43  ;;  %2193 = vmatpush1.bf16.msra.mxu1 %v4621_v44  ;;  %v6178_v43 = vld [vmem:[#allocation58_spill] sm:$0xff]  ;;  %v6179_v44 = vld [vmem:[#allocation59_spill] sm:$0xff] }
 0x5e6   :  { %2153 = vmatprep.subr.bf16.mxu0 %v4624_v45  ;;  %2194 = vmatprep.subr.bf16.mxu1 %v4627_v46  ;;  %v6180_v45 = vld [vmem:[#allocation60_spill] sm:$0xff]  ;;  %v6181_v46 = vld [vmem:[#allocation61_spill] sm:$0xff] }
 0x5e9   :  { %2154 = vmatpush1.bf16.msra.mxu0 %v4630_v6  ;;  %2195 = vmatpush1.bf16.msra.mxu1 %v4633_v47  ;;  %v6182_v6 = vld [vmem:[#allocation62_spill] sm:$0xff]  ;;  %v6183_v47 = vld [vmem:[#allocation63_spill] sm:$0xff] }
 0x5ea   :  { %2155 = vmatprep.subr.bf16.mxu0 %v4636_v48  ;;  %2196 = vmatprep.subr.bf16.mxu1 %v4639_v22  ;;  %v6184_v48 = vld [vmem:[#allocation64_spill] sm:$0xff]  ;;  %v6185_v22 = vld [vmem:[#allocation65_spill] sm:$0xff] }
 0x5ed   :  { %2156 = vmatpush1.bf16.msra.mxu0 %v6102_v12  ;;  %2197 = vmatpush1.bf16.msra.mxu1 %v6103_v5  ;;  %v6186_v12 = vld [vmem:[#allocation66_spill] sm:$0xff]  ;;  %v6187_v5 = vld [vmem:[#allocation67_spill] sm:$0xff] }
 0x5ee   :  { %2157 = vmatprep.subr.bf16.mxu0 %v6104_v62  ;;  %2198 = vmatprep.subr.bf16.mxu1 %v6105_v31  ;;  %v6188_v62 = vld [vmem:[#allocation68_spill] sm:$0xff]  ;;  %v6189_v31 = vld [vmem:[#allocation69_spill] sm:$0xff] }
 0x5f1   :  { %2158 = vmatpush1.bf16.msra.mxu0 %v6106_v59  ;;  %2199 = vmatpush1.bf16.msra.mxu1 %v6107_v1  ;;  %v6190_v59 = vld [vmem:[#allocation15_spill] sm:$0xff]  ;;  %v6191_v1 = vld [vmem:[#allocation16_spill] sm:$0xff] }
 0x5f2   :  { %2159 = vmatprep.subr.bf16.mxu0 %v6108_v3  ;;  %2200 = vmatprep.subr.bf16.mxu1 %v6109_v7  ;;  %v6192_v3 = vld [vmem:[#allocation75_spill] sm:$0xff]  ;;  %v6193_v7 = vld [vmem:[#allocation77_spill] sm:$0xff] }
 0x5f5   :  { %2160 = vmatpush1.bf16.msra.mxu0 %v6110_v13  ;;  %2201 = vmatpush1.bf16.msra.mxu1 %v6111_v2  ;;  %v6194_v13 = vld [vmem:[#allocation78_spill] sm:$0xff]  ;;  %v6195_v2 = vld [vmem:[#allocation76_spill] sm:$0xff] }
 0x5f6   :  { %2161 = vmatprep.subr.bf16.mxu0 %v6112_v4  ;;  %2202 = vmatprep.subr.bf16.mxu1 %v6113_v58  ;;  %v6196_v4 = vld [vmem:[#allocation21_spill] sm:$0xff]  ;;  %v6197_v58 = vld [vmem:[#allocation22_spill] sm:$0xff] }
 0x5f9   :  { %2162 = vmatpush1.bf16.msra.mxu0 %v6114_v60  ;;  %2203 = vmatpush1.bf16.msra.mxu1 %v6115_v0  ;;  %v6198_v60 = vld [vmem:[#allocation23_spill] sm:$0xff]  ;;  %v6199_v0 = vld [vmem:[#allocation24_spill] sm:$0xff] }
 0x5fa   :  { %2163 = vmatprep.subr.bf16.mxu0 %v6116_v61  ;;  %2204 = vmatprep.subr.bf16.mxu1 %v6117_v56  ;;  %v6200_v61 = vld [vmem:[#allocation25_spill] sm:$0xff]  ;;  %v6201_v56 = vld [vmem:[#allocation26_spill] sm:$0xff] }
 0x5fd   :  { %2164 = vmatpush1.bf16.msra.mxu0 %v6118_v9  ;;  %2205 = vmatpush1.bf16.msra.mxu1 %v6119_v63 }
 0x5fe   :  { %2165 = vmatprep.subr.bf16.mxu0 %v6120_v10  ;;  %2206 = vmatprep.subr.bf16.mxu1 %v6121_v8  ;;  %v6202_v10 = vld [vmem:[#allocation17_spill] sm:$0xff] }
 0x601   :  { %2166 = vmatpush1.bf16.msra.mxu0 %v6122_v19  ;;  %2207 = vmatpush1.bf16.msra.mxu1 %v6123_v38 }
 0x602   :  { %2167 = vmatprep.subr.bf16.mxu0 %v6124_v25  ;;  %2208 = vmatprep.subr.bf16.mxu1 %v6125_v26  ;;  %v6203_v26 = vld [vmem:[#allocation18_spill] sm:$0xff] }
 0x605   :  { %2168 = vmatpush2.bf16.msra.mxu0 %v6126_v27  ;;  %2209 = vmatpush2.bf16.msra.mxu1 %v6127_v28 }
 0x606   :  { %2169 = vmatprep.subr.bf16.mxu0 %v6128_v29  ;;  %2210 = vmatprep.subr.bf16.mxu1 %v6129_v33 }
 0x609   :  { %2170 = vmatpush2.bf16.msra.mxu0 %v6130_v34  ;;  %2211 = vmatpush2.bf16.msra.mxu1 %v6131_v36 }
 0x60a   :  { %2171 = vmatprep.subr.bf16.mxu0 %v6176_v39  ;;  %2212 = vmatprep.subr.bf16.mxu1 %v6177_v42 }
 0x60d   :  { %2172 = vmatpush2.bf16.msra.mxu0 %v6178_v43  ;;  %2213 = vmatpush2.bf16.msra.mxu1 %v6179_v44  ;;  %v6205_v44 = vld [vmem:[#allocation20_spill] sm:$0xff] }
 0x60e   :  { %2173 = vmatprep.subr.bf16.mxu0 %v6180_v45  ;;  %2214 = vmatprep.subr.bf16.mxu1 %v6181_v46 }
 0x611   :  { %2174 = vmatpush2.bf16.msra.mxu0 %v6182_v6  ;;  %2215 = vmatpush2.bf16.msra.mxu1 %v6183_v47 }
 0x612   :  { %2175 = vmatprep.subr.bf16.mxu0 %v6184_v48  ;;  %2216 = vmatprep.subr.bf16.mxu1 %v6185_v22 }
 0x615   :  { %2176 = vmatpush2.bf16.msra.mxu0 %v6186_v12  ;;  %2217 = vmatpush2.bf16.msra.mxu1 %v6187_v5  ;;  %v6206_v5 = vld [vmem:[#allocation87_spill] sm:$0xff] }
 0x616   :  { %2177 = vmatprep.subr.bf16.mxu0 %v6188_v62  ;;  %2218 = vmatprep.subr.bf16.mxu1 %v6189_v31 }
 0x619   :  { %2178 = vmatpush2.bf16.msra.mxu0 %v6190_v59  ;;  %2219 = vmatpush2.bf16.msra.mxu1 %v6191_v1 }
 0x61a   :  { %2179 = vmatprep.subr.bf16.mxu0 %v6192_v3  ;;  %2220 = vmatprep.subr.bf16.mxu1 %v6193_v7 }
 0x61d   :  { %2180 = vmatpush2.bf16.msra.mxu0 %v6194_v13  ;;  %2221 = vmatpush2.bf16.msra.mxu1 %v6195_v2  ;;  %v6207_v13 = vld [vmem:[#allocation89_spill] sm:$0xff] }
 0x61e   :  { %2181 = vmatprep.subr.bf16.mxu0 %v6196_v4  ;;  %2222 = vmatprep.subr.bf16.mxu1 %v6197_v58 }
 0x621   :  { %2182 = vmatpush2.bf16.msra.mxu0 %v6198_v60  ;;  %2223 = vmatpush2.bf16.msra.mxu1 %v6199_v0 }
 0x622   :  { %2257 = vmatprep.subr.bf16.mxu0 %v6200_v61  ;;  %2298 = vmatprep.subr.bf16.mxu1 %v6201_v56 }
 0x684   :  { %v1967_v9 = vpop.f32.mrf.mxu0  ;;  %v2008_v63 = vpop.f32.mrf.mxu1 }
 0x685   :  { %v1968_v8 = vadd.f32 %v1967_v9, %v6202_v10  ;;  %v2009_v45 = vadd.f32 %v2008_v63, %v6205_v44 }
 0x686   :  { %v1969_v19 = vpop.f32.mrf.mxu0  ;;  %v2010_v38 = vpop.f32.mrf.mxu1 }
 0x687   :  { %v2968_v25 = vmul.f32 -1.442695, %v1968_v8  ;;  %v1970_v27 = vadd.f32 %v1969_v19, %v6203_v26  ;;  %v2011_v39 = vadd.f32 %v2010_v38, %v6204_v18 }
 0x688   :  { %v1971_v28 = vpop.f32.mrf.mxu0  ;;  %v2012_v29 = vpop.f32.mrf.mxu1 }
 0x689   :  { %3351 = vpow2.f32 %v2968_v25  ;;  %v2969_v33 = vmul.f32 -1.442695, %v1970_v27  ;;  %v2970_v42 = vmul.f32 -1.442695, %v2011_v39  ;;  %v6208_v27 = vld [vmem:[#allocation90_spill] sm:$0xff]  ;;  %v6209_v29 = vld [vmem:[#allocation88_spill] sm:$0xff] }
 0x68a   :  { %v1972_v34 = vpop.f32.mrf.mxu0  ;;  %v2013_v36 = vpop.f32.mrf.mxu1 }
 0x68b   :  { %3353 = vpow2.f32 %v2969_v33 }
 0x68c   :  { %3355 = vpow2.f32 %v2970_v42 }
 0x696   :  { %v3352_v43 = vpop.eup %3351 }
 0x697   :  { %v2018_v46 = vadd.f32 1.0, %v3352_v43 }
 0x698   :  { %v3354_v6 = vpop.eup %3353 }
 0x699   :  { %3357 = vrcp.f32 %v2018_v46  ;;  %v2024_v47 = vadd.f32 1.0, %v3354_v6  ;;  %v3356_v12 = vpop.eup %3355 }
 0x69a   :  { %3359 = vtanh.f32 %v2009_v45  ;;  %v2031_v58 = vadd.f32 1.0, %v3356_v12 }
 0x69b   :  { %3361 = vrcp.f32 %v2024_v47 }
 0x6a4   :  { %v2073_v48 = vpop.f32.mrf.mxu0  ;;  %v2114_v22 = vpop.f32.mrf.mxu1 }
 0x6a5   :  { %v2121_v62 = vadd.f32 %v2073_v48, %v6206_v5  ;;  %v2123_v33 = vadd.f32 %v2114_v22, %v6209_v29  ;;  %v5161_v29 = vld [vmem:[#allocation7 + $0xe8] ss:$16 sps:$4 sm:$0xff]  }
 0x6a6   :  { %v3358_v31 = vpop.eup %3357  ;;  %v2075_v59 = vpop.f32.mrf.mxu0 }
 0x6a7   :  { %v2116_v1 = vpop.f32.mrf.mxu1  ;;  %v3360_v3 = vpop.eup %3359  ;;  %v2971_v7 = vmul.f32 -1.442695, %v2121_v62  ;;  %v2122_v2 = vadd.f32 %v2075_v59, %v6207_v13 }
 0x6a8   :  { %v3362_v4 = vpop.eup %3361  ;;  %v2077_v60 = vpop.f32.mrf.mxu0  ;;  %v2035_v9 = vmul.f32 %v3360_v3, %v3358_v31  ;;  %v2124_v28 = vadd.f32 %v2116_v1, %v6208_v27  ;;  %v5155_v27 = vld [vmem:[#allocation7 + $0xec] ss:$16 sps:$4 sm:$0xff]  }
 0x6a9   :  { %v2118_v0 = vpop.f32.mrf.mxu1  ;;  %v2034_v63 = vmul.f32 %v3362_v4, %v4931_v32  ;;  %3363 = vpow2.f32 %v2971_v7  ;;  %v2972_v8 = vmul.f32 -1.442695, %v2122_v2  ;;  %v6211_v2 = vld [vmem:[#allocation28_spill] sm:$0xff]  ;;  %v6212_v4 = vld [vmem:[#allocation29_spill] sm:$0xff]  ;;  %v6214_v60 = vld [vmem:[#allocation79_spill] sm:$0xff] }
 0x6aa   :  { %v2078_v19 = vpop.f32.mrf.mxu0  ;;  %v2973_v34 = vmul.f32 -1.442695, %v2124_v28  ;;  %v6215_v0 = vld [vmem:[#allocation81_spill] sm:$0xff]  ;;  %v5158_v28 = vld [vmem:[#allocation7 + $0xe0] ss:$16 sps:$4 sm:$0xff]  }
 0x6ab   :  { %v2119_v38 = vpop.f32.mrf.mxu1  ;;  %3365 = vpow2.f32 %v2972_v8  ;;  %v5111_v25 = vadd.f32 %v2035_v9, %v2034_v63  ;;  %v6216_v9 = vld [vmem:[#allocation82_spill] sm:$0xff]  ;;  %v6217_v63 = vld [vmem:[#allocation80_spill] sm:$0xff]  ;;  %v6218_v8 = vld [vmem:[#allocation31_spill] sm:$0xff] }
 0x6ac   :  { %3367 = vrcp.f32 %v2031_v58  ;;  %v6213_v58 = vld [vmem:[#allocation30_spill] sm:$0xff]  ;;  %v6219_v19 = vld [vmem:[#allocation32_spill] sm:$0xff] }
 0x6ad   :  { %3369 = vtanh.f32 %v5111_v25  ;;  %v5152_v38 = vld [vmem:[#allocation7 + $0xe4] ss:$16 sps:$4 sm:$0xff]  }
 0x6ae   :  { %3371 = vtanh.f32 %v2123_v33  ;;  %v5164_v33 = vld [vmem:[#allocation7 + $0xc4] ss:$16 sps:$4 sm:$0xff]  }
 0x6af   :  { %3373 = vpow2.f32 %v2973_v34  ;;  %v5167_v34 = vld [vmem:[#allocation7 + $0xcc] ss:$16 sps:$4 sm:$0xff]  }
 0x6b6   :  { %v3364_v36 = vpop.eup %3363 }
 0x6b7   :  { %v2128_v39 = vadd.f32 1.0, %v3364_v36  ;;  %v5170_v36 = vld [vmem:[#allocation7 + $0xc0] ss:$16 sps:$4 sm:$0xff]  }
 0x6b8   :  { %v3366_v42 = vpop.eup %3365 }
 0x6b9   :  { %v3368_v32 = vpop.eup %3367  ;;  %3375 = vrcp.f32 %v2128_v39  ;;  %v2134_v43 = vadd.f32 1.0, %v3366_v42  ;;  %v5173_v39 = vld [vmem:[#allocation7 + $0xc8] ss:$16 sps:$4 sm:$0xff]   ;;  %v5176_v42 = vld [vmem:[#allocation7 + $0xa4] ss:$16 sps:$4 sm:$0xff]  }
 0x6ba   :  { %v3370_v45 = vpop.eup %3369 }
 0x6bb   :  { %3377 = vrcp.f32 %v2134_v43  ;;  %v2038_v46 = vmul.f32 %v3370_v45, %v3368_v32  ;;  %v3372_v47 = vpop.eup %3371  ;;  %v5179_v32 = vld [vmem:[#allocation7 + $0xac] ss:$16 sps:$4 sm:$0xff]   ;;  %v5182_v43 = vld [vmem:[#allocation7 + $0xa0] ss:$16 sps:$4 sm:$0xff]   ;;  %v5185_v45 = vld [vmem:[#allocation7 + $0xa8] ss:$16 sps:$4 sm:$0xff]  }
 0x6bc   :  { %v3374_v48 = vpop.eup %3373  ;;  %6220 = vst [vmem:[#allocation33_spill] sm:$0xff] %v5182_v43  ;;  %6221 = vst [vmem:[#allocation34_spill] sm:$0xff] %v5185_v45 }
 0x6bd   :  { %v2150_v6 = vpack.c.bf16 %v2038_v46, %v2038_v46  ;;  %v2141_v62 = vadd.f32 1.0, %v3374_v48  ;;  %v5188_v46 = vld [vmem:[#allocation7 + $0x84] ss:$16 sps:$4 sm:$0xff]   ;;  %v5197_v48 = vld [vmem:[#allocation7 + $0x88] ss:$16 sps:$4 sm:$0xff]  }
 0x6be   :  { %6222 = vst [vmem:[#allocation35_spill] sm:$0xff] %v5188_v46  ;;  %6225 = vst [vmem:[#allocation38_spill] sm:$0xff] %v5197_v48 }
 0x6bf   :  { %2183 = vmatprep.mubr.bf16.mxu0 %v2150_v6  ;;  %2224 = vmatprep.mubr.bf16.mxu1 %v2150_v6  ;;  %3379 = vrcp.f32 %v2141_v62  ;;  %v5191_v6 = vld [vmem:[#allocation7 + $0x8c] ss:$16 sps:$4 sm:$0xff]   ;;  %v5209_v62 = vld [vmem:[#allocation7 + $0x68] ss:$16 sps:$4 sm:$0xff]  }
 0x6c0   :  { %6223 = vst [vmem:[#allocation36_spill] sm:$0xff] %v5191_v6  ;;  %6229 = vst [vmem:[#allocation42_spill] sm:$0xff] %v5209_v62 }
 0x6c6   :  { %v3376_v12 = vpop.eup %3375 }
 0x6c7   :  { %v2145_v5 = vmul.f32 %v3376_v12, %v3372_v47  ;;  %v5194_v47 = vld [vmem:[#allocation7 + $0x80] ss:$16 sps:$4 sm:$0xff]   ;;  %v5200_v12 = vld [vmem:[#allocation7 + $0x64] ss:$16 sps:$4 sm:$0xff]  }
 0x6c8   :  { %v3378_v22 = vpop.eup %3377  ;;  %6224 = vst [vmem:[#allocation37_spill] sm:$0xff] %v5194_v47  ;;  %6226 = vst [vmem:[#allocation39_spill] sm:$0xff] %v5200_v12 }
 0x6c9   :  { %v2144_v31 = vmul.f32 %v3378_v22, %v4937_v57  ;;  %v6210_v57 = vld [vmem:[#allocation27_spill] sm:$0xff]  ;;  %v5206_v22 = vld [vmem:[#allocation7 + $0x60] ss:$16 sps:$4 sm:$0xff]  }
 0x6ca   :  { %6228 = vst [vmem:[#allocation41_spill] sm:$0xff] %v5206_v22 }
 0x6cb   :  { %v5117_v59 = vadd.f32 %v2145_v5, %v2144_v31  ;;  %v5203_v5 = vld [vmem:[#allocation7 + $0x6c] ss:$16 sps:$4 sm:$0xff]   ;;  %v5212_v31 = vld [vmem:[#allocation7 + $0x44] ss:$16 sps:$4 sm:$0xff]  }
 0x6cc   :  { %v3380_v1 = vpop.eup %3379  ;;  %6227 = vst [vmem:[#allocation40_spill] sm:$0xff] %v5203_v5  ;;  %6230 = vst [vmem:[#allocation43_spill] sm:$0xff] %v5212_v31 }
 0x6cd   :  { %3381 = vtanh.f32 %v5117_v59 }
 0x6da   :  { %v3382_v3 = vpop.eup %3381 }
 0x6db   :  { %v2148_v7 = vmul.f32 %v3382_v3, %v3380_v1  ;;  %v5215_v1 = vld [vmem:[#allocation7 + $0x4c] ss:$16 sps:$4 sm:$0xff]   ;;  %v5218_v3 = vld [vmem:[#allocation7 + $0x40] ss:$16 sps:$4 sm:$0xff]  }
 0x6dc   :  { %6231 = vst [vmem:[#allocation44_spill] sm:$0xff] %v5215_v1  ;;  %6232 = vst [vmem:[#allocation45_spill] sm:$0xff] %v5218_v3 }
 0x6dd   :  { %v2149_v13 = vpack.c.bf16 %v2148_v7, %v2148_v7  ;;  %v5221_v7 = vld [vmem:[#allocation7 + $0x48] ss:$16 sps:$4 sm:$0xff]  }
 0x6de   :  { %6233 = vst [vmem:[#allocation70_spill] sm:$0xff] %v5221_v7 }
 0x6df   :  { %2184 = vmatmul.mubr.bf16.vlgmr.msra.gmra.mxu0 %v2149_v13  ;;  %2225 = vmatmul.mubr.bf16.vlgmr.msra.gmra.mxu1 %v2149_v13 }
 0x6e0   :  { %2258 = vmatpush1.bf16.msra.mxu0 %v4944_v30  ;;  %2299 = vmatpush1.bf16.msra.mxu1 %v4947_v50 }
 0x6e1   :  { %2259 = vmatprep.subr.bf16.mxu0 %v4950_v24  ;;  %2300 = vmatprep.subr.bf16.mxu1 %v4953_v20 }
 0x6e2   :  { %2289 = vmatprep.mubr.bf16.mxu0 %v5919_v11  ;;  %2330 = vmatprep.mubr.bf16.mxu1 %v5919_v11 }
 0x6e4   :  { %2260 = vmatpush1.bf16.msra.mxu0 %v4958_v40  ;;  %2301 = vmatpush1.bf16.msra.mxu1 %v4961_v55 }
 0x6e5   :  { %2261 = vmatprep.subr.bf16.mxu0 %v4964_v21  ;;  %2302 = vmatprep.subr.bf16.mxu1 %v4967_v23 }
 0x6e8   :  { %2262 = vmatpush1.bf16.msra.mxu0 %v4970_v17  ;;  %2303 = vmatpush1.bf16.msra.mxu1 %v4973_v52 }
 0x6e9   :  { %2263 = vmatprep.subr.bf16.mxu0 %v4976_v53  ;;  %2304 = vmatprep.subr.bf16.mxu1 %v4979_v51 }
 0x6ec   :  { %2264 = vmatpush1.bf16.msra.mxu0 %v4982_v54  ;;  %2305 = vmatpush1.bf16.msra.mxu1 %v4985_v37 }
 0x6ed   :  { %2265 = vmatprep.subr.bf16.mxu0 %v6210_v57  ;;  %2306 = vmatprep.subr.bf16.mxu1 %v6211_v2 }
 0x6f0   :  { %2266 = vmatpush1.bf16.msra.mxu0 %v6212_v4  ;;  %2307 = vmatpush1.bf16.msra.mxu1 %v6213_v58 }
 0x6f1   :  { %2267 = vmatprep.subr.bf16.mxu0 %v6214_v60  ;;  %2308 = vmatprep.subr.bf16.mxu1 %v6215_v0 }
 0x6f4   :  { %2268 = vmatpush1.bf16.msra.mxu0 %v6216_v9  ;;  %2309 = vmatpush1.bf16.msra.mxu1 %v6217_v63 }
 0x6f5   :  { %2269 = vmatprep.subr.bf16.mxu0 %v6218_v8  ;;  %2310 = vmatprep.subr.bf16.mxu1 %v6219_v19 }
 0x6f8   :  { %2270 = vmatpush1.bf16.msra.mxu0 %v5018_v41  ;;  %2311 = vmatpush1.bf16.msra.mxu1 %v5021_v49 }
 0x6f9   :  { %2271 = vmatprep.subr.bf16.mxu0 %v5024_v35  ;;  %2312 = vmatprep.subr.bf16.mxu1 %v5027_v15 }
 0x6fc   :  { %2272 = vmatpush1.bf16.msra.mxu0 %v5030_v14  ;;  %2313 = vmatpush1.bf16.msra.mxu1 %v5033_v16 }
 0x6fd   :  { %2369 = vmatprep.subr.bf16.mxu0 %v5152_v38  ;;  %2410 = vmatprep.subr.bf16.mxu1 %v5155_v27 }
 0x6ff   :  { %2290 = vmatmul.mubr.bf16.vlgmr.msra.gmra.mxu0 %v2149_v13  ;;  %2331 = vmatmul.mubr.bf16.vlgmr.msra.gmra.mxu1 %v2149_v13  ;;  %v5224_v13 = vld [vmem:[#allocation7 + $0x24] ss:$16 sps:$4 sm:$0xff]  }
 0x700   :  { %2370 = vmatpush1.bf16.msra.mxu0 %v5158_v28  ;;  %2411 = vmatpush1.bf16.msra.mxu1 %v5161_v29  ;;  %6234 = vst [vmem:[#allocation71_spill] sm:$0xff] %v5224_v13 }
 0x701   :  { %2371 = vmatprep.subr.bf16.mxu0 %v5164_v33  ;;  %2412 = vmatprep.subr.bf16.mxu1 %v5167_v34 }
 0x704   :  { %2372 = vmatpush1.bf16.msra.mxu0 %v5170_v36  ;;  %2413 = vmatpush1.bf16.msra.mxu1 %v5173_v39 }
 0x705   :  { %2373 = vmatprep.subr.bf16.mxu0 %v5176_v42  ;;  %2414 = vmatprep.subr.bf16.mxu1 %v5179_v32 }
 0x708   :  { %2374 = vmatpush1.bf16.msra.mxu0 %v5182_v43  ;;  %2415 = vmatpush1.bf16.msra.mxu1 %v5185_v45 }
 0x709   :  { %2375 = vmatprep.subr.bf16.mxu0 %v5188_v46  ;;  %2416 = vmatprep.subr.bf16.mxu1 %v5191_v6 }
 0x70c   :  { %2376 = vmatpush1.bf16.msra.mxu0 %v5194_v47  ;;  %2417 = vmatpush1.bf16.msra.mxu1 %v5197_v48 }
 0x70d   :  { %2377 = vmatprep.subr.bf16.mxu0 %v5200_v12  ;;  %2418 = vmatprep.subr.bf16.mxu1 %v5203_v5 }
 0x710   :  { %2378 = vmatpush1.bf16.msra.mxu0 %v5206_v22  ;;  %2419 = vmatpush1.bf16.msra.mxu1 %v5209_v62  ;;  %v5227_v62 = vld [vmem:[#allocation7 + $0x2c] ss:$16 sps:$4 sm:$0xff]  }
 0x711   :  { %2379 = vmatprep.subr.bf16.mxu0 %v5212_v31  ;;  %2420 = vmatprep.subr.bf16.mxu1 %v5215_v1  ;;  %6235 = vst [vmem:[#allocation73_spill] sm:$0xff] %v5227_v62  ;;  %v5230_v31 = vld [vmem:[#allocation7 + $0x20] ss:$16 sps:$4 sm:$0xff]   ;;  %v5233_v1 = vld [vmem:[#allocation7 + $0x28] ss:$16 sps:$4 sm:$0xff]  }
 0x712   :  { %6236 = vst [vmem:[#allocation74_spill] sm:$0xff] %v5230_v31  ;;  %6237 = vst [vmem:[#allocation72_spill] sm:$0xff] %v5233_v1 }
 0x714   :  { %2380 = vmatpush1.bf16.msra.mxu0 %v5218_v3  ;;  %2421 = vmatpush1.bf16.msra.mxu1 %v5221_v7  ;;  %v5236_v3 = vld [vmem:[#allocation7 + $0x4] ss:$16 sps:$4 sm:$0xff]   ;;  %v5239_v7 = vld [vmem:[#allocation7 + $0xc] ss:$16 sps:$4 sm:$0xff]  }
 0x715   :  { %2381 = vmatprep.subr.bf16.mxu0 %v5224_v13  ;;  %2422 = vmatprep.subr.bf16.mxu1 %v5227_v62  ;;  %6238 = vst [vmem:[#allocation46_spill] sm:$0xff] %v5236_v3  ;;  %6239 = vst [vmem:[#allocation47_spill] sm:$0xff] %v5239_v7  ;;  %v5242_v13 = vld [vmem:[#allocation7] ss:$16 sps:$4 sm:$0xff]   ;;  %v5245_v62 = vld [vmem:[#allocation7 + $0x8] ss:$16 sps:$4 sm:$0xff]  }
 0x716   :  { %6240 = vst [vmem:[#allocation48_spill] sm:$0xff] %v5242_v13  ;;  %6241 = vst [vmem:[#allocation49_spill] sm:$0xff] %v5245_v62 }
 0x718   :  { %2382 = vmatpush1.bf16.msra.mxu0 %v5230_v31  ;;  %2423 = vmatpush1.bf16.msra.mxu1 %v5233_v1  ;;  %v5248_v31 = vld [vmem:[#allocation7 + $0x1e4] ss:$16 sps:$4 sm:$0xff]   ;;  %v5251_v1 = vld [vmem:[#allocation7 + $0x1ec] ss:$16 sps:$4 sm:$0xff]  }
 0x719   :  { %2383 = vmatprep.subr.bf16.mxu0 %v5236_v3  ;;  %2424 = vmatprep.subr.bf16.mxu1 %v5239_v7  ;;  %6242 = vst [vmem:[#allocation50_spill] sm:$0xff] %v5248_v31  ;;  %6243 = vst [vmem:[#allocation51_spill] sm:$0xff] %v5251_v1  ;;  %v5254_v3 = vld [vmem:[#allocation7 + $0x1e0] ss:$16 sps:$4 sm:$0xff]   ;;  %v5257_v7 = vld [vmem:[#allocation7 + $0x1e8] ss:$16 sps:$4 sm:$0xff]  }
 0x71a   :  { %6244 = vst [vmem:[#allocation52_spill] sm:$0xff] %v5254_v3  ;;  %6245 = vst [vmem:[#allocation53_spill] sm:$0xff] %v5257_v7 }
 0x71c   :  { %2384 = vmatpush1.bf16.msra.mxu0 %v5242_v13  ;;  %2425 = vmatpush1.bf16.msra.mxu1 %v5245_v62  ;;  %v5260_v13 = vld [vmem:[#allocation7 + $0x1c4] ss:$16 sps:$4 sm:$0xff]   ;;  %v5263_v62 = vld [vmem:[#allocation7 + $0x1cc] ss:$16 sps:$4 sm:$0xff]  }
 0x71d   :  { %2385 = vmatprep.subr.bf16.mxu0 %v5248_v31  ;;  %2426 = vmatprep.subr.bf16.mxu1 %v5251_v1  ;;  %6246 = vst [vmem:[#allocation54_spill] sm:$0xff] %v5260_v13  ;;  %6247 = vst [vmem:[#allocation55_spill] sm:$0xff] %v5263_v62  ;;  %v5266_v31 = vld [vmem:[#allocation7 + $0x1c0] ss:$16 sps:$4 sm:$0xff]   ;;  %v5269_v1 = vld [vmem:[#allocation7 + $0x1c8] ss:$16 sps:$4 sm:$0xff]  }
 0x71e   :  { %6248 = vst [vmem:[#allocation83_spill] sm:$0xff] %v5266_v31  ;;  %6249 = vst [vmem:[#allocation85_spill] sm:$0xff] %v5269_v1 }
 0x720   :  { %2386 = vmatpush2.bf16.msra.mxu0 %v5254_v3  ;;  %2427 = vmatpush2.bf16.msra.mxu1 %v5257_v7  ;;  %v5272_v3 = vld [vmem:[#allocation7 + $0x1a4] ss:$16 sps:$4 sm:$0xff]   ;;  %v5275_v7 = vld [vmem:[#allocation7 + $0x1ac] ss:$16 sps:$4 sm:$0xff]  }
 0x721   :  { %2387 = vmatprep.subr.bf16.mxu0 %v5260_v13  ;;  %2428 = vmatprep.subr.bf16.mxu1 %v5263_v62  ;;  %6250 = vst [vmem:[#allocation86_spill] sm:$0xff] %v5272_v3  ;;  %6251 = vst [vmem:[#allocation84_spill] sm:$0xff] %v5275_v7  ;;  %v5278_v13 = vld [vmem:[#allocation7 + $0x1a0] ss:$16 sps:$4 sm:$0xff]   ;;  %v5281_v62 = vld [vmem:[#allocation7 + $0x1a8] ss:$16 sps:$4 sm:$0xff]  }
 0x722   :  { %6252 = vst [vmem:[#allocation56_spill] sm:$0xff] %v5278_v13  ;;  %6253 = vst [vmem:[#allocation57_spill] sm:$0xff] %v5281_v62 }
 0x724   :  { %2388 = vmatpush2.bf16.msra.mxu0 %v5266_v31  ;;  %2429 = vmatpush2.bf16.msra.mxu1 %v5269_v1  ;;  %v5284_v31 = vld [vmem:[#allocation7 + $0x184] ss:$16 sps:$4 sm:$0xff]   ;;  %v5287_v1 = vld [vmem:[#allocation7 + $0x18c] ss:$16 sps:$4 sm:$0xff]  }
 0x725   :  { %2389 = vmatprep.subr.bf16.mxu0 %v5272_v3  ;;  %2430 = vmatprep.subr.bf16.mxu1 %v5275_v7  ;;  %6254 = vst [vmem:[#allocation58_spill] sm:$0xff] %v5284_v31  ;;  %6255 = vst [vmem:[#allocation59_spill] sm:$0xff] %v5287_v1  ;;  %v5290_v3 = vld [vmem:[#allocation7 + $0x180] ss:$16 sps:$4 sm:$0xff]   ;;  %v5293_v7 = vld [vmem:[#allocation7 + $0x188] ss:$16 sps:$4 sm:$0xff]  }
 0x726   :  { %6256 = vst [vmem:[#allocation60_spill] sm:$0xff] %v5290_v3  ;;  %6257 = vst [vmem:[#allocation61_spill] sm:$0xff] %v5293_v7 }
 0x728   :  { %2390 = vmatpush2.bf16.msra.mxu0 %v5278_v13  ;;  %2431 = vmatpush2.bf16.msra.mxu1 %v5281_v62  ;;  %v5296_v13 = vld [vmem:[#allocation7 + $0x164] ss:$16 sps:$4 sm:$0xff]   ;;  %v5299_v62 = vld [vmem:[#allocation7 + $0x16c] ss:$16 sps:$4 sm:$0xff]  }
 0x729   :  { %2391 = vmatprep.subr.bf16.mxu0 %v5284_v31  ;;  %2432 = vmatprep.subr.bf16.mxu1 %v5287_v1  ;;  %6258 = vst [vmem:[#allocation62_spill] sm:$0xff] %v5296_v13  ;;  %6259 = vst [vmem:[#allocation63_spill] sm:$0xff] %v5299_v62  ;;  %v5302_v31 = vld [vmem:[#allocation7 + $0x160] ss:$16 sps:$4 sm:$0xff]   ;;  %v5305_v1 = vld [vmem:[#allocation7 + $0x168] ss:$16 sps:$4 sm:$0xff]  }
 0x72a   :  { %6260 = vst [vmem:[#allocation64_spill] sm:$0xff] %v5302_v31  ;;  %6261 = vst [vmem:[#allocation65_spill] sm:$0xff] %v5305_v1 }
 0x72c   :  { %2392 = vmatpush2.bf16.msra.mxu0 %v5290_v3  ;;  %2433 = vmatpush2.bf16.msra.mxu1 %v5293_v7  ;;  %v5308_v3 = vld [vmem:[#allocation7 + $0x144] ss:$16 sps:$4 sm:$0xff]   ;;  %v5311_v7 = vld [vmem:[#allocation7 + $0x14c] ss:$16 sps:$4 sm:$0xff]  }
 0x72d   :  { %2393 = vmatprep.subr.bf16.mxu0 %v5296_v13  ;;  %2434 = vmatprep.subr.bf16.mxu1 %v5299_v62  ;;  %6262 = vst [vmem:[#allocation66_spill] sm:$0xff] %v5308_v3  ;;  %6263 = vst [vmem:[#allocation67_spill] sm:$0xff] %v5311_v7  ;;  %v5314_v13 = vld [vmem:[#allocation7 + $0x140] ss:$16 sps:$4 sm:$0xff]   ;;  %v5317_v62 = vld [vmem:[#allocation7 + $0x148] ss:$16 sps:$4 sm:$0xff]  }
 0x72e   :  { %6264 = vst [vmem:[#allocation68_spill] sm:$0xff] %v5314_v13  ;;  %6265 = vst [vmem:[#allocation69_spill] sm:$0xff] %v5317_v62 }
 0x730   :  { %2394 = vmatpush2.bf16.msra.mxu0 %v5302_v31  ;;  %2435 = vmatpush2.bf16.msra.mxu1 %v5305_v1  ;;  %v5320_v31 = vld [vmem:[#allocation7 + $0x124] ss:$16 sps:$4 sm:$0xff]   ;;  %v5323_v1 = vld [vmem:[#allocation7 + $0x12c] ss:$16 sps:$4 sm:$0xff]  }
 0x731   :  { %2395 = vmatprep.subr.bf16.mxu0 %v5308_v3  ;;  %2436 = vmatprep.subr.bf16.mxu1 %v5311_v7  ;;  %6266 = vst [vmem:[#allocation15_spill] sm:$0xff] %v5320_v31  ;;  %6267 = vst [vmem:[#allocation16_spill] sm:$0xff] %v5323_v1  ;;  %v5326_v3 = vld [vmem:[#allocation7 + $0x120] ss:$16 sps:$4 sm:$0xff]   ;;  %v5329_v7 = vld [vmem:[#allocation7 + $0x128] ss:$16 sps:$4 sm:$0xff]  }
 0x732   :  { %6268 = vst [vmem:[#allocation75_spill] sm:$0xff] %v5326_v3  ;;  %6269 = vst [vmem:[#allocation77_spill] sm:$0xff] %v5329_v7 }
 0x734   :  { %2396 = vmatpush2.bf16.msra.mxu0 %v5314_v13  ;;  %2437 = vmatpush2.bf16.msra.mxu1 %v5317_v62  ;;  %v5332_v13 = vld [vmem:[#allocation7 + $0x104] ss:$16 sps:$4 sm:$0xff]   ;;  %v5335_v62 = vld [vmem:[#allocation7 + $0x10c] ss:$16 sps:$4 sm:$0xff]  }
 0x735   :  { %2397 = vmatprep.subr.bf16.mxu0 %v5320_v31  ;;  %2438 = vmatprep.subr.bf16.mxu1 %v5323_v1  ;;  %6270 = vst [vmem:[#allocation78_spill] sm:$0xff] %v5332_v13  ;;  %6271 = vst [vmem:[#allocation76_spill] sm:$0xff] %v5335_v62  ;;  %v5338_v31 = vld [vmem:[#allocation7 + $0x100] ss:$16 sps:$4 sm:$0xff]   ;;  %v5341_v1 = vld [vmem:[#allocation7 + $0x108] ss:$16 sps:$4 sm:$0xff]  }
 0x736   :  { %6272 = vst [vmem:[#allocation21_spill] sm:$0xff] %v5338_v31  ;;  %6273 = vst [vmem:[#allocation22_spill] sm:$0xff] %v5341_v1 }
 0x738   :  { %2398 = vmatpush2.bf16.msra.mxu0 %v5326_v3  ;;  %2439 = vmatpush2.bf16.msra.mxu1 %v5329_v7 }
 0x739   :  { %2399 = vmatprep.subr.bf16.mxu0 %v5332_v13  ;;  %2440 = vmatprep.subr.bf16.mxu1 %v5335_v62 }
 0x73c   :  { %2400 = vmatpush2.bf16.msra.mxu0 %v5338_v31  ;;  %2441 = vmatpush2.bf16.msra.mxu1 %v5341_v1 }
 0x73d   :  { %2475 = vmatprep.subr.bf16.mxu0 %v6200_v61  ;;  %2516 = vmatprep.subr.bf16.mxu1 %v6201_v56 }
 0x79f   :  { %v2185_v7 = vpop.f32.mrf.mxu0  ;;  %v2226_v3 = vpop.f32.mrf.mxu1 }
 0x7a0   :  { %v2186_v13 = vadd.f32 %v2185_v7, %v6202_v10  ;;  %v2227_v45 = vadd.f32 %v2226_v3, %v6205_v44 }
 0x7a1   :  { %v2187_v22 = vpop.f32.mrf.mxu0  ;;  %v2228_v5 = vpop.f32.mrf.mxu1 }
 0x7a2   :  { %v2974_v12 = vmul.f32 -1.442695, %v2186_v13  ;;  %v2188_v62 = vadd.f32 %v2187_v22, %v6203_v26  ;;  %v2229_v61 = vadd.f32 %v2228_v5, %v6204_v18  ;;  %v6274_v22 = vld [vmem:[#allocation91_spill] sm:$0xff]  ;;  %v6275_v18 = vld [vmem:[#allocation93_spill] sm:$0xff] }
 0x7a3   :  { %v2189_v48 = vpop.f32.mrf.mxu0  ;;  %v2230_v47 = vpop.f32.mrf.mxu1 }
 0x7a4   :  { %3383 = vpow2.f32 %v2974_v12  ;;  %v2975_v31 = vmul.f32 -1.442695, %v2188_v62  ;;  %v2976_v1 = vmul.f32 -1.442695, %v2229_v61 }
 0x7a5   :  { %v2190_v6 = vpop.f32.mrf.mxu0  ;;  %v2231_v46 = vpop.f32.mrf.mxu1 }
 0x7a6   :  { %3385 = vpow2.f32 %v2975_v31 }
 0x7a7   :  { %3387 = vpow2.f32 %v2976_v1 }
 0x7b1   :  { %v3384_v56 = vpop.eup %3383 }
 0x7b2   :  { %v2236_v43 = vadd.f32 1.0, %v3384_v56 }
 0x7b3   :  { %v3386_v7 = vpop.eup %3385 }
 0x7b4   :  { %3389 = vrcp.f32 %v2236_v43  ;;  %v2242_v13 = vadd.f32 1.0, %v3386_v7  ;;  %v3388_v12 = vpop.eup %3387 }
 0x7b5   :  { %3391 = vtanh.f32 %v2227_v45  ;;  %v2249_v56 = vadd.f32 1.0, %v3388_v12 }
 0x7b6   :  { %3393 = vrcp.f32 %v2242_v13 }
 0x7bf   :  { %v2291_v48 = vpop.f32.mrf.mxu0  ;;  %v2332_v47 = vpop.f32.mrf.mxu1 }
 0x7c0   :  { %v2339_v6 = vadd.f32 %v2291_v48, %v6274_v22  ;;  %v6276_v22 = vld [vmem:[#allocation94_spill] sm:$0xff] }
 0x7c1   :  { %v3390_v46 = vpop.eup %3389  ;;  %v2293_v62 = vpop.f32.mrf.mxu0 }
 0x7c2   :  { %v2334_v31 = vpop.f32.mrf.mxu1  ;;  %v3392_v5 = vpop.eup %3391  ;;  %v2977_v61 = vmul.f32 -1.442695, %v2339_v6  ;;  %v2340_v26 = vadd.f32 %v2293_v62, %v6275_v18  ;;  %v6277_v18 = vld [vmem:[#allocation92_spill] sm:$0xff] }
 0x7c3   :  { %v3394_v3 = vpop.eup %3393  ;;  %v2295_v44 = vpop.f32.mrf.mxu0  ;;  %v2253_v43 = vmul.f32 %v3392_v5, %v3390_v46  ;;  %v2342_v6 = vadd.f32 %v2334_v31, %v6276_v22  ;;  %v2341_v62 = vadd.f32 %v2332_v47, %v6277_v18 }
 0x7c4   :  { %v2336_v1 = vpop.f32.mrf.mxu1  ;;  %v2252_v45 = vmul.f32 %v3394_v3, %v5111_v25  ;;  %3395 = vpow2.f32 %v2977_v61  ;;  %v2978_v7 = vmul.f32 -1.442695, %v2340_v26 }
 0x7c5   :  { %v2296_v13 = vpop.f32.mrf.mxu0  ;;  %v2979_v12 = vmul.f32 -1.442695, %v2342_v6 }
 0x7c6   :  { %v2337_v10 = vpop.f32.mrf.mxu1  ;;  %3397 = vpow2.f32 %v2978_v7  ;;  %v5353_v48 = vadd.f32 %v2253_v43, %v2252_v45 }
 0x7c7   :  { %3399 = vrcp.f32 %v2249_v56 }
 0x7c8   :  { %3401 = vtanh.f32 %v5353_v48 }
 0x7c9   :  { %3403 = vtanh.f32 %v2341_v62 }
 0x7ca   :  { %3405 = vpow2.f32 %v2979_v12  ;;  %v6320_v12 = vld [vmem:[#allocation66_spill] sm:$0xff] }
 0x7d1   :  { %v3396_v44 = vpop.eup %3395 }
 0x7d2   :  { %v2346_v1 = vadd.f32 1.0, %v3396_v44  ;;  %v6321_v44 = vld [vmem:[#allocation67_spill] sm:$0xff] }
 0x7d3   :  { %v3398_v46 = vpop.eup %3397 }
 0x7d4   :  { %v3400_v25 = vpop.eup %3399  ;;  %3407 = vrcp.f32 %v2346_v1  ;;  %v2352_v26 = vadd.f32 1.0, %v3398_v46  ;;  %v6322_v1 = vld [vmem:[#allocation68_spill] sm:$0xff]  ;;  %v6323_v46 = vld [vmem:[#allocation69_spill] sm:$0xff] }
 0x7d5   :  { %v3402_v10 = vpop.eup %3401 }
 0x7d6   :  { %3409 = vrcp.f32 %v2352_v26  ;;  %v2256_v5 = vmul.f32 %v3402_v10, %v3400_v25  ;;  %v3404_v3 = vpop.eup %3403  ;;  %v6324_v25 = vld [vmem:[#allocation15_spill] sm:$0xff]  ;;  %v6325_v26 = vld [vmem:[#allocation16_spill] sm:$0xff] }
 0x7d7   :  { %v3406_v56 = vpop.eup %3405  ;;  %v6326_v10 = vld [vmem:[#allocation75_spill] sm:$0xff] }
 0x7d8   :  { %v2368_v61 = vpack.c.bf16 %v2256_v5, %v2256_v5  ;;  %v2359_v45 = vadd.f32 1.0, %v3406_v56  ;;  %v6327_v5 = vld [vmem:[#allocation77_spill] sm:$0xff] }
 0x7d9   :  { %v6330_v56 = vld [vmem:[#allocation21_spill] sm:$0xff] }
 0x7da   :  { %2401 = vmatprep.mubr.bf16.mxu0 %v2368_v61  ;;  %2442 = vmatprep.mubr.bf16.mxu1 %v2368_v61  ;;  %3411 = vrcp.f32 %v2359_v45  ;;  %v6328_v61 = vld [vmem:[#allocation78_spill] sm:$0xff]  ;;  %v6332_v45 = vld [vmem:[#allocation17_spill] sm:$0xff] }
 0x7e1   :  { %v3408_v31 = vpop.eup %3407 }
 0x7e2   :  { %v2363_v43 = vmul.f32 %v3408_v31, %v3404_v3  ;;  %v6329_v3 = vld [vmem:[#allocation76_spill] sm:$0xff]  ;;  %v6331_v31 = vld [vmem:[#allocation22_spill] sm:$0xff] }
 0x7e3   :  { %v3410_v47 = vpop.eup %3409 }
 0x7e4   :  { %v2362_v7 = vmul.f32 %v3410_v47, %v5117_v59  ;;  %v6299_v59 = vld [vmem:[#allocation49_spill] sm:$0xff] }
 0x7e6   :  { %v5359_v13 = vadd.f32 %v2363_v43, %v2362_v7 }
 0x7e7   :  { %v3412_v22 = vpop.eup %3411 }
 0x7e8   :  { %3413 = vtanh.f32 %v5359_v13 }
 0x7f5   :  { %v3414_v6 = vpop.eup %3413 }
 0x7f6   :  { %v2366_v18 = vmul.f32 %v3414_v6, %v3412_v22 }
 0x7f8   :  { %v2367_v62 = vpack.c.bf16 %v2366_v18, %v2366_v18 }
 0x7fa   :  { %2402 = vmatmul.mubr.bf16.vlgmr.msra.gmra.mxu0 %v2367_v62  ;;  %2443 = vmatmul.mubr.bf16.vlgmr.msra.gmra.mxu1 %v2367_v62 }
 0x7fb   :  { %2476 = vmatpush1.bf16.msra.mxu0 %v4944_v30  ;;  %2517 = vmatpush1.bf16.msra.mxu1 %v4947_v50  ;;  %v6279_v30 = vld [vmem:[#allocation34_spill] sm:$0xff]  ;;  %v6280_v50 = vld [vmem:[#allocation35_spill] sm:$0xff] }
 0x7fc   :  { %2477 = vmatprep.subr.bf16.mxu0 %v4950_v24  ;;  %2518 = vmatprep.subr.bf16.mxu1 %v4953_v20  ;;  %v6281_v24 = vld [vmem:[#allocation36_spill] sm:$0xff]  ;;  %v6282_v20 = vld [vmem:[#allocation37_spill] sm:$0xff] }
 0x7fd   :  { %2507 = vmatprep.mubr.bf16.mxu0 %v5919_v11  ;;  %2548 = vmatprep.mubr.bf16.mxu1 %v5919_v11  ;;  %v6278_v11 = vld [vmem:[#allocation33_spill] sm:$0xff] }
 0x7ff   :  { %2478 = vmatpush1.bf16.msra.mxu0 %v4958_v40  ;;  %2519 = vmatpush1.bf16.msra.mxu1 %v4961_v55  ;;  %v6283_v40 = vld [vmem:[#allocation38_spill] sm:$0xff]  ;;  %v6284_v55 = vld [vmem:[#allocation39_spill] sm:$0xff] }
 0x800   :  { %2479 = vmatprep.subr.bf16.mxu0 %v4964_v21  ;;  %2520 = vmatprep.subr.bf16.mxu1 %v4967_v23  ;;  %v6285_v21 = vld [vmem:[#allocation40_spill] sm:$0xff]  ;;  %v6286_v23 = vld [vmem:[#allocation41_spill] sm:$0xff] }
 0x803   :  { %2480 = vmatpush1.bf16.msra.mxu0 %v4970_v17  ;;  %2521 = vmatpush1.bf16.msra.mxu1 %v4973_v52  ;;  %v6287_v17 = vld [vmem:[#allocation42_spill] sm:$0xff]  ;;  %v6288_v52 = vld [vmem:[#allocation43_spill] sm:$0xff] }
 0x804   :  { %2481 = vmatprep.subr.bf16.mxu0 %v4976_v53  ;;  %2522 = vmatprep.subr.bf16.mxu1 %v4979_v51  ;;  %v6289_v53 = vld [vmem:[#allocation44_spill] sm:$0xff]  ;;  %v6290_v51 = vld [vmem:[#allocation45_spill] sm:$0xff] }
 0x807   :  { %2482 = vmatpush1.bf16.msra.mxu0 %v4982_v54  ;;  %2523 = vmatpush1.bf16.msra.mxu1 %v4985_v37  ;;  %v6291_v54 = vld [vmem:[#allocation70_spill] sm:$0xff]  ;;  %v6292_v37 = vld [vmem:[#allocation71_spill] sm:$0xff] }
 0x808   :  { %2483 = vmatprep.subr.bf16.mxu0 %v6210_v57  ;;  %2524 = vmatprep.subr.bf16.mxu1 %v6211_v2  ;;  %v6300_v57 = vld [vmem:[#allocation50_spill] sm:$0xff]  ;;  %v6301_v2 = vld [vmem:[#allocation51_spill] sm:$0xff] }
 0x80b   :  { %2484 = vmatpush1.bf16.msra.mxu0 %v6212_v4  ;;  %2525 = vmatpush1.bf16.msra.mxu1 %v6213_v58  ;;  %v6302_v4 = vld [vmem:[#allocation52_spill] sm:$0xff]  ;;  %v6303_v58 = vld [vmem:[#allocation53_spill] sm:$0xff] }
 0x80c   :  { %2485 = vmatprep.subr.bf16.mxu0 %v6214_v60  ;;  %2526 = vmatprep.subr.bf16.mxu1 %v6215_v0  ;;  %v6304_v60 = vld [vmem:[#allocation54_spill] sm:$0xff]  ;;  %v6305_v0 = vld [vmem:[#allocation55_spill] sm:$0xff] }
 0x80f   :  { %2486 = vmatpush1.bf16.msra.mxu0 %v6216_v9  ;;  %2527 = vmatpush1.bf16.msra.mxu1 %v6217_v63  ;;  %v6306_v9 = vld [vmem:[#allocation83_spill] sm:$0xff]  ;;  %v6307_v63 = vld [vmem:[#allocation85_spill] sm:$0xff] }
 0x810   :  { %2487 = vmatprep.subr.bf16.mxu0 %v6218_v8  ;;  %2528 = vmatprep.subr.bf16.mxu1 %v6219_v19  ;;  %v6308_v8 = vld [vmem:[#allocation86_spill] sm:$0xff]  ;;  %v6309_v19 = vld [vmem:[#allocation84_spill] sm:$0xff] }
 0x813   :  { %2488 = vmatpush1.bf16.msra.mxu0 %v5018_v41  ;;  %2529 = vmatpush1.bf16.msra.mxu1 %v5021_v49  ;;  %v6297_v41 = vld [vmem:[#allocation47_spill] sm:$0xff]  ;;  %v6298_v49 = vld [vmem:[#allocation48_spill] sm:$0xff] }
 0x814   :  { %2489 = vmatprep.subr.bf16.mxu0 %v5024_v35  ;;  %2530 = vmatprep.subr.bf16.mxu1 %v5027_v15  ;;  %v6293_v35 = vld [vmem:[#allocation73_spill] sm:$0xff]  ;;  %v6294_v15 = vld [vmem:[#allocation74_spill] sm:$0xff] }
 0x817   :  { %2490 = vmatpush1.bf16.msra.mxu0 %v5030_v14  ;;  %2531 = vmatpush1.bf16.msra.mxu1 %v5033_v16  ;;  %v6295_v14 = vld [vmem:[#allocation72_spill] sm:$0xff]  ;;  %v6296_v16 = vld [vmem:[#allocation46_spill] sm:$0xff] }
 0x818   :  { %2587 = vmatprep.subr.bf16.mxu0 %v5152_v38  ;;  %2628 = vmatprep.subr.bf16.mxu1 %v5155_v27  ;;  %v6310_v38 = vld [vmem:[#allocation56_spill] sm:$0xff]  ;;  %v6311_v27 = vld [vmem:[#allocation57_spill] sm:$0xff] }
 0x81a   :  { %2508 = vmatmul.mubr.bf16.vlgmr.msra.gmra.mxu0 %v2367_v62  ;;  %2549 = vmatmul.mubr.bf16.vlgmr.msra.gmra.mxu1 %v2367_v62  ;;  %v6333_v62 = vld [vmem:[#allocation18_spill] sm:$0xff] }
 0x81b   :  { %2588 = vmatpush1.bf16.msra.mxu0 %v5158_v28  ;;  %2629 = vmatpush1.bf16.msra.mxu1 %v5161_v29  ;;  %v6312_v28 = vld [vmem:[#allocation58_spill] sm:$0xff]  ;;  %v6313_v29 = vld [vmem:[#allocation59_spill] sm:$0xff] }
 0x81c   :  { %2589 = vmatprep.subr.bf16.mxu0 %v5164_v33  ;;  %2630 = vmatprep.subr.bf16.mxu1 %v5167_v34  ;;  %v6314_v33 = vld [vmem:[#allocation60_spill] sm:$0xff]  ;;  %v6315_v34 = vld [vmem:[#allocation61_spill] sm:$0xff] }
 0x81f   :  { %2590 = vmatpush1.bf16.msra.mxu0 %v5170_v36  ;;  %2631 = vmatpush1.bf16.msra.mxu1 %v5173_v39  ;;  %v6316_v36 = vld [vmem:[#allocation62_spill] sm:$0xff]  ;;  %v6317_v39 = vld [vmem:[#allocation63_spill] sm:$0xff] }
 0x820   :  { %2591 = vmatprep.subr.bf16.mxu0 %v5176_v42  ;;  %2632 = vmatprep.subr.bf16.mxu1 %v5179_v32  ;;  %v6318_v42 = vld [vmem:[#allocation64_spill] sm:$0xff]  ;;  %v6319_v32 = vld [vmem:[#allocation65_spill] sm:$0xff] }
 0x823   :  { %2592 = vmatpush1.bf16.msra.mxu0 %v6278_v11  ;;  %2633 = vmatpush1.bf16.msra.mxu1 %v6279_v30 }
 0x824   :  { %2593 = vmatprep.subr.bf16.mxu0 %v6280_v50  ;;  %2634 = vmatprep.subr.bf16.mxu1 %v6281_v24 }
 0x827   :  { %2594 = vmatpush1.bf16.msra.mxu0 %v6282_v20  ;;  %2635 = vmatpush1.bf16.msra.mxu1 %v6283_v40 }
 0x828   :  { %2595 = vmatprep.subr.bf16.mxu0 %v6284_v55  ;;  %2636 = vmatprep.subr.bf16.mxu1 %v6285_v21  ;;  %v6334_v55 = vld [vmem:[#allocation19_spill] sm:$0xff] }
 0x82b   :  { %2596 = vmatpush1.bf16.msra.mxu0 %v6286_v23  ;;  %2637 = vmatpush1.bf16.msra.mxu1 %v6287_v17 }
 0x82c   :  { %2597 = vmatprep.subr.bf16.mxu0 %v6288_v52  ;;  %2638 = vmatprep.subr.bf16.mxu1 %v6289_v53  ;;  %v6335_v52 = vld [vmem:[#allocation20_spill] sm:$0xff] }
 0x82f   :  { %2598 = vmatpush1.bf16.msra.mxu0 %v6290_v51  ;;  %2639 = vmatpush1.bf16.msra.mxu1 %v6291_v54 }
 0x830   :  { %2599 = vmatprep.subr.bf16.mxu0 %v6292_v37  ;;  %2640 = vmatprep.subr.bf16.mxu1 %v6293_v35 }
 0x833   :  { %2600 = vmatpush1.bf16.msra.mxu0 %v6294_v15  ;;  %2641 = vmatpush1.bf16.msra.mxu1 %v6295_v14 }
 0x834   :  { %2601 = vmatprep.subr.bf16.mxu0 %v6296_v16  ;;  %2642 = vmatprep.subr.bf16.mxu1 %v6297_v41  ;;  %v6336_v16 = vld [vmem:[#allocation95_spill] sm:$0xff] }
 0x837   :  { %2602 = vmatpush1.bf16.msra.mxu0 %v6298_v49  ;;  %2643 = vmatpush1.bf16.msra.mxu1 %v6299_v59 }
 0x838   :  { %2603 = vmatprep.subr.bf16.mxu0 %v6300_v57  ;;  %2644 = vmatprep.subr.bf16.mxu1 %v6301_v2 }
 0x83b   :  { %2604 = vmatpush2.bf16.msra.mxu0 %v6302_v4  ;;  %2645 = vmatpush2.bf16.msra.mxu1 %v6303_v58  ;;  %v6337_v58 = vld [vmem:[#allocation97_spill] sm:$0xff] }
 0x83c   :  { %2605 = vmatprep.subr.bf16.mxu0 %v6304_v60  ;;  %2646 = vmatprep.subr.bf16.mxu1 %v6305_v0 }
 0x83f   :  { %2606 = vmatpush2.bf16.msra.mxu0 %v6306_v9  ;;  %2647 = vmatpush2.bf16.msra.mxu1 %v6307_v63 }
 0x840   :  { %2607 = vmatprep.subr.bf16.mxu0 %v6308_v8  ;;  %2648 = vmatprep.subr.bf16.mxu1 %v6309_v19 }
 0x843   :  { %2608 = vmatpush2.bf16.msra.mxu0 %v6310_v38  ;;  %2649 = vmatpush2.bf16.msra.mxu1 %v6311_v27 }
 0x844   :  { %2609 = vmatprep.subr.bf16.mxu0 %v6312_v28  ;;  %2650 = vmatprep.subr.bf16.mxu1 %v6313_v29 }
 0x847   :  { %2610 = vmatpush2.bf16.msra.mxu0 %v6314_v33  ;;  %2651 = vmatpush2.bf16.msra.mxu1 %v6315_v34  ;;  %v6338_v34 = vld [vmem:[#allocation98_spill] sm:$0xff] }
 0x848   :  { %2611 = vmatprep.subr.bf16.mxu0 %v6316_v36  ;;  %2652 = vmatprep.subr.bf16.mxu1 %v6317_v39  ;;  %v6339_v39 = vld [vmem:[#allocation96_spill] sm:$0xff] }
 0x84b   :  { %2612 = vmatpush2.bf16.msra.mxu0 %v6318_v42  ;;  %2653 = vmatpush2.bf16.msra.mxu1 %v6319_v32 }
 0x84c   :  { %2613 = vmatprep.subr.bf16.mxu0 %v6320_v12  ;;  %2654 = vmatprep.subr.bf16.mxu1 %v6321_v44 }
 0x84f   :  { %2614 = vmatpush2.bf16.msra.mxu0 %v6322_v1  ;;  %2655 = vmatpush2.bf16.msra.mxu1 %v6323_v46 }
 0x850   :  { %2615 = vmatprep.subr.bf16.mxu0 %v6324_v25  ;;  %2656 = vmatprep.subr.bf16.mxu1 %v6325_v26 }
 0x853   :  { %2616 = vmatpush2.bf16.msra.mxu0 %v6326_v10  ;;  %2657 = vmatpush2.bf16.msra.mxu1 %v6327_v5 }
 0x854   :  { %2617 = vmatprep.subr.bf16.mxu0 %v6328_v61  ;;  %2658 = vmatprep.subr.bf16.mxu1 %v6329_v3 }
 0x857   :  { %2618 = vmatpush2.bf16.msra.mxu0 %v6330_v56  ;;  %2659 = vmatpush2.bf16.msra.mxu1 %v6331_v31 }
 0x8ba   :  { %v2403_v43 = vpop.f32.mrf.mxu0  ;;  %v2444_v47 = vpop.f32.mrf.mxu1 }
 0x8bb   :  { %v2404_v7 = vadd.f32 %v2403_v43, %v6332_v45  ;;  %v2445_v53 = vadd.f32 %v2444_v47, %v6335_v52 }
 0x8bc   :  { %v2405_v22 = vpop.f32.mrf.mxu0  ;;  %v2446_v6 = vpop.f32.mrf.mxu1 }
 0x8bd   :  { %v2980_v18 = vmul.f32 -1.442695, %v2404_v7  ;;  %v2406_v11 = vadd.f32 %v2405_v22, %v6333_v62  ;;  %v2447_v21 = vadd.f32 %v2446_v6, %v6334_v55 }
 0x8be   :  { %v2407_v30 = vpop.f32.mrf.mxu0  ;;  %v2448_v50 = vpop.f32.mrf.mxu1 }
 0x8bf   :  { %3415 = vpow2.f32 %v2980_v18  ;;  %v2981_v24 = vmul.f32 -1.442695, %v2406_v11  ;;  %v2982_v23 = vmul.f32 -1.442695, %v2447_v21  ;;  %v3199_v30 = vld [vmem:[#allocation8 + $0x38] sm:$0xff]   ;;  %v3772_v50 = vmov 0.0  }
 0x8c0   :  { %v2408_v20 = vpop.f32.mrf.mxu0  ;;  %v2449_v40 = vpop.f32.mrf.mxu1  ;;  %3007 = vmatprep.subr.bf16.mxu0 %v3772_v50  ;;  %v3204_v21 = vld [vmem:[#allocation8 + $0x10] sm:$0xff]  }
 0x8c1   :  { %3417 = vpow2.f32 %v2981_v24  ;;  %v3200_v24 = vld [vmem:[#allocation8 + $0x30] sm:$0xff]   ;;  %v3201_v20 = vld [vmem:[#allocation8 + $0x28] sm:$0xff]   ;;  %v3203_v40 = vld [vmem:[#allocation8 + $0x18] sm:$0xff]  }
 0x8c2   :  { %3419 = vpow2.f32 %v2982_v23  ;;  %v3205_v23 = vld [vmem:[#allocation8 + $0x8] sm:$0xff]  }
 0x8cc   :  { %v3416_v17 = vpop.eup %3415 }
 0x8cd   :  { %v2454_v51 = vadd.f32 1.0, %v3416_v17  ;;  %v3206_v17 = vld [vmem:[#allocation8] sm:$0xff]  }
 0x8ce   :  { %v3418_v54 = vpop.eup %3417 }
 0x8cf   :  { %3421 = vrcp.f32 %v2454_v51  ;;  %v2460_v37 = vadd.f32 1.0, %v3418_v54  ;;  %v3420_v14 = vpop.eup %3419 }
 0x8d0   :  { %3423 = vtanh.f32 %v2445_v53  ;;  %v2467_v9 = vadd.f32 1.0, %v3420_v14 }
 0x8d1   :  { %3425 = vrcp.f32 %v2460_v37 }
 0x8da   :  { %v2509_v35 = vpop.f32.mrf.mxu0  ;;  %v2550_v15 = vpop.f32.mrf.mxu1 }
 0x8db   :  { %v2557_v41 = vadd.f32 %v2509_v35, %v6336_v16  ;;  %v2559_v42 = vadd.f32 %v2550_v15, %v6339_v39  ;;  %v2989_v39 = vld [vmem:[%s5489_s7] ss:$0 sm:$0xff] }
 0x8dc   :  { %v3422_v49 = vpop.eup %3421  ;;  %v2511_v59 = vpop.f32.mrf.mxu0 }
 0x8dd   :  { %v2552_v57 = vpop.f32.mrf.mxu1  ;;  %v3424_v2 = vpop.eup %3423  ;;  %v2983_v4 = vmul.f32 -1.442695, %v2557_v41  ;;  %v2558_v60 = vadd.f32 %v2511_v59, %v6337_v58 }
 0x8de   :  { %v3426_v0 = vpop.eup %3425  ;;  %v2513_v63 = vpop.f32.mrf.mxu0  ;;  %v2471_v19 = vmul.f32 %v3424_v2, %v3422_v49  ;;  %v2560_v36 = vadd.f32 %v2552_v57, %v6338_v34 }
 0x8df   :  { %v2554_v8 = vpop.f32.mrf.mxu1  ;;  %v2470_v38 = vmul.f32 %v3426_v0, %v5353_v48  ;;  %3427 = vpow2.f32 %v2983_v4  ;;  %v2984_v27 = vmul.f32 -1.442695, %v2558_v60 }
 0x8e0   :  { %v2514_v28 = vpop.f32.mrf.mxu0  ;;  %v2985_v32 = vmul.f32 -1.442695, %v2560_v36 }
 0x8e1   :  { %v2555_v29 = vpop.f32.mrf.mxu1  ;;  %3429 = vpow2.f32 %v2984_v27  ;;  %v5465_v33 = vadd.f32 %v2471_v19, %v2470_v38 }
 0x8e2   :  { %3431 = vrcp.f32 %v2467_v9 }
 0x8e3   :  { %3433 = vtanh.f32 %v5465_v33 }
 0x8e4   :  { %3435 = vtanh.f32 %v2559_v42 }
 0x8e5   :  { %3437 = vpow2.f32 %v2985_v32 }
 0x8ec   :  { %v3428_v12 = vpop.eup %3427 }
 0x8ed   :  { %v2564_v44 = vadd.f32 1.0, %v3428_v12 }
 0x8ee   :  { %v3430_v1 = vpop.eup %3429 }
 0x8ef   :  { %v3432_v48 = vpop.eup %3431  ;;  %3439 = vrcp.f32 %v2564_v44  ;;  %v2570_v46 = vadd.f32 1.0, %v3430_v1 }
 0x8f0   :  { %v3434_v25 = vpop.eup %3433 }
 0x8f1   :  { %3441 = vrcp.f32 %v2570_v46  ;;  %v2474_v26 = vmul.f32 %v3434_v25, %v3432_v48  ;;  %v3436_v5 = vpop.eup %3435 }
 0x8f2   :  { %v3438_v61 = vpop.eup %3437 }
 0x8f3   :  { %v2586_v10 = vpack.c.bf16 %v2474_v26, %v2474_v26  ;;  %v2577_v43 = vadd.f32 1.0, %v3438_v61 }
 0x8f5   :  { %2619 = vmatprep.mubr.bf16.mxu0 %v2586_v10  ;;  %2660 = vmatprep.mubr.bf16.mxu1 %v2586_v10  ;;  %3443 = vrcp.f32 %v2577_v43 }
 0x8fc   :  { %v3440_v3 = vpop.eup %3439 }
 0x8fd   :  { %v2581_v56 = vmul.f32 %v3440_v3, %v3436_v5 }
 0x8fe   :  { %v3442_v31 = vpop.eup %3441 }
 0x8ff   :  { %v2580_v47 = vmul.f32 %v3442_v31, %v5359_v13  ;;  %v3202_v13 = vld [vmem:[#allocation8 + $0x20] sm:$0xff]  }
 0x901   :  { %v2582_v7 = vadd.f32 %v2581_v56, %v2580_v47 }
 0x902   :  { %v3444_v22 = vpop.eup %3443 }
 0x903   :  { %3445 = vtanh.f32 %v2582_v7 }
 0x910   :  { %v3446_v6 = vpop.eup %3445 }
 0x911   :  { %v2584_v18 = vmul.f32 %v3446_v6, %v3444_v22 }
 0x913   :  { %v2585_v11 = vpack.c.bf16 %v2584_v18, %v2584_v18 }
 0x915   :  { %2620 = vmatmul.mubr.bf16.vlgmr.msra.gmra.mxu0 %v2585_v11  ;;  %2661 = vmatmul.mubr.bf16.vlgmr.msra.gmra.mxu1 %v2585_v11 }
 0x916   :  { %3008 = vmatpush3.bf16.msra.mxu0 %v3199_v30  ;;  %3023 = vmatprep.mubr.msk.bf16.mxu0 %vm3773_vm2, %v3772_v50 }
 0x917   :  { %3009 = vmatprep.subr.bf16.mxu0 %v3772_v50 }
 0x91a   :  { %3010 = vmatpush3.bf16.msra.mxu0 %v3200_v24 }
 0x91b   :  { %3011 = vmatprep.subr.bf16.mxu0 %v3772_v50 }
 0x91e   :  { %3012 = vmatpush3.bf16.msra.mxu0 %v3201_v20 }
 0x91f   :  { %3013 = vmatprep.subr.bf16.mxu0 %v3772_v50 }
 0x922   :  { %3014 = vmatpush3.bf16.msra.mxu0 %v3202_v13 }
 0x923   :  { %3015 = vmatprep.subr.bf16.mxu0 %v3772_v50 }
 0x926   :  { %3016 = vmatpush3.bf16.msra.mxu0 %v3203_v40 }
 0x927   :  { %3017 = vmatprep.subr.bf16.mxu0 %v3772_v50 }
 0x92a   :  { %3018 = vmatpush3.bf16.msra.mxu0 %v3204_v21 }
 0x92b   :  { %3019 = vmatprep.subr.bf16.mxu0 %v3772_v50 }
 0x92e   :  { %3020 = vmatpush3.bf16.msra.mxu0 %v3205_v23 }
 0x92f   :  { %3021 = vmatprep.subr.bf16.mxu0 %v3772_v50 }
 0x932   :  { %3022 = vmatpush3.bf16.msra.mxu0 %v3206_v17 }
 0x9d5   :  { %v2621_v53 = vpop.f32.mrf.mxu0  ;;  %v2662_v51 = vpop.f32.mrf.mxu1 }
 0x9d6   :  { %v2622_v54 = vadd.f32 %v2621_v53, %v6332_v45  ;;  %v2663_v60 = vadd.f32 %v2662_v51, %v6335_v52 }
 0x9d7   :  { %v2623_v37 = vpop.f32.mrf.mxu0  ;;  %v2664_v35 = vpop.f32.mrf.mxu1 }
 0x9d8   :  { %v2986_v15 = vmul.f32 -1.442695, %v2622_v54  ;;  %v2624_v14 = vadd.f32 %v2623_v37, %v6333_v62  ;;  %v2665_v2 = vadd.f32 %v2664_v35, %v6334_v55 }
 0x9d9   :  { %v2625_v16 = vpop.f32.mrf.mxu0  ;;  %v2666_v41 = vpop.f32.mrf.mxu1 }
 0x9da   :  { %3447 = vpow2.f32 %v2986_v15  ;;  %v2987_v49 = vmul.f32 -1.442695, %v2624_v14  ;;  %v2988_v4 = vmul.f32 -1.442695, %v2665_v2 }
 0x9db   :  { %v2626_v59 = vpop.f32.mrf.mxu0  ;;  %v2667_v57 = vpop.f32.mrf.mxu1 }
 0x9dc   :  { %3449 = vpow2.f32 %v2987_v49 }
 0x9dd   :  { %3451 = vpow2.f32 %v2988_v4 }
 0x9e7   :  { %v3448_v58 = vpop.eup %3447 }
 0x9e8   :  { %v2672_v0 = vadd.f32 1.0, %v3448_v58 }
 0x9e9   :  { %v3450_v45 = vpop.eup %3449 }
 0x9ea   :  { %3453 = vrcp.f32 %v2672_v0  ;;  %v2678_v9 = vadd.f32 1.0, %v3450_v45  ;;  %v3452_v62 = vpop.eup %3451 }
 0x9eb   :  { %3455 = vtanh.f32 %v2663_v60  ;;  %v2685_v38 = vadd.f32 1.0, %v3452_v62 }
 0x9ec   :  { %3457 = vrcp.f32 %v2678_v9 }
 0x9ed   :  { %3459 = vrcp.f32 %v2685_v38 }
 0x9f7   :  { %v3454_v63 = vpop.eup %3453 }
 0x9f8   :  { %v3456_v8 = vpop.eup %3455 }
 0x9f9   :  { %v3458_v19 = vpop.eup %3457  ;;  %v2689_v27 = vmul.f32 %v3456_v8, %v3454_v63 }
 0x9fa   :  { %v2688_v28 = vmul.f32 %v3458_v19, %v5465_v33  ;;  %v3460_v29 = vpop.eup %3459 }
 0x9fc   :  { %v2690_v55 = vadd.f32 %v2689_v27, %v2688_v28 }
 0x9fe   :  { %3461 = vtanh.f32 %v2690_v55 }
 0xa0b   :  { %v3462_v52 = vpop.eup %3461 }
 0xa0c   :  { %v2692_v34 = vmul.f32 %v3462_v52, %v3460_v29 }
 0xa0e   :  { %v2693_v36 = vpack.c.bf16 %v2692_v34, %v2692_v34 }
 0xa10   :  { %3024 = vmatmul.mubr.bf16.vlgmr.msra.gmra.mxu0 %v2693_v36 }
 0xad0   :  { %v2799_v42 = vpop.f32.mrf.mxu0 }
 0xad1   :  { %v2800_v32 = vadd.f32 %v2989_v39, %v2799_v42 }
 0xad2   :  { %v3025_v12 = vpop.f32.mrf.mxu0 }
 0xad3   :  { %2805 = vst [vmem:[#allocation10] sm:$0xff] %v2800_v32 }
 0xad4   :  { %v2802_v33 = vpop.f32.mrf.mxu0 }
 0xad5   :  { %3746 = shalt.err (!%p3743_p10)
}
 0xad6   :  { %2815 = dma.vmem_to_hbm [thread:$0]  %s2813_s15, 128, %s5490_s8, [#allocation4]   ;;  %v3026_v44 = vpop.f32.mrf.mxu0 }
 0xad7   :  { %3761 = dma.done.wait [#allocation4], 128  }
 0xad8   :  { %3762 = vsyncadd [#allocation4], 4294967168 }
 0xad9   :  { %2819 = vsyncpa [#allocation3], 1 }
 0xada   :  { %2820 = vsyncpa [#allocation6], 1 }
 0xadb   :  { %2821 = vsyncpa [#allocation9], 1 }
 0xadc   :  { %2822 = vsyncpa [#allocation4], 1 }

</bundles_post_ra>
